<compile_context>
chip_gen: v7x
topology: tpu7x:2x2x1
jax: 0.10.0
libtpu: 0.0.40
codegen_flags: <defaults>
</compile_context>

<pallas_src>
import math

import numpy as np
import jax
import jax.numpy as jnp
from jax.experimental import pallas as pl
from jax.experimental.pallas import tpu as pltpu

VMEM_LIMIT_BYTES = 32 * 1024 * 1024
PMAX = 2  # max halo (K=5 -> pad 2)


# ----------------------------------------------------------------------------
# Fused kernel body (built as a closure over static config)
# ----------------------------------------------------------------------------
def _build_kernel(H, W, C, specs):
    WC = W * C

    def kernel(x_ref, pcat_ref, w1x1_ref, wpath_ref, wsep_ref, wpool_ref,
               shifts_ref, invcnt_ref, out_ref, pad_ref):
        # Zero the H-halo scratch once per grid step; only the interior rows
        # [PMAX : PMAX+H) are ever rewritten afterwards, so the halo stays 0.
        pad_ref[...] = jnp.zeros((H + 2 * PMAX, WC), jnp.float32)

        def mm(a_bf16, w_bf16):
            return jnp.dot(a_bf16, w_bf16, preferred_element_type=jnp.float32)

        def sep_stage(x, K, base, sh):
            # ReLU -> (depthwise KxK + pointwise 1x1 + BN scale) folded into K
            # lane-packed matrices -> + BN shift.
            P = K // 2
            pad_ref[PMAX:PMAX + H, :] = jnp.maximum(x, 0.0)
            acc = None
            for dy in range(K):
                r0 = PMAX - P + dy
                xs = pad_ref[r0:r0 + H, :].astype(jnp.bfloat16)
                term = mm(xs, wsep_ref[base + dy])
                acc = term if acc is None else acc + term
            return acc + shifts_ref[sh:sh + 1, :]

        def branch(x, sp):
            h = sep_stage(x, sp["K"], sp["base1"], sp["sh1"])
            return sep_stage(h, sp["K"], sp["base2"], sp["sh2"])

        def avgpool3(v):
            # 3x3 stride-1 avg pool, count_include_pad=False.
            pad_ref[PMAX:PMAX + H, :] = v
            wp = wpool_ref[...]
            tot = None
            for dy in range(3):
                r0 = PMAX - 1 + dy
                xs = pad_ref[r0:r0 + H, :].astype(jnp.bfloat16)
                term = mm(xs, wp)
                tot = term if tot is None else tot + term
            return tot * invcnt_ref[...]

        # x_right = BN(conv1x1(ReLU(x)))          (scale folded into weights)
        x_right = mm(jnp.maximum(x_ref[0], 0.0).astype(jnp.bfloat16),
                     w1x1_ref[...]) + shifts_ref[0:1, :]
        # x_left = final_path_bn(concat(path1(relu(xp)), path2(relu(xp))))
        x_left = mm(jnp.maximum(pcat_ref[0], 0.0).astype(jnp.bfloat16),
                    wpath_ref[...]) + shifts_ref[1:2, :]

        c0l, c0r, c1l, c1r, c4l = specs
        comb0 = branch(x_right, c0l) + branch(x_left, c0r)
        comb1 = branch(x_left, c1l) + branch(x_left, c1r)
        comb2 = avgpool3(x_right) + x_left
        comb3 = 2.0 * avgpool3(x_left)
        comb4 = branch(x_right, c4l) + x_right

        out_ref[0, 0, :, :] = x_left
        out_ref[0, 1, :, :] = comb0
        out_ref[0, 2, :, :] = comb1
        out_ref[0, 3, :, :] = comb2
        out_ref[0, 4, :, :] = comb3
        out_ref[0, 5, :, :] = comb4

    return kernel


# ----------------------------------------------------------------------------
# Wrapper-side parameter packing (lane-packed, BN-scale folded, bf16 weights)
# ----------------------------------------------------------------------------
def _pack_params(params, H, W):
    C = params["conv_1x1_w"].shape[1]
    WC = W * C
    f32 = jnp.float32
    eyeW = jnp.eye(W, dtype=f32)
    eyeC = jnp.eye(C, dtype=f32)

    def bigpw(mat, scale):
        # (cin, cout) 1x1 conv with BN scale folded -> block-diag (W*cin, W*cout)
        return jnp.kron(eyeW, mat * jnp.reshape(scale, (1, -1)))

    def trow(v):
        # per-channel row -> packed (1, W*cout) row (index w*cout + c)
        return jnp.tile(jnp.reshape(v, (1, -1)), (1, W))

    # conv_1x1 (ReLU -> 1x1 -> BN)
    s0, b0 = params["conv_1x1_bn"]
    w1x1 = bigpw(params["conv_1x1_w"], s0).astype(jnp.bfloat16)
    shifts = [trow(b0)]

    # path_1 / path_2 / final_path_bn as one block-diagonal 1x1 conv over the
    # per-pixel [p1 | p2] channel concat.
    fs, fb = params["final_path_bn"]
    w1, w2 = params["path1_w"], params["path2_w"]
    in_l, Cl = w1.shape
    z = jnp.zeros((in_l, Cl), f32)
    wcat = jnp.concatenate(
        [jnp.concatenate([w1, z], axis=1),
         jnp.concatenate([z, w2], axis=1)], axis=0)          # (2*in_l, 2*Cl)
    wpath = bigpw(wcat, fs).astype(jnp.bfloat16)
    shifts.append(trow(fb))

    def stage_mats(dw, pw, scale, K):
        # Fold depthwise taps (for each kernel row dy) + pointwise + BN scale
        # into K lane-packed (W*C, W*C) matrices: A_dy = M_dy @ kron(I_W, pw*s).
        P = K // 2
        sel = np.zeros((K, W, W), np.float32)
        for dx in range(K):
            for w in range(W):
                wp = w + dx - P
                if 0 <= wp < W:
                    sel[dx, wp, w] = 1.0
        taps = dw.reshape(K, K, C)                                  # [dy, dx, c]
        tmp = jnp.einsum("xuw,yxc->yuwc", jnp.asarray(sel), taps)   # [dy, wp, w, c]
        M = jnp.einsum("yuwc,vc->yuvwc", tmp, eyeC).reshape(K, WC, WC)
        A = jnp.einsum("yij,jk->yik", M, bigpw(pw, scale))
        return A.astype(jnp.bfloat16)

    wsep_blocks = []
    specs = []
    base = 0
    sh = 2
    for name in ("c0l", "c0r", "c1l", "c1r", "c4l"):
        p = params[name]
        K = int(math.isqrt(p["dw1"].shape[0]))
        sp = {"K": K}
        for t in (1, 2):
            wsep_blocks.append(stage_mats(p[f"dw{t}"], p[f"pw{t}"],
                                          p[f"bn{t}"][0], K))
            shifts.append(trow(p[f"bn{t}"][1]))
            sp[f"base{t}"] = base
            sp[f"sh{t}"] = sh
            base += K
            sh += 1
        specs.append(sp)

    wsep = jnp.concatenate(wsep_blocks, axis=0)       # (sum K, WC, WC) bf16
    shifts_all = jnp.concatenate(shifts, axis=0)      # (12, WC) f32
    pad = (-shifts_all.shape[0]) % 8
    if pad:
        shifts_all = jnp.pad(shifts_all, ((0, pad), (0, 0)))
    return w1x1, wpath, wsep, shifts_all, specs


def _pool_constants(H, W, C):
    # Banded 0/1 matrix doing the W-direction 3-tap sum in packed layout, and
    # the (H, W*C) inverse valid-count map (count_include_pad=False).
    sel = np.zeros((W, W), np.float32)
    for dx in range(3):
        for w in range(W):
            wp = w + dx - 1
            if 0 <= wp < W:
                sel[wp, w] += 1.0
    wpool = np.kron(sel, np.eye(C, dtype=np.float32))               # (WC, WC)
    hcnt = np.array([3 - (i == 0) - (i == H - 1) for i in range(H)], np.float32)
    wcnt = np.array([3 - (i == 0) - (i == W - 1) for i in range(W)], np.float32)
    inv = 1.0 / np.outer(hcnt, wcnt)                                # (H, W)
    invcnt = np.repeat(inv, C, axis=1)                              # (H, W*C)
    return jnp.asarray(wpool, jnp.bfloat16), jnp.asarray(invcnt, jnp.float32)


# ----------------------------------------------------------------------------
# Forward pass (one pallas_call per forward)
# ----------------------------------------------------------------------------
def first_cell_forward(params, x_nchw, xprev_nchw):
    x = jnp.transpose(x_nchw, (0, 2, 3, 1)).astype(jnp.float32)     # NHWC
    xp = jnp.transpose(xprev_nchw, (0, 2, 3, 1)).astype(jnp.float32)
    N, H, W, Cin_r = x.shape
    _, Hp, Wp, Cin_l = xp.shape
    assert Hp % 2 == 0 and Wp % 2 == 0
    assert Hp == 2 * H and Wp == 2 * W
    C = params["conv_1x1_w"].shape[1]
    WC = W * C

    # path_1 / path_2 stride-2 subsampling (AvgPool2d(k=1, stride=2)).
    p1 = xp[:, ::2, ::2, :]
    p2 = xp[:, 1::2, 1::2, :]     # x_prev[:, :, 1:, 1:] then ceil-mode stride-2
    pcat = jnp.concatenate([p1, p2], axis=-1).reshape(N, H, W * 2 * Cin_l)
    x_packed = x.reshape(N, H, W * Cin_r)

    w1x1, wpath, wsep, shifts_all, specs = _pack_params(params, H, W)
    wpool, invcnt = _pool_constants(H, W, C)

    kernel = _build_kernel(H, W, C, specs)

    out_packed = pl.pallas_call(
        kernel,
        out_shape=jax.ShapeDtypeStruct((N, 6, H, WC), jnp.float32),
        grid=(N,),
        in_specs=[
            pl.BlockSpec((1, H, W * Cin_r), lambda n: (n, 0, 0)),
            pl.BlockSpec((1, H, W * 2 * Cin_l), lambda n: (n, 0, 0)),
            pl.BlockSpec(w1x1.shape, lambda n: (0, 0)),
            pl.BlockSpec(wpath.shape, lambda n: (0, 0)),
            pl.BlockSpec(wsep.shape, lambda n: (0, 0, 0)),
            pl.BlockSpec(wpool.shape, lambda n: (0, 0)),
            pl.BlockSpec(shifts_all.shape, lambda n: (0, 0)),
            pl.BlockSpec(invcnt.shape, lambda n: (0, 0)),
        ],
        out_specs=pl.BlockSpec((1, 6, H, WC), lambda n: (n, 0, 0, 0)),
        scratch_shapes=[pltpu.VMEM((H + 2 * PMAX, WC), jnp.float32)],
        compiler_params=pltpu.CompilerParams(
            dimension_semantics=("parallel",),
            vmem_limit_bytes=VMEM_LIMIT_BYTES,
        ),
    )(x_packed, pcat, w1x1, wpath, wsep, wpool, shifts_all, invcnt)

    # packed (N, 6, H, W*C) -> NCHW (N, 6*C, H, W)
    out = out_packed.reshape(N, 6, H, W, C).transpose(0, 1, 4, 2, 3)
    return out.reshape(N, 6 * C, H, W)


# ----------------------------------------------------------------------------
# Parameter construction (deterministic, synthetic)
# ----------------------------------------------------------------------------
class KeyGen:
    def __init__(self, key):
        self.key = key
        self.i = 0

    def __call__(self):
        self.i += 1
        return jax.random.fold_in(self.key, self.i)


def init_bn(kg, C):
    eps = 1e-3
    gamma = 1.0 + 0.1 * jax.random.normal(kg(), (C,), jnp.float32)
    beta = 0.1 * jax.random.normal(kg(), (C,), jnp.float32)
    mean = 0.1 * jax.random.normal(kg(), (C,), jnp.float32)
    var = 1.0 + 0.1 * jax.random.uniform(kg(), (C,), jnp.float32)
    scale = gamma / jnp.sqrt(var + eps)
    shift = beta - mean * scale
    return scale.reshape(1, C), shift.reshape(1, C)


def init_conv1x1(kg, cin, cout):
    # PyTorch weight (Cout, Cin, 1, 1) stored directly as a (Cin, Cout) matrix.
    return 0.1 * jax.random.normal(kg(), (cin, cout), jnp.float32)


def init_branch_sep(kg, cin, cout, K):
    # K is recovered statically from dw.shape[0] == K*K (never traced).
    return dict(
        dw1=0.1 * jax.random.normal(kg(), (K * K, cin), jnp.float32),
        pw1=init_conv1x1(kg, cin, cin),
        bn1=init_bn(kg, cin),
        dw2=0.1 * jax.random.normal(kg(), (K * K, cin), jnp.float32),
        pw2=init_conv1x1(kg, cin, cout),
        bn2=init_bn(kg, cout),
    )


def init_first_cell(key, in_ch_left, out_ch_left, in_ch_right, out_ch_right):
    assert 2 * out_ch_left == out_ch_right, "NASNet FirstCell needs 2*out_left == out_right"
    kg = KeyGen(key)
    C = out_ch_right
    return dict(
        conv_1x1_w=init_conv1x1(kg, in_ch_right, out_ch_right),
        conv_1x1_bn=init_bn(kg, out_ch_right),
        path1_w=init_conv1x1(kg, in_ch_left, out_ch_left),
        path2_w=init_conv1x1(kg, in_ch_left, out_ch_left),
        final_path_bn=init_bn(kg, 2 * out_ch_left),
        c0l=init_branch_sep(kg, C, C, 5),
        c0r=init_branch_sep(kg, C, C, 3),
        c1l=init_branch_sep(kg, C, C, 5),
        c1r=init_branch_sep(kg, C, C, 3),
        c4l=init_branch_sep(kg, C, C, 3),
    )


def _branch_k(p):
    return int(math.isqrt(p["dw1"].shape[0]))


# ----------------------------------------------------------------------------
# Plain-JAX f32 reference (numerical sanity check)
# ----------------------------------------------------------------------------
def _ref_sep_stage(x, dw, pw, scale, shift, K):
    N, H, W, C = x.shape
    P = K // 2
    xr = jnp.maximum(x, 0.0)
    xpd = jnp.pad(xr, ((0, 0), (P, P), (P, P), (0, 0)))
    acc = jnp.zeros_like(x)
    for dy in range(K):
        for dx in range(K):
            tap = dw[dy * K + dx].reshape(1, 1, 1, C)
            acc = acc + xpd[:, dy:dy + H, dx:dx + W, :] * tap
    y = acc.reshape(-1, C) @ pw
    y = y * scale + shift
    return y.reshape(N, H, W, -1)


def _ref_branch(x, p):
    K = _branch_k(p)
    h = _ref_sep_stage(x, p["dw1"], p["pw1"], p["bn1"][0], p["bn1"][1], K)
    return _ref_sep_stage(h, p["dw2"], p["pw2"], p["bn2"][0], p["bn2"][1], K)


def _ref_avgpool(x):
    N, H, W, C = x.shape
    xpd = jnp.pad(x, ((0, 0), (1, 1), (1, 1), (0, 0)))
    ones = jnp.pad(jnp.ones_like(x), ((0, 0), (1, 1), (1, 1), (0, 0)))
    acc = jnp.zeros_like(x)
    cnt = jnp.zeros_like(x)
    for dy in range(3):
        for dx in range(3):
            acc = acc + xpd[:, dy:dy + H, dx:dx + W, :]
            cnt = cnt + ones[:, dy:dy + H, dx:dx + W, :]
    return acc / cnt


def first_cell_reference(params, x_nchw, xprev_nchw):
    x = jnp.transpose(x_nchw, (0, 2, 3, 1)).astype(jnp.float32)
    xp = jnp.transpose(xprev_nchw, (0, 2, 3, 1)).astype(jnp.float32)
    N, H, W, _ = x.shape

    p1 = jnp.maximum(xp[:, ::2, ::2, :], 0.0)
    p2 = jnp.maximum(xp[:, 1::2, 1::2, :], 0.0)
    fs, fb = params["final_path_bn"]
    y1 = p1.reshape(-1, p1.shape[-1]) @ params["path1_w"]
    y2 = p2.reshape(-1, p2.shape[-1]) @ params["path2_w"]
    x_left = (jnp.concatenate([y1, y2], axis=-1) * fs + fb).reshape(N, H, W, -1)

    bs, bb = params["conv_1x1_bn"]
    xr = jnp.maximum(x, 0.0)
    x_right = ((xr.reshape(-1, xr.shape[-1]) @ params["conv_1x1_w"]) * bs + bb
               ).reshape(N, H, W, -1)

    comb0 = _ref_branch(x_right, params["c0l"]) + _ref_branch(x_left, params["c0r"])
    comb1 = _ref_branch(x_left, params["c1l"]) + _ref_branch(x_left, params["c1r"])
    comb2 = _ref_avgpool(x_right) + x_left
    comb3 = 2.0 * _ref_avgpool(x_left)
    comb4 = _ref_branch(x_right, params["c4l"]) + x_right

    out = jnp.concatenate([x_left, comb0, comb1, comb2, comb3, comb4], axis=-1)
    return jnp.transpose(out, (0, 3, 1, 2))


# ----------------------------------------------------------------------------
# Main
# ----------------------------------------------------------------------------
if __name__ == "__main__":
    # FirstCell(in_left, out_left, in_right, out_right) with
    # 2*out_left == out_right and x spatial == x_prev spatial / 2.
    N = 2
    in_ch_left, out_ch_left = 8, 8
    in_ch_right, out_ch_right = 12, 16
    Hp = Wp = 16   # x_prev spatial
    H = W = 8      # x spatial (W * out_ch_right == 128 -> perfectly lane-dense)

    key = jax.random.PRNGKey(0)
    k_x, k_xp, k_p = jax.random.split(key, 3)
    x = jax.random.normal(k_x, (N, in_ch_right, H, W), jnp.float32)         # NCHW
    x_prev = jax.random.normal(k_xp, (N, in_ch_left, Hp, Wp), jnp.float32)  # NCHW

    params = init_first_cell(k_p, in_ch_left, out_ch_left, in_ch_right, out_ch_right)

    fwd = jax.jit(first_cell_forward)
    out = jax.block_until_ready(fwd(params, x, x_prev))

    expected_shape = (N, 6 * out_ch_right, H, W)  # (2, 96, 8, 8)
    assert out.shape == expected_shape, (out.shape, expected_shape)
    assert bool(jnp.all(jnp.isfinite(out)))

    # Loose sanity check vs plain-JAX f32 reference (bf16 MXU operands inside
    # the kernel introduce small rounding differences).
    ref = first_cell_reference(params, x, x_prev)
    max_ref = float(jnp.max(jnp.abs(ref)))
    max_err = float(jnp.max(jnp.abs(out - ref)))
    assert max_err <= 1e-1 + 5e-2 * max_ref, (max_err, max_ref)

    print("KERNEL_OK")
</pallas_src>

<mosaic_0001>
module attributes {stable_mosaic.version = 11 : i64} {
  func.func @kernel(%arg0: i32, %arg1: memref<1x8x96xf32, #tpu.memory_space<vmem>>, %arg2: memref<1x8x128xf32, #tpu.memory_space<vmem>>, %arg3: memref<96x128xbf16, #tpu.memory_space<vmem>>, %arg4: memref<128x128xbf16, #tpu.memory_space<vmem>>, %arg5: memref<38x128x128xbf16, #tpu.memory_space<vmem>>, %arg6: memref<128x128xbf16, #tpu.memory_space<vmem>>, %arg7: memref<16x128xf32, #tpu.memory_space<vmem>>, %arg8: memref<8x128xf32, #tpu.memory_space<vmem>>, %arg9: memref<1x6x8x128xf32, #tpu.memory_space<vmem>>, %arg10: memref<12x128xf32, #tpu.memory_space<vmem>>) attributes {dimension_semantics = [#tpu.dimension_semantics<parallel>], iteration_bounds = array<i64: 2>, scalar_prefetch = 0 : i64, scratch_operands = 1 : i64, tpu.core_type = #tpu.core_type<tc>, window_params = [{transform_indices = @transform_0, window_bounds = array<i64: 1, 8, 96>}, {transform_indices = @transform_1, window_bounds = array<i64: 1, 8, 128>}, {pipeline_mode = #tpu.pipeline_mode<synchronous>, transform_indices = @transform_2, window_bounds = array<i64: 96, 128>}, {pipeline_mode = #tpu.pipeline_mode<synchronous>, transform_indices = @transform_3, window_bounds = array<i64: 128, 128>}, {pipeline_mode = #tpu.pipeline_mode<synchronous>, transform_indices = @transform_4, window_bounds = array<i64: 38, 128, 128>}, {pipeline_mode = #tpu.pipeline_mode<synchronous>, transform_indices = @transform_5, window_bounds = array<i64: 128, 128>}, {pipeline_mode = #tpu.pipeline_mode<synchronous>, transform_indices = @transform_6, window_bounds = array<i64: 16, 128>}, {pipeline_mode = #tpu.pipeline_mode<synchronous>, transform_indices = @transform_7, window_bounds = array<i64: 8, 128>}, {transform_indices = @transform_8, window_bounds = array<i64: 1, 6, 8, 128>}]} {
    %cst = arith.constant 0.000000e+00 : f32
    %0 = vector.broadcast %cst : f32 to vector<12x128xf32>
    %c0 = arith.constant 0 : index
    %c0_0 = arith.constant 0 : index
    %1 = vector.load %arg10[%c0, %c0_0] : memref<12x128xf32, #tpu.memory_space<vmem>>, vector<12x128xf32>
    tpu.vector_store %arg10[%c0, %c0_0], %0 {strides = array<i32>} : memref<12x128xf32, #tpu.memory_space<vmem>>, vector<12x128xf32>,
    %c0_1 = arith.constant 0 : index
    %c0_2 = arith.constant 0 : index
    %c0_3 = arith.constant 0 : index
    %2 = vector.load %arg1[%c0_1, %c0_2, %c0_3] : memref<1x8x96xf32, #tpu.memory_space<vmem>>, vector<1x8x96xf32>
    %3 = vector.shape_cast %2 : vector<1x8x96xf32> to vector<8x96xf32>
    %cst_4 = arith.constant 0.000000e+00 : f32
    %4 = vector.broadcast %cst_4 : f32 to vector<8x96xf32>
    %5 = arith.maximumf %3, %4 : vector<8x96xf32>
    %6 = arith.truncf %5 : vector<8x96xf32> to vector<8x96xbf16>
    %c0_5 = arith.constant 0 : index
    %c0_6 = arith.constant 0 : index
    %7 = vector.load %arg3[%c0_5, %c0_6] : memref<96x128xbf16, #tpu.memory_space<vmem>>, vector<96x128xbf16>
    %cst_7 = arith.constant dense<0.000000e+00> : vector<8x128xf32>
    %8 = tpu.matmul %6, %7, %cst_7 {dimension_numbers = #tpu.dot_dimension_numbers<[1], [0], [0], [1], [0, 0, 1, 1], [], []>} : vector<8x96xbf16>, vector<96x128xbf16>, vector<8x128xf32> -> vector<8x128xf32>
    %c0_8 = arith.constant 0 : index
    %c0_9 = arith.constant 0 : index
    %9 = vector.load %arg7[%c0_8, %c0_9] : memref<16x128xf32, #tpu.memory_space<vmem>>, vector<1x128xf32>
    %10 = vector.broadcast %9 : vector<1x128xf32> to vector<8x128xf32>
    %11 = arith.addf %8, %10 : vector<8x128xf32>
    %c0_10 = arith.constant 0 : index
    %c0_11 = arith.constant 0 : index
    %c0_12 = arith.constant 0 : index
    %12 = vector.load %arg2[%c0_10, %c0_11, %c0_12] : memref<1x8x128xf32, #tpu.memory_space<vmem>>, vector<1x8x128xf32>
    %13 = vector.shape_cast %12 : vector<1x8x128xf32> to vector<8x128xf32>
    %cst_13 = arith.constant 0.000000e+00 : f32
    %14 = vector.broadcast %cst_13 : f32 to vector<8x128xf32>
    %15 = arith.maximumf %13, %14 : vector<8x128xf32>
    %16 = arith.truncf %15 : vector<8x128xf32> to vector<8x128xbf16>
    %c0_14 = arith.constant 0 : index
    %c0_15 = arith.constant 0 : index
    %17 = vector.load %arg4[%c0_14, %c0_15] : memref<128x128xbf16, #tpu.memory_space<vmem>>, vector<128x128xbf16>
    %cst_16 = arith.constant dense<0.000000e+00> : vector<8x128xf32>
    %18 = tpu.matmul %16, %17, %cst_16 {dimension_numbers = #tpu.dot_dimension_numbers<[1], [0], [0], [1], [0, 0, 1, 1], [], []>} : vector<8x128xbf16>, vector<128x128xbf16>, vector<8x128xf32> -> vector<8x128xf32>
    %c1 = arith.constant 1 : index
    %c0_17 = arith.constant 0 : index
    %19 = vector.load %arg7[%c1, %c0_17] : memref<16x128xf32, #tpu.memory_space<vmem>>, vector<1x128xf32>
    %20 = vector.broadcast %19 : vector<1x128xf32> to vector<8x128xf32>
    %21 = arith.addf %18, %20 : vector<8x128xf32>
    %cst_18 = arith.constant 0.000000e+00 : f32
    %22 = vector.broadcast %cst_18 : f32 to vector<8x128xf32>
    %23 = arith.maximumf %11, %22 : vector<8x128xf32>
    %c2 = arith.constant 2 : index
    %c0_19 = arith.constant 0 : index
    %24 = vector.load %arg10[%c2, %c0_19] : memref<12x128xf32, #tpu.memory_space<vmem>>, vector<8x128xf32>
    tpu.vector_store %arg10[%c2, %c0_19], %23 {strides = array<i32>} : memref<12x128xf32, #tpu.memory_space<vmem>>, vector<8x128xf32>,
    %c0_20 = arith.constant 0 : index
    %c0_21 = arith.constant 0 : index
    %25 = vector.load %arg10[%c0_20, %c0_21] : memref<12x128xf32, #tpu.memory_space<vmem>>, vector<8x128xf32>
    %26 = arith.truncf %25 : vector<8x128xf32> to vector<8x128xbf16>
    %c0_22 = arith.constant 0 : index
    %c0_23 = arith.constant 0 : index
    %c0_24 = arith.constant 0 : index
    %27 = vector.load %arg5[%c0_22, %c0_23, %c0_24] : memref<38x128x128xbf16, #tpu.memory_space<vmem>>, vector<1x128x128xbf16>
    %28 = vector.shape_cast %27 : vector<1x128x128xbf16> to vector<128x128xbf16>
    %cst_25 = arith.constant dense<0.000000e+00> : vector<8x128xf32>
    %29 = tpu.matmul %26, %28, %cst_25 {dimension_numbers = #tpu.dot_dimension_numbers<[1], [0], [0], [1], [0, 0, 1, 1], [], []>} : vector<8x128xbf16>, vector<128x128xbf16>, vector<8x128xf32> -> vector<8x128xf32>
    %c1_26 = arith.constant 1 : index
    %c0_27 = arith.constant 0 : index
    %30 = vector.load %arg10[%c1_26, %c0_27] : memref<12x128xf32, #tpu.memory_space<vmem>>, vector<8x128xf32>
    %31 = arith.truncf %30 : vector<8x128xf32> to vector<8x128xbf16>
    %c1_28 = arith.constant 1 : index
    %c0_29 = arith.constant 0 : index
    %c0_30 = arith.constant 0 : index
    %32 = vector.load %arg5[%c1_28, %c0_29, %c0_30] : memref<38x128x128xbf16, #tpu.memory_space<vmem>>, vector<1x128x128xbf16>
    %33 = vector.shape_cast %32 : vector<1x128x128xbf16> to vector<128x128xbf16>
    %cst_31 = arith.constant dense<0.000000e+00> : vector<8x128xf32>
    %34 = tpu.matmul %31, %33, %cst_31 {dimension_numbers = #tpu.dot_dimension_numbers<[1], [0], [0], [1], [0, 0, 1, 1], [], []>} : vector<8x128xbf16>, vector<128x128xbf16>, vector<8x128xf32> -> vector<8x128xf32>
    %35 = arith.addf %29, %34 : vector<8x128xf32>
    %c2_32 = arith.constant 2 : index
    %c0_33 = arith.constant 0 : index
    %36 = vector.load %arg10[%c2_32, %c0_33] : memref<12x128xf32, #tpu.memory_space<vmem>>, vector<8x128xf32>
    %37 = arith.truncf %36 : vector<8x128xf32> to vector<8x128xbf16>
    %c2_34 = arith.constant 2 : index
    %c0_35 = arith.constant 0 : index
    %c0_36 = arith.constant 0 : index
    %38 = vector.load %arg5[%c2_34, %c0_35, %c0_36] : memref<38x128x128xbf16, #tpu.memory_space<vmem>>, vector<1x128x128xbf16>
    %39 = vector.shape_cast %38 : vector<1x128x128xbf16> to vector<128x128xbf16>
    %cst_37 = arith.constant dense<0.000000e+00> : vector<8x128xf32>
    %40 = tpu.matmul %37, %39, %cst_37 {dimension_numbers = #tpu.dot_dimension_numbers<[1], [0], [0], [1], [0, 0, 1, 1], [], []>} : vector<8x128xbf16>, vector<128x128xbf16>, vector<8x128xf32> -> vector<8x128xf32>
    %41 = arith.addf %35, %40 : vector<8x128xf32>
    %c3 = arith.constant 3 : index
    %c0_38 = arith.constant 0 : index
    %42 = vector.load %arg10[%c3, %c0_38] : memref<12x128xf32, #tpu.memory_space<vmem>>, vector<8x128xf32>
    %43 = arith.truncf %42 : vector<8x128xf32> to vector<8x128xbf16>
    %c3_39 = arith.constant 3 : index
    %c0_40 = arith.constant 0 : index
    %c0_41 = arith.constant 0 : index
    %44 = vector.load %arg5[%c3_39, %c0_40, %c0_41] : memref<38x128x128xbf16, #tpu.memory_space<vmem>>, vector<1x128x128xbf16>
    %45 = vector.shape_cast %44 : vector<1x128x128xbf16> to vector<128x128xbf16>
    %cst_42 = arith.constant dense<0.000000e+00> : vector<8x128xf32>
    %46 = tpu.matmul %43, %45, %cst_42 {dimension_numbers = #tpu.dot_dimension_numbers<[1], [0], [0], [1], [0, 0, 1, 1], [], []>} : vector<8x128xbf16>, vector<128x128xbf16>, vector<8x128xf32> -> vector<8x128xf32>
    %47 = arith.addf %41, %46 : vector<8x128xf32>
    %c4 = arith.constant 4 : index
    %c0_43 = arith.constant 0 : index
    %48 = vector.load %arg10[%c4, %c0_43] : memref<12x128xf32, #tpu.memory_space<vmem>>, vector<8x128xf32>
    %49 = arith.truncf %48 : vector<8x128xf32> to vector<8x128xbf16>
    %c4_44 = arith.constant 4 : index
    %c0_45 = arith.constant 0 : index
    %c0_46 = arith.constant 0 : index
    %50 = vector.load %arg5[%c4_44, %c0_45, %c0_46] : memref<38x128x128xbf16, #tpu.memory_space<vmem>>, vector<1x128x128xbf16>
    %51 = vector.shape_cast %50 : vector<1x128x128xbf16> to vector<128x128xbf16>
    %cst_47 = arith.constant dense<0.000000e+00> : vector<8x128xf32>
    %52 = tpu.matmul %49, %51, %cst_47 {dimension_numbers = #tpu.dot_dimension_numbers<[1], [0], [0], [1], [0, 0, 1, 1], [], []>} : vector<8x128xbf16>, vector<128x128xbf16>, vector<8x128xf32> -> vector<8x128xf32>
    %53 = arith.addf %47, %52 : vector<8x128xf32>
    %c2_48 = arith.constant 2 : index
    %c0_49 = arith.constant 0 : index
    %54 = vector.load %arg7[%c2_48, %c0_49] : memref<16x128xf32, #tpu.memory_space<vmem>>, vector<1x128xf32>
    %55 = vector.broadcast %54 : vector<1x128xf32> to vector<8x128xf32>
    %56 = arith.addf %53, %55 : vector<8x128xf32>
    %cst_50 = arith.constant 0.000000e+00 : f32
    %57 = vector.broadcast %cst_50 : f32 to vector<8x128xf32>
    %58 = arith.maximumf %56, %57 : vector<8x128xf32>
    %c2_51 = arith.constant 2 : index
    %c0_52 = arith.constant 0 : index
    %59 = vector.load %arg10[%c2_51, %c0_52] : memref<12x128xf32, #tpu.memory_space<vmem>>, vector<8x128xf32>
    tpu.vector_store %arg10[%c2_51, %c0_52], %58 {strides = array<i32>} : memref<12x128xf32, #tpu.memory_space<vmem>>, vector<8x128xf32>,
    %c0_53 = arith.constant 0 : index
    %c0_54 = arith.constant 0 : index
    %60 = vector.load %arg10[%c0_53, %c0_54] : memref<12x128xf32, #tpu.memory_space<vmem>>, vector<8x128xf32>
    %61 = arith.truncf %60 : vector<8x128xf32> to vector<8x128xbf16>
    %c5 = arith.constant 5 : index
    %c0_55 = arith.constant 0 : index
    %c0_56 = arith.constant 0 : index
    %62 = vector.load %arg5[%c5, %c0_55, %c0_56] : memref<38x128x128xbf16, #tpu.memory_space<vmem>>, vector<1x128x128xbf16>
    %63 = vector.shape_cast %62 : vector<1x128x128xbf16> to vector<128x128xbf16>
    %cst_57 = arith.constant dense<0.000000e+00> : vector<8x128xf32>
    %64 = tpu.matmul %61, %63, %cst_57 {dimension_numbers = #tpu.dot_dimension_numbers<[1], [0], [0], [1], [0, 0, 1, 1], [], []>} : vector<8x128xbf16>, vector<128x128xbf16>, vector<8x128xf32> -> vector<8x128xf32>
    %c1_58 = arith.constant 1 : index
    %c0_59 = arith.constant 0 : index
    %65 = vector.load %arg10[%c1_58, %c0_59] : memref<12x128xf32, #tpu.memory_space<vmem>>, vector<8x128xf32>
    %66 = arith.truncf %65 : vector<8x128xf32> to vector<8x128xbf16>
    %c6 = arith.constant 6 : index
    %c0_60 = arith.constant 0 : index
    %c0_61 = arith.constant 0 : index
    %67 = vector.load %arg5[%c6, %c0_60, %c0_61] : memref<38x128x128xbf16, #tpu.memory_space<vmem>>, vector<1x128x128xbf16>
    %68 = vector.shape_cast %67 : vector<1x128x128xbf16> to vector<128x128xbf16>
    %cst_62 = arith.constant dense<0.000000e+00> : vector<8x128xf32>
    %69 = tpu.matmul %66, %68, %cst_62 {dimension_numbers = #tpu.dot_dimension_numbers<[1], [0], [0], [1], [0, 0, 1, 1], [], []>} : vector<8x128xbf16>, vector<128x128xbf16>, vector<8x128xf32> -> vector<8x128xf32>
    %70 = arith.addf %64, %69 : vector<8x128xf32>
    %c2_63 = arith.constant 2 : index
    %c0_64 = arith.constant 0 : index
    %71 = vector.load %arg10[%c2_63, %c0_64] : memref<12x128xf32, #tpu.memory_space<vmem>>, vector<8x128xf32>
    %72 = arith.truncf %71 : vector<8x128xf32> to vector<8x128xbf16>
    %c7 = arith.constant 7 : index
    %c0_65 = arith.constant 0 : index
    %c0_66 = arith.constant 0 : index
    %73 = vector.load %arg5[%c7, %c0_65, %c0_66] : memref<38x128x128xbf16, #tpu.memory_space<vmem>>, vector<1x128x128xbf16>
    %74 = vector.shape_cast %73 : vector<1x128x128xbf16> to vector<128x128xbf16>
    %cst_67 = arith.constant dense<0.000000e+00> : vector<8x128xf32>
    %75 = tpu.matmul %72, %74, %cst_67 {dimension_numbers = #tpu.dot_dimension_numbers<[1], [0], [0], [1], [0, 0, 1, 1], [], []>} : vector<8x128xbf16>, vector<128x128xbf16>, vector<8x128xf32> -> vector<8x128xf32>
    %76 = arith.addf %70, %75 : vector<8x128xf32>
    %c3_68 = arith.constant 3 : index
    %c0_69 = arith.constant 0 : index
    %77 = vector.load %arg10[%c3_68, %c0_69] : memref<12x128xf32, #tpu.memory_space<vmem>>, vector<8x128xf32>
    %78 = arith.truncf %77 : vector<8x128xf32> to vector<8x128xbf16>
    %c8 = arith.constant 8 : index
    %c0_70 = arith.constant 0 : index
    %c0_71 = arith.constant 0 : index
    %79 = vector.load %arg5[%c8, %c0_70, %c0_71] : memref<38x128x128xbf16, #tpu.memory_space<vmem>>, vector<1x128x128xbf16>
    %80 = vector.shape_cast %79 : vector<1x128x128xbf16> to vector<128x128xbf16>
    %cst_72 = arith.constant dense<0.000000e+00> : vector<8x128xf32>
    %81 = tpu.matmul %78, %80, %cst_72 {dimension_numbers = #tpu.dot_dimension_numbers<[1], [0], [0], [1], [0, 0, 1, 1], [], []>} : vector<8x128xbf16>, vector<128x128xbf16>, vector<8x128xf32> -> vector<8x128xf32>
    %82 = arith.addf %76, %81 : vector<8x128xf32>
    %c4_73 = arith.constant 4 : index
    %c0_74 = arith.constant 0 : index
    %83 = vector.load %arg10[%c4_73, %c0_74] : memref<12x128xf32, #tpu.memory_space<vmem>>, vector<8x128xf32>
    %84 = arith.truncf %83 : vector<8x128xf32> to vector<8x128xbf16>
    %c9 = arith.constant 9 : index
    %c0_75 = arith.constant 0 : index
    %c0_76 = arith.constant 0 : index
    %85 = vector.load %arg5[%c9, %c0_75, %c0_76] : memref<38x128x128xbf16, #tpu.memory_space<vmem>>, vector<1x128x128xbf16>
    %86 = vector.shape_cast %85 : vector<1x128x128xbf16> to vector<128x128xbf16>
    %cst_77 = arith.constant dense<0.000000e+00> : vector<8x128xf32>
    %87 = tpu.matmul %84, %86, %cst_77 {dimension_numbers = #tpu.dot_dimension_numbers<[1], [0], [0], [1], [0, 0, 1, 1], [], []>} : vector<8x128xbf16>, vector<128x128xbf16>, vector<8x128xf32> -> vector<8x128xf32>
    %88 = arith.addf %82, %87 : vector<8x128xf32>
    %c3_78 = arith.constant 3 : index
    %c0_79 = arith.constant 0 : index
    %89 = vector.load %arg7[%c3_78, %c0_79] : memref<16x128xf32, #tpu.memory_space<vmem>>, vector<1x128xf32>
    %90 = vector.broadcast %89 : vector<1x128xf32> to vector<8x128xf32>
    %91 = arith.addf %88, %90 : vector<8x128xf32>
    %cst_80 = arith.constant 0.000000e+00 : f32
    %92 = vector.broadcast %cst_80 : f32 to vector<8x128xf32>
    %93 = arith.maximumf %21, %92 : vector<8x128xf32>
    %c2_81 = arith.constant 2 : index
    %c0_82 = arith.constant 0 : index
    %94 = vector.load %arg10[%c2_81, %c0_82] : memref<12x128xf32, #tpu.memory_space<vmem>>, vector<8x128xf32>
    tpu.vector_store %arg10[%c2_81, %c0_82], %93 {strides = array<i32>} : memref<12x128xf32, #tpu.memory_space<vmem>>, vector<8x128xf32>,
    %c1_83 = arith.constant 1 : index
    %c0_84 = arith.constant 0 : index
    %95 = vector.load %arg10[%c1_83, %c0_84] : memref<12x128xf32, #tpu.memory_space<vmem>>, vector<8x128xf32>
    %96 = arith.truncf %95 : vector<8x128xf32> to vector<8x128xbf16>
    %c10 = arith.constant 10 : index
    %c0_85 = arith.constant 0 : index
    %c0_86 = arith.constant 0 : index
    %97 = vector.load %arg5[%c10, %c0_85, %c0_86] : memref<38x128x128xbf16, #tpu.memory_space<vmem>>, vector<1x128x128xbf16>
    %98 = vector.shape_cast %97 : vector<1x128x128xbf16> to vector<128x128xbf16>
    %cst_87 = arith.constant dense<0.000000e+00> : vector<8x128xf32>
    %99 = tpu.matmul %96, %98, %cst_87 {dimension_numbers = #tpu.dot_dimension_numbers<[1], [0], [0], [1], [0, 0, 1, 1], [], []>} : vector<8x128xbf16>, vector<128x128xbf16>, vector<8x128xf32> -> vector<8x128xf32>
    %c2_88 = arith.constant 2 : index
    %c0_89 = arith.constant 0 : index
    %100 = vector.load %arg10[%c2_88, %c0_89] : memref<12x128xf32, #tpu.memory_space<vmem>>, vector<8x128xf32>
    %101 = arith.truncf %100 : vector<8x128xf32> to vector<8x128xbf16>
    %c11 = arith.constant 11 : index
    %c0_90 = arith.constant 0 : index
    %c0_91 = arith.constant 0 : index
    %102 = vector.load %arg5[%c11, %c0_90, %c0_91] : memref<38x128x128xbf16, #tpu.memory_space<vmem>>, vector<1x128x128xbf16>
    %103 = vector.shape_cast %102 : vector<1x128x128xbf16> to vector<128x128xbf16>
    %cst_92 = arith.constant dense<0.000000e+00> : vector<8x128xf32>
    %104 = tpu.matmul %101, %103, %cst_92 {dimension_numbers = #tpu.dot_dimension_numbers<[1], [0], [0], [1], [0, 0, 1, 1], [], []>} : vector<8x128xbf16>, vector<128x128xbf16>, vector<8x128xf32> -> vector<8x128xf32>
    %105 = arith.addf %99, %104 : vector<8x128xf32>
    %c3_93 = arith.constant 3 : index
    %c0_94 = arith.constant 0 : index
    %106 = vector.load %arg10[%c3_93, %c0_94] : memref<12x128xf32, #tpu.memory_space<vmem>>, vector<8x128xf32>
    %107 = arith.truncf %106 : vector<8x128xf32> to vector<8x128xbf16>
    %c12 = arith.constant 12 : index
    %c0_95 = arith.constant 0 : index
    %c0_96 = arith.constant 0 : index
    %108 = vector.load %arg5[%c12, %c0_95, %c0_96] : memref<38x128x128xbf16, #tpu.memory_space<vmem>>, vector<1x128x128xbf16>
    %109 = vector.shape_cast %108 : vector<1x128x128xbf16> to vector<128x128xbf16>
    %cst_97 = arith.constant dense<0.000000e+00> : vector<8x128xf32>
    %110 = tpu.matmul %107, %109, %cst_97 {dimension_numbers = #tpu.dot_dimension_numbers<[1], [0], [0], [1], [0, 0, 1, 1], [], []>} : vector<8x128xbf16>, vector<128x128xbf16>, vector<8x128xf32> -> vector<8x128xf32>
    %111 = arith.addf %105, %110 : vector<8x128xf32>
    %c4_98 = arith.constant 4 : index
    %c0_99 = arith.constant 0 : index
    %112 = vector.load %arg7[%c4_98, %c0_99] : memref<16x128xf32, #tpu.memory_space<vmem>>, vector<1x128xf32>
    %113 = vector.broadcast %112 : vector<1x128xf32> to vector<8x128xf32>
    %114 = arith.addf %111, %113 : vector<8x128xf32>
    %cst_100 = arith.constant 0.000000e+00 : f32
    %115 = vector.broadcast %cst_100 : f32 to vector<8x128xf32>
    %116 = arith.maximumf %114, %115 : vector<8x128xf32>
    %c2_101 = arith.constant 2 : index
    %c0_102 = arith.constant 0 : index
    %117 = vector.load %arg10[%c2_101, %c0_102] : memref<12x128xf32, #tpu.memory_space<vmem>>, vector<8x128xf32>
    tpu.vector_store %arg10[%c2_101, %c0_102], %116 {strides = array<i32>} : memref<12x128xf32, #tpu.memory_space<vmem>>, vector<8x128xf32>,
    %c1_103 = arith.constant 1 : index
    %c0_104 = arith.constant 0 : index
    %118 = vector.load %arg10[%c1_103, %c0_104] : memref<12x128xf32, #tpu.memory_space<vmem>>, vector<8x128xf32>
    %119 = arith.truncf %118 : vector<8x128xf32> to vector<8x128xbf16>
    %c13 = arith.constant 13 : index
    %c0_105 = arith.constant 0 : index
    %c0_106 = arith.constant 0 : index
    %120 = vector.load %arg5[%c13, %c0_105, %c0_106] : memref<38x128x128xbf16, #tpu.memory_space<vmem>>, vector<1x128x128xbf16>
    %121 = vector.shape_cast %120 : vector<1x128x128xbf16> to vector<128x128xbf16>
    %cst_107 = arith.constant dense<0.000000e+00> : vector<8x128xf32>
    %122 = tpu.matmul %119, %121, %cst_107 {dimension_numbers = #tpu.dot_dimension_numbers<[1], [0], [0], [1], [0, 0, 1, 1], [], []>} : vector<8x128xbf16>, vector<128x128xbf16>, vector<8x128xf32> -> vector<8x128xf32>
    %c2_108 = arith.constant 2 : index
    %c0_109 = arith.constant 0 : index
    %123 = vector.load %arg10[%c2_108, %c0_109] : memref<12x128xf32, #tpu.memory_space<vmem>>, vector<8x128xf32>
    %124 = arith.truncf %123 : vector<8x128xf32> to vector<8x128xbf16>
    %c14 = arith.constant 14 : index
    %c0_110 = arith.constant 0 : index
    %c0_111 = arith.constant 0 : index
    %125 = vector.load %arg5[%c14, %c0_110, %c0_111] : memref<38x128x128xbf16, #tpu.memory_space<vmem>>, vector<1x128x128xbf16>
    %126 = vector.shape_cast %125 : vector<1x128x128xbf16> to vector<128x128xbf16>
    %cst_112 = arith.constant dense<0.000000e+00> : vector<8x128xf32>
    %127 = tpu.matmul %124, %126, %cst_112 {dimension_numbers = #tpu.dot_dimension_numbers<[1], [0], [0], [1], [0, 0, 1, 1], [], []>} : vector<8x128xbf16>, vector<128x128xbf16>, vector<8x128xf32> -> vector<8x128xf32>
    %128 = arith.addf %122, %127 : vector<8x128xf32>
    %c3_113 = arith.constant 3 : index
    %c0_114 = arith.constant 0 : index
    %129 = vector.load %arg10[%c3_113, %c0_114] : memref<12x128xf32, #tpu.memory_space<vmem>>, vector<8x128xf32>
    %130 = arith.truncf %129 : vector<8x128xf32> to vector<8x128xbf16>
    %c15 = arith.constant 15 : index
    %c0_115 = arith.constant 0 : index
    %c0_116 = arith.constant 0 : index
    %131 = vector.load %arg5[%c15, %c0_115, %c0_116] : memref<38x128x128xbf16, #tpu.memory_space<vmem>>, vector<1x128x128xbf16>
    %132 = vector.shape_cast %131 : vector<1x128x128xbf16> to vector<128x128xbf16>
    %cst_117 = arith.constant dense<0.000000e+00> : vector<8x128xf32>
    %133 = tpu.matmul %130, %132, %cst_117 {dimension_numbers = #tpu.dot_dimension_numbers<[1], [0], [0], [1], [0, 0, 1, 1], [], []>} : vector<8x128xbf16>, vector<128x128xbf16>, vector<8x128xf32> -> vector<8x128xf32>
    %134 = arith.addf %128, %133 : vector<8x128xf32>
    %c5_118 = arith.constant 5 : index
    %c0_119 = arith.constant 0 : index
    %135 = vector.load %arg7[%c5_118, %c0_119] : memref<16x128xf32, #tpu.memory_space<vmem>>, vector<1x128xf32>
    %136 = vector.broadcast %135 : vector<1x128xf32> to vector<8x128xf32>
    %137 = arith.addf %134, %136 : vector<8x128xf32>
    %138 = arith.addf %91, %137 : vector<8x128xf32>
    %cst_120 = arith.constant 0.000000e+00 : f32
    %139 = vector.broadcast %cst_120 : f32 to vector<8x128xf32>
    %140 = arith.maximumf %21, %139 : vector<8x128xf32>
    %c2_121 = arith.constant 2 : index
    %c0_122 = arith.constant 0 : index
    %141 = vector.load %arg10[%c2_121, %c0_122] : memref<12x128xf32, #tpu.memory_space<vmem>>, vector<8x128xf32>
    tpu.vector_store %arg10[%c2_121, %c0_122], %140 {strides = array<i32>} : memref<12x128xf32, #tpu.memory_space<vmem>>, vector<8x128xf32>,
    %c0_123 = arith.constant 0 : index
    %c0_124 = arith.constant 0 : index
    %142 = vector.load %arg10[%c0_123, %c0_124] : memref<12x128xf32, #tpu.memory_space<vmem>>, vector<8x128xf32>
    %143 = arith.truncf %142 : vector<8x128xf32> to vector<8x128xbf16>
    %c16 = arith.constant 16 : index
    %c0_125 = arith.constant 0 : index
    %c0_126 = arith.constant 0 : index
    %144 = vector.load %arg5[%c16, %c0_125, %c0_126] : memref<38x128x128xbf16, #tpu.memory_space<vmem>>, vector<1x128x128xbf16>
    %145 = vector.shape_cast %144 : vector<1x128x128xbf16> to vector<128x128xbf16>
    %cst_127 = arith.constant dense<0.000000e+00> : vector<8x128xf32>
    %146 = tpu.matmul %143, %145, %cst_127 {dimension_numbers = #tpu.dot_dimension_numbers<[1], [0], [0], [1], [0, 0, 1, 1], [], []>} : vector<8x128xbf16>, vector<128x128xbf16>, vector<8x128xf32> -> vector<8x128xf32>
    %c1_128 = arith.constant 1 : index
    %c0_129 = arith.constant 0 : index
    %147 = vector.load %arg10[%c1_128, %c0_129] : memref<12x128xf32, #tpu.memory_space<vmem>>, vector<8x128xf32>
    %148 = arith.truncf %147 : vector<8x128xf32> to vector<8x128xbf16>
    %c17 = arith.constant 17 : index
    %c0_130 = arith.constant 0 : index
    %c0_131 = arith.constant 0 : index
    %149 = vector.load %arg5[%c17, %c0_130, %c0_131] : memref<38x128x128xbf16, #tpu.memory_space<vmem>>, vector<1x128x128xbf16>
    %150 = vector.shape_cast %149 : vector<1x128x128xbf16> to vector<128x128xbf16>
    %cst_132 = arith.constant dense<0.000000e+00> : vector<8x128xf32>
    %151 = tpu.matmul %148, %150, %cst_132 {dimension_numbers = #tpu.dot_dimension_numbers<[1], [0], [0], [1], [0, 0, 1, 1], [], []>} : vector<8x128xbf16>, vector<128x128xbf16>, vector<8x128xf32> -> vector<8x128xf32>
    %152 = arith.addf %146, %151 : vector<8x128xf32>
    %c2_133 = arith.constant 2 : index
    %c0_134 = arith.constant 0 : index
    %153 = vector.load %arg10[%c2_133, %c0_134] : memref<12x128xf32, #tpu.memory_space<vmem>>, vector<8x128xf32>
    %154 = arith.truncf %153 : vector<8x128xf32> to vector<8x128xbf16>
    %c18 = arith.constant 18 : index
    %c0_135 = arith.constant 0 : index
    %c0_136 = arith.constant 0 : index
    %155 = vector.load %arg5[%c18, %c0_135, %c0_136] : memref<38x128x128xbf16, #tpu.memory_space<vmem>>, vector<1x128x128xbf16>
    %156 = vector.shape_cast %155 : vector<1x128x128xbf16> to vector<128x128xbf16>
    %cst_137 = arith.constant dense<0.000000e+00> : vector<8x128xf32>
    %157 = tpu.matmul %154, %156, %cst_137 {dimension_numbers = #tpu.dot_dimension_numbers<[1], [0], [0], [1], [0, 0, 1, 1], [], []>} : vector<8x128xbf16>, vector<128x128xbf16>, vector<8x128xf32> -> vector<8x128xf32>
    %158 = arith.addf %152, %157 : vector<8x128xf32>
    %c3_138 = arith.constant 3 : index
    %c0_139 = arith.constant 0 : index
    %159 = vector.load %arg10[%c3_138, %c0_139] : memref<12x128xf32, #tpu.memory_space<vmem>>, vector<8x128xf32>
    %160 = arith.truncf %159 : vector<8x128xf32> to vector<8x128xbf16>
    %c19 = arith.constant 19 : index
    %c0_140 = arith.constant 0 : index
    %c0_141 = arith.constant 0 : index
    %161 = vector.load %arg5[%c19, %c0_140, %c0_141] : memref<38x128x128xbf16, #tpu.memory_space<vmem>>, vector<1x128x128xbf16>
    %162 = vector.shape_cast %161 : vector<1x128x128xbf16> to vector<128x128xbf16>
    %cst_142 = arith.constant dense<0.000000e+00> : vector<8x128xf32>
    %163 = tpu.matmul %160, %162, %cst_142 {dimension_numbers = #tpu.dot_dimension_numbers<[1], [0], [0], [1], [0, 0, 1, 1], [], []>} : vector<8x128xbf16>, vector<128x128xbf16>, vector<8x128xf32> -> vector<8x128xf32>
    %164 = arith.addf %158, %163 : vector<8x128xf32>
    %c4_143 = arith.constant 4 : index
    %c0_144 = arith.constant 0 : index
    %165 = vector.load %arg10[%c4_143, %c0_144] : memref<12x128xf32, #tpu.memory_space<vmem>>, vector<8x128xf32>
    %166 = arith.truncf %165 : vector<8x128xf32> to vector<8x128xbf16>
    %c20 = arith.constant 20 : index
    %c0_145 = arith.constant 0 : index
    %c0_146 = arith.constant 0 : index
    %167 = vector.load %arg5[%c20, %c0_145, %c0_146] : memref<38x128x128xbf16, #tpu.memory_space<vmem>>, vector<1x128x128xbf16>
    %168 = vector.shape_cast %167 : vector<1x128x128xbf16> to vector<128x128xbf16>
    %cst_147 = arith.constant dense<0.000000e+00> : vector<8x128xf32>
    %169 = tpu.matmul %166, %168, %cst_147 {dimension_numbers = #tpu.dot_dimension_numbers<[1], [0], [0], [1], [0, 0, 1, 1], [], []>} : vector<8x128xbf16>, vector<128x128xbf16>, vector<8x128xf32> -> vector<8x128xf32>
    %170 = arith.addf %164, %169 : vector<8x128xf32>
    %c6_148 = arith.constant 6 : index
    %c0_149 = arith.constant 0 : index
    %171 = vector.load %arg7[%c6_148, %c0_149] : memref<16x128xf32, #tpu.memory_space<vmem>>, vector<1x128xf32>
    %172 = vector.broadcast %171 : vector<1x128xf32> to vector<8x128xf32>
    %173 = arith.addf %170, %172 : vector<8x128xf32>
    %cst_150 = arith.constant 0.000000e+00 : f32
    %174 = vector.broadcast %cst_150 : f32 to vector<8x128xf32>
    %175 = arith.maximumf %173, %174 : vector<8x128xf32>
    %c2_151 = arith.constant 2 : index
    %c0_152 = arith.constant 0 : index
    %176 = vector.load %arg10[%c2_151, %c0_152] : memref<12x128xf32, #tpu.memory_space<vmem>>, vector<8x128xf32>
    tpu.vector_store %arg10[%c2_151, %c0_152], %175 {strides = array<i32>} : memref<12x128xf32, #tpu.memory_space<vmem>>, vector<8x128xf32>,
    %c0_153 = arith.constant 0 : index
    %c0_154 = arith.constant 0 : index
    %177 = vector.load %arg10[%c0_153, %c0_154] : memref<12x128xf32, #tpu.memory_space<vmem>>, vector<8x128xf32>
    %178 = arith.truncf %177 : vector<8x128xf32> to vector<8x128xbf16>
    %c21 = arith.constant 21 : index
    %c0_155 = arith.constant 0 : index
    %c0_156 = arith.constant 0 : index
    %179 = vector.load %arg5[%c21, %c0_155, %c0_156] : memref<38x128x128xbf16, #tpu.memory_space<vmem>>, vector<1x128x128xbf16>
    %180 = vector.shape_cast %179 : vector<1x128x128xbf16> to vector<128x128xbf16>
    %cst_157 = arith.constant dense<0.000000e+00> : vector<8x128xf32>
    %181 = tpu.matmul %178, %180, %cst_157 {dimension_numbers = #tpu.dot_dimension_numbers<[1], [0], [0], [1], [0, 0, 1, 1], [], []>} : vector<8x128xbf16>, vector<128x128xbf16>, vector<8x128xf32> -> vector<8x128xf32>
    %c1_158 = arith.constant 1 : index
    %c0_159 = arith.constant 0 : index
    %182 = vector.load %arg10[%c1_158, %c0_159] : memref<12x128xf32, #tpu.memory_space<vmem>>, vector<8x128xf32>
    %183 = arith.truncf %182 : vector<8x128xf32> to vector<8x128xbf16>
    %c22 = arith.constant 22 : index
    %c0_160 = arith.constant 0 : index
    %c0_161 = arith.constant 0 : index
    %184 = vector.load %arg5[%c22, %c0_160, %c0_161] : memref<38x128x128xbf16, #tpu.memory_space<vmem>>, vector<1x128x128xbf16>
    %185 = vector.shape_cast %184 : vector<1x128x128xbf16> to vector<128x128xbf16>
    %cst_162 = arith.constant dense<0.000000e+00> : vector<8x128xf32>
    %186 = tpu.matmul %183, %185, %cst_162 {dimension_numbers = #tpu.dot_dimension_numbers<[1], [0], [0], [1], [0, 0, 1, 1], [], []>} : vector<8x128xbf16>, vector<128x128xbf16>, vector<8x128xf32> -> vector<8x128xf32>
    %187 = arith.addf %181, %186 : vector<8x128xf32>
    %c2_163 = arith.constant 2 : index
    %c0_164 = arith.constant 0 : index
    %188 = vector.load %arg10[%c2_163, %c0_164] : memref<12x128xf32, #tpu.memory_space<vmem>>, vector<8x128xf32>
    %189 = arith.truncf %188 : vector<8x128xf32> to vector<8x128xbf16>
    %c23 = arith.constant 23 : index
    %c0_165 = arith.constant 0 : index
    %c0_166 = arith.constant 0 : index
    %190 = vector.load %arg5[%c23, %c0_165, %c0_166] : memref<38x128x128xbf16, #tpu.memory_space<vmem>>, vector<1x128x128xbf16>
    %191 = vector.shape_cast %190 : vector<1x128x128xbf16> to vector<128x128xbf16>
    %cst_167 = arith.constant dense<0.000000e+00> : vector<8x128xf32>
    %192 = tpu.matmul %189, %191, %cst_167 {dimension_numbers = #tpu.dot_dimension_numbers<[1], [0], [0], [1], [0, 0, 1, 1], [], []>} : vector<8x128xbf16>, vector<128x128xbf16>, vector<8x128xf32> -> vector<8x128xf32>
    %193 = arith.addf %187, %192 : vector<8x128xf32>
    %c3_168 = arith.constant 3 : index
    %c0_169 = arith.constant 0 : index
    %194 = vector.load %arg10[%c3_168, %c0_169] : memref<12x128xf32, #tpu.memory_space<vmem>>, vector<8x128xf32>
    %195 = arith.truncf %194 : vector<8x128xf32> to vector<8x128xbf16>
    %c24 = arith.constant 24 : index
    %c0_170 = arith.constant 0 : index
    %c0_171 = arith.constant 0 : index
    %196 = vector.load %arg5[%c24, %c0_170, %c0_171] : memref<38x128x128xbf16, #tpu.memory_space<vmem>>, vector<1x128x128xbf16>
    %197 = vector.shape_cast %196 : vector<1x128x128xbf16> to vector<128x128xbf16>
    %cst_172 = arith.constant dense<0.000000e+00> : vector<8x128xf32>
    %198 = tpu.matmul %195, %197, %cst_172 {dimension_numbers = #tpu.dot_dimension_numbers<[1], [0], [0], [1], [0, 0, 1, 1], [], []>} : vector<8x128xbf16>, vector<128x128xbf16>, vector<8x128xf32> -> vector<8x128xf32>
    %199 = arith.addf %193, %198 : vector<8x128xf32>
    %c4_173 = arith.constant 4 : index
    %c0_174 = arith.constant 0 : index
    %200 = vector.load %arg10[%c4_173, %c0_174] : memref<12x128xf32, #tpu.memory_space<vmem>>, vector<8x128xf32>
    %201 = arith.truncf %200 : vector<8x128xf32> to vector<8x128xbf16>
    %c25 = arith.constant 25 : index
    %c0_175 = arith.constant 0 : index
    %c0_176 = arith.constant 0 : index
    %202 = vector.load %arg5[%c25, %c0_175, %c0_176] : memref<38x128x128xbf16, #tpu.memory_space<vmem>>, vector<1x128x128xbf16>
    %203 = vector.shape_cast %202 : vector<1x128x128xbf16> to vector<128x128xbf16>
    %cst_177 = arith.constant dense<0.000000e+00> : vector<8x128xf32>
    %204 = tpu.matmul %201, %203, %cst_177 {dimension_numbers = #tpu.dot_dimension_numbers<[1], [0], [0], [1], [0, 0, 1, 1], [], []>} : vector<8x128xbf16>, vector<128x128xbf16>, vector<8x128xf32> -> vector<8x128xf32>
    %205 = arith.addf %199, %204 : vector<8x128xf32>
    %c7_178 = arith.constant 7 : index
    %c0_179 = arith.constant 0 : index
    %206 = vector.load %arg7[%c7_178, %c0_179] : memref<16x128xf32, #tpu.memory_space<vmem>>, vector<1x128xf32>
    %207 = vector.broadcast %206 : vector<1x128xf32> to vector<8x128xf32>
    %208 = arith.addf %205, %207 : vector<8x128xf32>
    %cst_180 = arith.constant 0.000000e+00 : f32
    %209 = vector.broadcast %cst_180 : f32 to vector<8x128xf32>
    %210 = arith.maximumf %21, %209 : vector<8x128xf32>
    %c2_181 = arith.constant 2 : index
    %c0_182 = arith.constant 0 : index
    %211 = vector.load %arg10[%c2_181, %c0_182] : memref<12x128xf32, #tpu.memory_space<vmem>>, vector<8x128xf32>
    tpu.vector_store %arg10[%c2_181, %c0_182], %210 {strides = array<i32>} : memref<12x128xf32, #tpu.memory_space<vmem>>, vector<8x128xf32>,
    %c1_183 = arith.constant 1 : index
    %c0_184 = arith.constant 0 : index
    %212 = vector.load %arg10[%c1_183, %c0_184] : memref<12x128xf32, #tpu.memory_space<vmem>>, vector<8x128xf32>
    %213 = arith.truncf %212 : vector<8x128xf32> to vector<8x128xbf16>
    %c26 = arith.constant 26 : index
    %c0_185 = arith.constant 0 : index
    %c0_186 = arith.constant 0 : index
    %214 = vector.load %arg5[%c26, %c0_185, %c0_186] : memref<38x128x128xbf16, #tpu.memory_space<vmem>>, vector<1x128x128xbf16>
    %215 = vector.shape_cast %214 : vector<1x128x128xbf16> to vector<128x128xbf16>
    %cst_187 = arith.constant dense<0.000000e+00> : vector<8x128xf32>
    %216 = tpu.matmul %213, %215, %cst_187 {dimension_numbers = #tpu.dot_dimension_numbers<[1], [0], [0], [1], [0, 0, 1, 1], [], []>} : vector<8x128xbf16>, vector<128x128xbf16>, vector<8x128xf32> -> vector<8x128xf32>
    %c2_188 = arith.constant 2 : index
    %c0_189 = arith.constant 0 : index
    %217 = vector.load %arg10[%c2_188, %c0_189] : memref<12x128xf32, #tpu.memory_space<vmem>>, vector<8x128xf32>
    %218 = arith.truncf %217 : vector<8x128xf32> to vector<8x128xbf16>
    %c27 = arith.constant 27 : index
    %c0_190 = arith.constant 0 : index
    %c0_191 = arith.constant 0 : index
    %219 = vector.load %arg5[%c27, %c0_190, %c0_191] : memref<38x128x128xbf16, #tpu.memory_space<vmem>>, vector<1x128x128xbf16>
    %220 = vector.shape_cast %219 : vector<1x128x128xbf16> to vector<128x128xbf16>
    %cst_192 = arith.constant dense<0.000000e+00> : vector<8x128xf32>
    %221 = tpu.matmul %218, %220, %cst_192 {dimension_numbers = #tpu.dot_dimension_numbers<[1], [0], [0], [1], [0, 0, 1, 1], [], []>} : vector<8x128xbf16>, vector<128x128xbf16>, vector<8x128xf32> -> vector<8x128xf32>
    %222 = arith.addf %216, %221 : vector<8x128xf32>
    %c3_193 = arith.constant 3 : index
    %c0_194 = arith.constant 0 : index
    %223 = vector.load %arg10[%c3_193, %c0_194] : memref<12x128xf32, #tpu.memory_space<vmem>>, vector<8x128xf32>
    %224 = arith.truncf %223 : vector<8x128xf32> to vector<8x128xbf16>
    %c28 = arith.constant 28 : index
    %c0_195 = arith.constant 0 : index
    %c0_196 = arith.constant 0 : index
    %225 = vector.load %arg5[%c28, %c0_195, %c0_196] : memref<38x128x128xbf16, #tpu.memory_space<vmem>>, vector<1x128x128xbf16>
    %226 = vector.shape_cast %225 : vector<1x128x128xbf16> to vector<128x128xbf16>
    %cst_197 = arith.constant dense<0.000000e+00> : vector<8x128xf32>
    %227 = tpu.matmul %224, %226, %cst_197 {dimension_numbers = #tpu.dot_dimension_numbers<[1], [0], [0], [1], [0, 0, 1, 1], [], []>} : vector<8x128xbf16>, vector<128x128xbf16>, vector<8x128xf32> -> vector<8x128xf32>
    %228 = arith.addf %222, %227 : vector<8x128xf32>
    %c8_198 = arith.constant 8 : index
    %c0_199 = arith.constant 0 : index
    %229 = vector.load %arg7[%c8_198, %c0_199] : memref<16x128xf32, #tpu.memory_space<vmem>>, vector<1x128xf32>
    %230 = vector.broadcast %229 : vector<1x128xf32> to vector<8x128xf32>
    %231 = arith.addf %228, %230 : vector<8x128xf32>
    %cst_200 = arith.constant 0.000000e+00 : f32
    %232 = vector.broadcast %cst_200 : f32 to vector<8x128xf32>
    %233 = arith.maximumf %231, %232 : vector<8x128xf32>
    %c2_201 = arith.constant 2 : index
    %c0_202 = arith.constant 0 : index
    %234 = vector.load %arg10[%c2_201, %c0_202] : memref<12x128xf32, #tpu.memory_space<vmem>>, vector<8x128xf32>
    tpu.vector_store %arg10[%c2_201, %c0_202], %233 {strides = array<i32>} : memref<12x128xf32, #tpu.memory_space<vmem>>, vector<8x128xf32>,
    %c1_203 = arith.constant 1 : index
    %c0_204 = arith.constant 0 : index
    %235 = vector.load %arg10[%c1_203, %c0_204] : memref<12x128xf32, #tpu.memory_space<vmem>>, vector<8x128xf32>
    %236 = arith.truncf %235 : vector<8x128xf32> to vector<8x128xbf16>
    %c29 = arith.constant 29 : index
    %c0_205 = arith.constant 0 : index
    %c0_206 = arith.constant 0 : index
    %237 = vector.load %arg5[%c29, %c0_205, %c0_206] : memref<38x128x128xbf16, #tpu.memory_space<vmem>>, vector<1x128x128xbf16>
    %238 = vector.shape_cast %237 : vector<1x128x128xbf16> to vector<128x128xbf16>
    %cst_207 = arith.constant dense<0.000000e+00> : vector<8x128xf32>
    %239 = tpu.matmul %236, %238, %cst_207 {dimension_numbers = #tpu.dot_dimension_numbers<[1], [0], [0], [1], [0, 0, 1, 1], [], []>} : vector<8x128xbf16>, vector<128x128xbf16>, vector<8x128xf32> -> vector<8x128xf32>
    %c2_208 = arith.constant 2 : index
    %c0_209 = arith.constant 0 : index
    %240 = vector.load %arg10[%c2_208, %c0_209] : memref<12x128xf32, #tpu.memory_space<vmem>>, vector<8x128xf32>
    %241 = arith.truncf %240 : vector<8x128xf32> to vector<8x128xbf16>
    %c30 = arith.constant 30 : index
    %c0_210 = arith.constant 0 : index
    %c0_211 = arith.constant 0 : index
    %242 = vector.load %arg5[%c30, %c0_210, %c0_211] : memref<38x128x128xbf16, #tpu.memory_space<vmem>>, vector<1x128x128xbf16>
    %243 = vector.shape_cast %242 : vector<1x128x128xbf16> to vector<128x128xbf16>
    %cst_212 = arith.constant dense<0.000000e+00> : vector<8x128xf32>
    %244 = tpu.matmul %241, %243, %cst_212 {dimension_numbers = #tpu.dot_dimension_numbers<[1], [0], [0], [1], [0, 0, 1, 1], [], []>} : vector<8x128xbf16>, vector<128x128xbf16>, vector<8x128xf32> -> vector<8x128xf32>
    %245 = arith.addf %239, %244 : vector<8x128xf32>
    %c3_213 = arith.constant 3 : index
    %c0_214 = arith.constant 0 : index
    %246 = vector.load %arg10[%c3_213, %c0_214] : memref<12x128xf32, #tpu.memory_space<vmem>>, vector<8x128xf32>
    %247 = arith.truncf %246 : vector<8x128xf32> to vector<8x128xbf16>
    %c31 = arith.constant 31 : index
    %c0_215 = arith.constant 0 : index
    %c0_216 = arith.constant 0 : index
    %248 = vector.load %arg5[%c31, %c0_215, %c0_216] : memref<38x128x128xbf16, #tpu.memory_space<vmem>>, vector<1x128x128xbf16>
    %249 = vector.shape_cast %248 : vector<1x128x128xbf16> to vector<128x128xbf16>
    %cst_217 = arith.constant dense<0.000000e+00> : vector<8x128xf32>
    %250 = tpu.matmul %247, %249, %cst_217 {dimension_numbers = #tpu.dot_dimension_numbers<[1], [0], [0], [1], [0, 0, 1, 1], [], []>} : vector<8x128xbf16>, vector<128x128xbf16>, vector<8x128xf32> -> vector<8x128xf32>
    %251 = arith.addf %245, %250 : vector<8x128xf32>
    %c9_218 = arith.constant 9 : index
    %c0_219 = arith.constant 0 : index
    %252 = vector.load %arg7[%c9_218, %c0_219] : memref<16x128xf32, #tpu.memory_space<vmem>>, vector<1x128xf32>
    %253 = vector.broadcast %252 : vector<1x128xf32> to vector<8x128xf32>
    %254 = arith.addf %251, %253 : vector<8x128xf32>
    %255 = arith.addf %208, %254 : vector<8x128xf32>
    %c2_220 = arith.constant 2 : index
    %c0_221 = arith.constant 0 : index
    %256 = vector.load %arg10[%c2_220, %c0_221] : memref<12x128xf32, #tpu.memory_space<vmem>>, vector<8x128xf32>
    tpu.vector_store %arg10[%c2_220, %c0_221], %11 {strides = array<i32>} : memref<12x128xf32, #tpu.memory_space<vmem>>, vector<8x128xf32>,
    %c0_222 = arith.constant 0 : index
    %c0_223 = arith.constant 0 : index
    %257 = vector.load %arg6[%c0_222, %c0_223] : memref<128x128xbf16, #tpu.memory_space<vmem>>, vector<128x128xbf16>
    %c1_224 = arith.constant 1 : index
    %c0_225 = arith.constant 0 : index
    %258 = vector.load %arg10[%c1_224, %c0_225] : memref<12x128xf32, #tpu.memory_space<vmem>>, vector<8x128xf32>
    %259 = arith.truncf %258 : vector<8x128xf32> to vector<8x128xbf16>
    %cst_226 = arith.constant dense<0.000000e+00> : vector<8x128xf32>
    %260 = tpu.matmul %259, %257, %cst_226 {dimension_numbers = #tpu.dot_dimension_numbers<[1], [0], [0], [1], [0, 0, 1, 1], [], []>} : vector<8x128xbf16>, vector<128x128xbf16>, vector<8x128xf32> -> vector<8x128xf32>
    %c2_227 = arith.constant 2 : index
    %c0_228 = arith.constant 0 : index
    %261 = vector.load %arg10[%c2_227, %c0_228] : memref<12x128xf32, #tpu.memory_space<vmem>>, vector<8x128xf32>
    %262 = arith.truncf %261 : vector<8x128xf32> to vector<8x128xbf16>
    %cst_229 = arith.constant dense<0.000000e+00> : vector<8x128xf32>
    %263 = tpu.matmul %262, %257, %cst_229 {dimension_numbers = #tpu.dot_dimension_numbers<[1], [0], [0], [1], [0, 0, 1, 1], [], []>} : vector<8x128xbf16>, vector<128x128xbf16>, vector<8x128xf32> -> vector<8x128xf32>
    %264 = arith.addf %260, %263 : vector<8x128xf32>
    %c3_230 = arith.constant 3 : index
    %c0_231 = arith.constant 0 : index
    %265 = vector.load %arg10[%c3_230, %c0_231] : memref<12x128xf32, #tpu.memory_space<vmem>>, vector<8x128xf32>
    %266 = arith.truncf %265 : vector<8x128xf32> to vector<8x128xbf16>
    %cst_232 = arith.constant dense<0.000000e+00> : vector<8x128xf32>
    %267 = tpu.matmul %266, %257, %cst_232 {dimension_numbers = #tpu.dot_dimension_numbers<[1], [0], [0], [1], [0, 0, 1, 1], [], []>} : vector<8x128xbf16>, vector<128x128xbf16>, vector<8x128xf32> -> vector<8x128xf32>
    %268 = arith.addf %264, %267 : vector<8x128xf32>
    %c0_233 = arith.constant 0 : index
    %c0_234 = arith.constant 0 : index
    %269 = vector.load %arg8[%c0_233, %c0_234] : memref<8x128xf32, #tpu.memory_space<vmem>>, vector<8x128xf32>
    %270 = arith.mulf %268, %269 : vector<8x128xf32>
    %271 = arith.addf %270, %21 : vector<8x128xf32>
    %c2_235 = arith.constant 2 : index
    %c0_236 = arith.constant 0 : index
    %272 = vector.load %arg10[%c2_235, %c0_236] : memref<12x128xf32, #tpu.memory_space<vmem>>, vector<8x128xf32>
    tpu.vector_store %arg10[%c2_235, %c0_236], %21 {strides = array<i32>} : memref<12x128xf32, #tpu.memory_space<vmem>>, vector<8x128xf32>,
    %c0_237 = arith.constant 0 : index
    %c0_238 = arith.constant 0 : index
    %273 = vector.load %arg6[%c0_237, %c0_238] : memref<128x128xbf16, #tpu.memory_space<vmem>>, vector<128x128xbf16>
    %c1_239 = arith.constant 1 : index
    %c0_240 = arith.constant 0 : index
    %274 = vector.load %arg10[%c1_239, %c0_240] : memref<12x128xf32, #tpu.memory_space<vmem>>, vector<8x128xf32>
    %275 = arith.truncf %274 : vector<8x128xf32> to vector<8x128xbf16>
    %cst_241 = arith.constant dense<0.000000e+00> : vector<8x128xf32>
    %276 = tpu.matmul %275, %273, %cst_241 {dimension_numbers = #tpu.dot_dimension_numbers<[1], [0], [0], [1], [0, 0, 1, 1], [], []>} : vector<8x128xbf16>, vector<128x128xbf16>, vector<8x128xf32> -> vector<8x128xf32>
    %c2_242 = arith.constant 2 : index
    %c0_243 = arith.constant 0 : index
    %277 = vector.load %arg10[%c2_242, %c0_243] : memref<12x128xf32, #tpu.memory_space<vmem>>, vector<8x128xf32>
    %278 = arith.truncf %277 : vector<8x128xf32> to vector<8x128xbf16>
    %cst_244 = arith.constant dense<0.000000e+00> : vector<8x128xf32>
    %279 = tpu.matmul %278, %273, %cst_244 {dimension_numbers = #tpu.dot_dimension_numbers<[1], [0], [0], [1], [0, 0, 1, 1], [], []>} : vector<8x128xbf16>, vector<128x128xbf16>, vector<8x128xf32> -> vector<8x128xf32>
    %280 = arith.addf %276, %279 : vector<8x128xf32>
    %c3_245 = arith.constant 3 : index
    %c0_246 = arith.constant 0 : index
    %281 = vector.load %arg10[%c3_245, %c0_246] : memref<12x128xf32, #tpu.memory_space<vmem>>, vector<8x128xf32>
    %282 = arith.truncf %281 : vector<8x128xf32> to vector<8x128xbf16>
    %cst_247 = arith.constant dense<0.000000e+00> : vector<8x128xf32>
    %283 = tpu.matmul %282, %273, %cst_247 {dimension_numbers = #tpu.dot_dimension_numbers<[1], [0], [0], [1], [0, 0, 1, 1], [], []>} : vector<8x128xbf16>, vector<128x128xbf16>, vector<8x128xf32> -> vector<8x128xf32>
    %284 = arith.addf %280, %283 : vector<8x128xf32>
    %c0_248 = arith.constant 0 : index
    %c0_249 = arith.constant 0 : index
    %285 = vector.load %arg8[%c0_248, %c0_249] : memref<8x128xf32, #tpu.memory_space<vmem>>, vector<8x128xf32>
    %286 = arith.mulf %284, %285 : vector<8x128xf32>
    %cst_250 = arith.constant 2.000000e+00 : f32
    %287 = vector.broadcast %cst_250 : f32 to vector<8x128xf32>
    %288 = arith.mulf %287, %286 : vector<8x128xf32>
    %cst_251 = arith.constant 0.000000e+00 : f32
    %289 = vector.broadcast %cst_251 : f32 to vector<8x128xf32>
    %290 = arith.maximumf %11, %289 : vector<8x128xf32>
    %c2_252 = arith.constant 2 : index
    %c0_253 = arith.constant 0 : index
    %291 = vector.load %arg10[%c2_252, %c0_253] : memref<12x128xf32, #tpu.memory_space<vmem>>, vector<8x128xf32>
    tpu.vector_store %arg10[%c2_252, %c0_253], %290 {strides = array<i32>} : memref<12x128xf32, #tpu.memory_space<vmem>>, vector<8x128xf32>,
    %c1_254 = arith.constant 1 : index
    %c0_255 = arith.constant 0 : index
    %292 = vector.load %arg10[%c1_254, %c0_255] : memref<12x128xf32, #tpu.memory_space<vmem>>, vector<8x128xf32>
    %293 = arith.truncf %292 : vector<8x128xf32> to vector<8x128xbf16>
    %c32 = arith.constant 32 : index
    %c0_256 = arith.constant 0 : index
    %c0_257 = arith.constant 0 : index
    %294 = vector.load %arg5[%c32, %c0_256, %c0_257] : memref<38x128x128xbf16, #tpu.memory_space<vmem>>, vector<1x128x128xbf16>
    %295 = vector.shape_cast %294 : vector<1x128x128xbf16> to vector<128x128xbf16>
    %cst_258 = arith.constant dense<0.000000e+00> : vector<8x128xf32>
    %296 = tpu.matmul %293, %295, %cst_258 {dimension_numbers = #tpu.dot_dimension_numbers<[1], [0], [0], [1], [0, 0, 1, 1], [], []>} : vector<8x128xbf16>, vector<128x128xbf16>, vector<8x128xf32> -> vector<8x128xf32>
    %c2_259 = arith.constant 2 : index
    %c0_260 = arith.constant 0 : index
    %297 = vector.load %arg10[%c2_259, %c0_260] : memref<12x128xf32, #tpu.memory_space<vmem>>, vector<8x128xf32>
    %298 = arith.truncf %297 : vector<8x128xf32> to vector<8x128xbf16>
    %c33 = arith.constant 33 : index
    %c0_261 = arith.constant 0 : index
    %c0_262 = arith.constant 0 : index
    %299 = vector.load %arg5[%c33, %c0_261, %c0_262] : memref<38x128x128xbf16, #tpu.memory_space<vmem>>, vector<1x128x128xbf16>
    %300 = vector.shape_cast %299 : vector<1x128x128xbf16> to vector<128x128xbf16>
    %cst_263 = arith.constant dense<0.000000e+00> : vector<8x128xf32>
    %301 = tpu.matmul %298, %300, %cst_263 {dimension_numbers = #tpu.dot_dimension_numbers<[1], [0], [0], [1], [0, 0, 1, 1], [], []>} : vector<8x128xbf16>, vector<128x128xbf16>, vector<8x128xf32> -> vector<8x128xf32>
    %302 = arith.addf %296, %301 : vector<8x128xf32>
    %c3_264 = arith.constant 3 : index
    %c0_265 = arith.constant 0 : index
    %303 = vector.load %arg10[%c3_264, %c0_265] : memref<12x128xf32, #tpu.memory_space<vmem>>, vector<8x128xf32>
    %304 = arith.truncf %303 : vector<8x128xf32> to vector<8x128xbf16>
    %c34 = arith.constant 34 : index
    %c0_266 = arith.constant 0 : index
    %c0_267 = arith.constant 0 : index
    %305 = vector.load %arg5[%c34, %c0_266, %c0_267] : memref<38x128x128xbf16, #tpu.memory_space<vmem>>, vector<1x128x128xbf16>
    %306 = vector.shape_cast %305 : vector<1x128x128xbf16> to vector<128x128xbf16>
    %cst_268 = arith.constant dense<0.000000e+00> : vector<8x128xf32>
    %307 = tpu.matmul %304, %306, %cst_268 {dimension_numbers = #tpu.dot_dimension_numbers<[1], [0], [0], [1], [0, 0, 1, 1], [], []>} : vector<8x128xbf16>, vector<128x128xbf16>, vector<8x128xf32> -> vector<8x128xf32>
    %308 = arith.addf %302, %307 : vector<8x128xf32>
    %c10_269 = arith.constant 10 : index
    %c0_270 = arith.constant 0 : index
    %309 = vector.load %arg7[%c10_269, %c0_270] : memref<16x128xf32, #tpu.memory_space<vmem>>, vector<1x128xf32>
    %310 = vector.broadcast %309 : vector<1x128xf32> to vector<8x128xf32>
    %311 = arith.addf %308, %310 : vector<8x128xf32>
    %cst_271 = arith.constant 0.000000e+00 : f32
    %312 = vector.broadcast %cst_271 : f32 to vector<8x128xf32>
    %313 = arith.maximumf %311, %312 : vector<8x128xf32>
    %c2_272 = arith.constant 2 : index
    %c0_273 = arith.constant 0 : index
    %314 = vector.load %arg10[%c2_272, %c0_273] : memref<12x128xf32, #tpu.memory_space<vmem>>, vector<8x128xf32>
    tpu.vector_store %arg10[%c2_272, %c0_273], %313 {strides = array<i32>} : memref<12x128xf32, #tpu.memory_space<vmem>>, vector<8x128xf32>,
    %c1_274 = arith.constant 1 : index
    %c0_275 = arith.constant 0 : index
    %315 = vector.load %arg10[%c1_274, %c0_275] : memref<12x128xf32, #tpu.memory_space<vmem>>, vector<8x128xf32>
    %316 = arith.truncf %315 : vector<8x128xf32> to vector<8x128xbf16>
    %c35 = arith.constant 35 : index
    %c0_276 = arith.constant 0 : index
    %c0_277 = arith.constant 0 : index
    %317 = vector.load %arg5[%c35, %c0_276, %c0_277] : memref<38x128x128xbf16, #tpu.memory_space<vmem>>, vector<1x128x128xbf16>
    %318 = vector.shape_cast %317 : vector<1x128x128xbf16> to vector<128x128xbf16>
    %cst_278 = arith.constant dense<0.000000e+00> : vector<8x128xf32>
    %319 = tpu.matmul %316, %318, %cst_278 {dimension_numbers = #tpu.dot_dimension_numbers<[1], [0], [0], [1], [0, 0, 1, 1], [], []>} : vector<8x128xbf16>, vector<128x128xbf16>, vector<8x128xf32> -> vector<8x128xf32>
    %c2_279 = arith.constant 2 : index
    %c0_280 = arith.constant 0 : index
    %320 = vector.load %arg10[%c2_279, %c0_280] : memref<12x128xf32, #tpu.memory_space<vmem>>, vector<8x128xf32>
    %321 = arith.truncf %320 : vector<8x128xf32> to vector<8x128xbf16>
    %c36 = arith.constant 36 : index
    %c0_281 = arith.constant 0 : index
    %c0_282 = arith.constant 0 : index
    %322 = vector.load %arg5[%c36, %c0_281, %c0_282] : memref<38x128x128xbf16, #tpu.memory_space<vmem>>, vector<1x128x128xbf16>
    %323 = vector.shape_cast %322 : vector<1x128x128xbf16> to vector<128x128xbf16>
    %cst_283 = arith.constant dense<0.000000e+00> : vector<8x128xf32>
    %324 = tpu.matmul %321, %323, %cst_283 {dimension_numbers = #tpu.dot_dimension_numbers<[1], [0], [0], [1], [0, 0, 1, 1], [], []>} : vector<8x128xbf16>, vector<128x128xbf16>, vector<8x128xf32> -> vector<8x128xf32>
    %325 = arith.addf %319, %324 : vector<8x128xf32>
    %c3_284 = arith.constant 3 : index
    %c0_285 = arith.constant 0 : index
    %326 = vector.load %arg10[%c3_284, %c0_285] : memref<12x128xf32, #tpu.memory_space<vmem>>, vector<8x128xf32>
    %327 = arith.truncf %326 : vector<8x128xf32> to vector<8x128xbf16>
    %c37 = arith.constant 37 : index
    %c0_286 = arith.constant 0 : index
    %c0_287 = arith.constant 0 : index
    %328 = vector.load %arg5[%c37, %c0_286, %c0_287] : memref<38x128x128xbf16, #tpu.memory_space<vmem>>, vector<1x128x128xbf16>
    %329 = vector.shape_cast %328 : vector<1x128x128xbf16> to vector<128x128xbf16>
    %cst_288 = arith.constant dense<0.000000e+00> : vector<8x128xf32>
    %330 = tpu.matmul %327, %329, %cst_288 {dimension_numbers = #tpu.dot_dimension_numbers<[1], [0], [0], [1], [0, 0, 1, 1], [], []>} : vector<8x128xbf16>, vector<128x128xbf16>, vector<8x128xf32> -> vector<8x128xf32>
    %331 = arith.addf %325, %330 : vector<8x128xf32>
    %c11_289 = arith.constant 11 : index
    %c0_290 = arith.constant 0 : index
    %332 = vector.load %arg7[%c11_289, %c0_290] : memref<16x128xf32, #tpu.memory_space<vmem>>, vector<1x128xf32>
    %333 = vector.broadcast %332 : vector<1x128xf32> to vector<8x128xf32>
    %334 = arith.addf %331, %333 : vector<8x128xf32>
    %335 = arith.addf %334, %11 : vector<8x128xf32>
    %c0_291 = arith.constant 0 : index
    %c0_292 = arith.constant 0 : index
    %c0_293 = arith.constant 0 : index
    %c0_294 = arith.constant 0 : index
    %336 = vector.load %arg9[%c0_291, %c0_292, %c0_293, %c0_294] : memref<1x6x8x128xf32, #tpu.memory_space<vmem>>, vector<1x1x8x128xf32>
    %337 = vector.shape_cast %336 : vector<1x1x8x128xf32> to vector<8x128xf32>
    %338 = vector.shape_cast %21 : vector<8x128xf32> to vector<1x1x8x128xf32>
    tpu.vector_store %arg9[%c0_291, %c0_292, %c0_293, %c0_294], %338 {strides = array<i32>} : memref<1x6x8x128xf32, #tpu.memory_space<vmem>>, vector<1x1x8x128xf32>,
    %c0_295 = arith.constant 0 : index
    %c1_296 = arith.constant 1 : index
    %c0_297 = arith.constant 0 : index
    %c0_298 = arith.constant 0 : index
    %339 = vector.load %arg9[%c0_295, %c1_296, %c0_297, %c0_298] : memref<1x6x8x128xf32, #tpu.memory_space<vmem>>, vector<1x1x8x128xf32>
    %340 = vector.shape_cast %339 : vector<1x1x8x128xf32> to vector<8x128xf32>
    %341 = vector.shape_cast %138 : vector<8x128xf32> to vector<1x1x8x128xf32>
    tpu.vector_store %arg9[%c0_295, %c1_296, %c0_297, %c0_298], %341 {strides = array<i32>} : memref<1x6x8x128xf32, #tpu.memory_space<vmem>>, vector<1x1x8x128xf32>,
    %c0_299 = arith.constant 0 : index
    %c2_300 = arith.constant 2 : index
    %c0_301 = arith.constant 0 : index
    %c0_302 = arith.constant 0 : index
    %342 = vector.load %arg9[%c0_299, %c2_300, %c0_301, %c0_302] : memref<1x6x8x128xf32, #tpu.memory_space<vmem>>, vector<1x1x8x128xf32>
    %343 = vector.shape_cast %342 : vector<1x1x8x128xf32> to vector<8x128xf32>
    %344 = vector.shape_cast %255 : vector<8x128xf32> to vector<1x1x8x128xf32>
    tpu.vector_store %arg9[%c0_299, %c2_300, %c0_301, %c0_302], %344 {strides = array<i32>} : memref<1x6x8x128xf32, #tpu.memory_space<vmem>>, vector<1x1x8x128xf32>,
    %c0_303 = arith.constant 0 : index
    %c3_304 = arith.constant 3 : index
    %c0_305 = arith.constant 0 : index
    %c0_306 = arith.constant 0 : index
    %345 = vector.load %arg9[%c0_303, %c3_304, %c0_305, %c0_306] : memref<1x6x8x128xf32, #tpu.memory_space<vmem>>, vector<1x1x8x128xf32>
    %346 = vector.shape_cast %345 : vector<1x1x8x128xf32> to vector<8x128xf32>
    %347 = vector.shape_cast %271 : vector<8x128xf32> to vector<1x1x8x128xf32>
    tpu.vector_store %arg9[%c0_303, %c3_304, %c0_305, %c0_306], %347 {strides = array<i32>} : memref<1x6x8x128xf32, #tpu.memory_space<vmem>>, vector<1x1x8x128xf32>,
    %c0_307 = arith.constant 0 : index
    %c4_308 = arith.constant 4 : index
    %c0_309 = arith.constant 0 : index
    %c0_310 = arith.constant 0 : index
    %348 = vector.load %arg9[%c0_307, %c4_308, %c0_309, %c0_310] : memref<1x6x8x128xf32, #tpu.memory_space<vmem>>, vector<1x1x8x128xf32>
    %349 = vector.shape_cast %348 : vector<1x1x8x128xf32> to vector<8x128xf32>
    %350 = vector.shape_cast %288 : vector<8x128xf32> to vector<1x1x8x128xf32>
    tpu.vector_store %arg9[%c0_307, %c4_308, %c0_309, %c0_310], %350 {strides = array<i32>} : memref<1x6x8x128xf32, #tpu.memory_space<vmem>>, vector<1x1x8x128xf32>,
    %c0_311 = arith.constant 0 : index
    %c5_312 = arith.constant 5 : index
    %c0_313 = arith.constant 0 : index
    %c0_314 = arith.constant 0 : index
    %351 = vector.load %arg9[%c0_311, %c5_312, %c0_313, %c0_314] : memref<1x6x8x128xf32, #tpu.memory_space<vmem>>, vector<1x1x8x128xf32>
    %352 = vector.shape_cast %351 : vector<1x1x8x128xf32> to vector<8x128xf32>
    %353 = vector.shape_cast %335 : vector<8x128xf32> to vector<1x1x8x128xf32>
    tpu.vector_store %arg9[%c0_311, %c5_312, %c0_313, %c0_314], %353 {strides = array<i32>} : memref<1x6x8x128xf32, #tpu.memory_space<vmem>>, vector<1x1x8x128xf32>,
    return
  }
  func.func @transform_0(%arg0: i32) -> (i32, i32, i32) {
    %c0_i32 = arith.constant 0 : i32
    %c0_i32_0 = arith.constant 0 : i32
    %c0_i32_1 = arith.constant 0 : i32
    return %arg0, %c0_i32, %c0_i32_0 : i32, i32, i32
  }
  func.func @transform_1(%arg0: i32) -> (i32, i32, i32) {
    %c0_i32 = arith.constant 0 : i32
    %c0_i32_0 = arith.constant 0 : i32
    %c0_i32_1 = arith.constant 0 : i32
    return %arg0, %c0_i32, %c0_i32_0 : i32, i32, i32
  }
  func.func @transform_2(%arg0: i32) -> (i32, i32) {
    %c0_i32 = arith.constant 0 : i32
    %c0_i32_0 = arith.constant 0 : i32
    %c0_i32_1 = arith.constant 0 : i32
    return %c0_i32, %c0_i32_0 : i32, i32
  }
  func.func @transform_3(%arg0: i32) -> (i32, i32) {
    %c0_i32 = arith.constant 0 : i32
    %c0_i32_0 = arith.constant 0 : i32
    %c0_i32_1 = arith.constant 0 : i32
    return %c0_i32, %c0_i32_0 : i32, i32
  }
  func.func @transform_4(%arg0: i32) -> (i32, i32, i32) {
    %c0_i32 = arith.constant 0 : i32
    %c0_i32_0 = arith.constant 0 : i32
    %c0_i32_1 = arith.constant 0 : i32
    %c0_i32_2 = arith.constant 0 : i32
    return %c0_i32, %c0_i32_0, %c0_i32_1 : i32, i32, i32
  }
  func.func @transform_5(%arg0: i32) -> (i32, i32) {
    %c0_i32 = arith.constant 0 : i32
    %c0_i32_0 = arith.constant 0 : i32
    %c0_i32_1 = arith.constant 0 : i32
    return %c0_i32, %c0_i32_0 : i32, i32
  }
  func.func @transform_6(%arg0: i32) -> (i32, i32) {
    %c0_i32 = arith.constant 0 : i32
    %c0_i32_0 = arith.constant 0 : i32
    %c0_i32_1 = arith.constant 0 : i32
    return %c0_i32, %c0_i32_0 : i32, i32
  }
  func.func @transform_7(%arg0: i32) -> (i32, i32) {
    %c0_i32 = arith.constant 0 : i32
    %c0_i32_0 = arith.constant 0 : i32
    %c0_i32_1 = arith.constant 0 : i32
    return %c0_i32, %c0_i32_0 : i32, i32
  }
  func.func @transform_8(%arg0: i32) -> (i32, i32, i32, i32) {
    %c0_i32 = arith.constant 0 : i32
    %c0_i32_0 = arith.constant 0 : i32
    %c0_i32_1 = arith.constant 0 : i32
    %c0_i32_2 = arith.constant 0 : i32
    return %arg0, %c0_i32, %c0_i32_0, %c0_i32_1 : i32, i32, i32, i32
  }
}

</mosaic_0001>

<bundles_post_ra>
// kernel: first_cell_forward.1
= control target key start
LH: loop header
LB: loop body
LE: loop exit
PB: predicated region body
PF: predicated region fallthrough
CT: control target
= control target key end

     0   :  { %s7925_s27 = smov 0   ;;  %s9626_s0 = inlined_call_operand.vmem [shape: f32[2,8,96], index: 0, kind: input, shape index: {}]   ;;  %s9627_s1 = inlined_call_operand.vmem [shape: f32[2,8,128], index: 1, kind: input, shape index: {}]   ;;  %s9628_s2 = inlined_call_operand.vmem [shape: bf16[96,128], index: 2, kind: input, shape index: {}]   ;;  %s9629_s3 = inlined_call_operand.vmem [shape: bf16[128,128], index: 3, kind: input, shape index: {}]   ;;  %s9630_s4 = inlined_call_operand.vmem [shape: bf16[38,128,128], index: 4, kind: input, shape index: {}]   ;;  %s9631_s5 = inlined_call_operand.vmem [shape: bf16[128,128], index: 5, kind: input, shape index: {}]   ;;  %s9632_s6 = inlined_call_operand.vmem [shape: f32[16,128], index: 6, kind: input, shape index: {}]   ;;  %s9633_s7 = inlined_call_operand.vmem [shape: f32[8,128], index: 7, kind: input, shape index: {}]   ;;  %s9634_s8 = inlined_call_operand.vmem [shape: f32[2,6,8,128], index: 8, kind: output, shape index: {}]  }
   0x1 LB: > { %s5166_s28 = sadd.s32 4294967295, %s7876_s27   ;;  %p5170_p0 = scmp.ge.s32.totalorder %s7876_s27, 1  ;;  %s7876_s27 = sphi %s7925_s27, %s18_s27  }
   0x2   : > { %p270_p1 = scmp.lt.s32.totalorder %s7876_s27, 3 }
   0x4   : > { %p271_p2 = pnand %p5170_p0, %p270_p1 }
   0x5   : > { %v7535_v0 = vld [vmem:[%s9628_s2] sm:$0xff] (!%p271_p2)   ;;  %v7878_v1 = vmov (!%p271_p2), 0.0   ;;  %v7536_v2 = vld [vmem:[%s9628_s2 + $0x8] sm:$0xff] (!%p271_p2)   ;;  %vm7879_vm0 = vmmov (!%p271_p2), 0   ;;  %p307_p3 = scmp.lt.s32.totalorder (!%p271_p2), %s5166_s28, 1  ;;  %v7537_v3 = vld [vmem:[%s9628_s2 + $0x10] sm:$0xff] (!%p271_p2)  }
   0x6   : > { %274 = sbr.rel (%p271_p2) target bundleno = 2097 (0x831), region = 52  ;;  %6532 = vmatprep.subr.bf16.mxu0 (!%p271_p2), %v7878_v1  ;;  %321 = vst [vmem:[#allocation2] sm:$0xff] (!%p271_p2), %v7878_v1  ;;  %322 = vst [vmem:[#allocation2 + $0x8] sm:$0xf] (!%p271_p2), %v7878_v1  ;;  %6548 = vmatprep.subr.bf16.mxu1 (!%p271_p2), %v7878_v1  ;;  %v7541_v4 = vld [vmem:[%s9629_s3] sm:$0xff] (!%p271_p2)   ;;  %v7542_v5 = vld [vmem:[%s9629_s3 + $0x8] sm:$0xff] (!%p271_p2)  }
   0x7   : > { %6533 = vmatpush3.bf16.msra.mxu0 (!%p271_p2), %v7535_v0  ;;  %6544 = vmatprep.mubr.msk.bf16.mxu0 (!%p271_p2), %vm7879_vm0, %v7878_v1  ;;  %v7538_v6 = vld [vmem:[%s9628_s2 + $0x18] sm:$0xff] (!%p271_p2)   ;;  %v7543_v7 = vld [vmem:[%s9629_s3 + $0x10] sm:$0xff] (!%p271_p2)   ;;  %v7539_v8 = vld [vmem:[%s9628_s2 + $0x20] sm:$0xff] (!%p271_p2)   ;;  %vm379_vm1 = vcmask (!%p271_p2), 785408  }
   0x8   : > { %6534 = vmatprep.subr.bf16.mxu0 (!%p271_p2), %v7878_v1  ;;  %6564 = vmatprep.mubr.msk.bf16.mxu1 (!%p271_p2), %vm7879_vm0, %v7878_v1  ;;  %v7544_v11 = vld [vmem:[%s9629_s3 + $0x18] sm:$0xff] (!%p271_p2)   ;;  %v7540_v12 = vld [vmem:[%s9628_s2 + $0x28] sm:$0xff] (!%p271_p2)   ;;  %v7545_v13 = vld [vmem:[%s9629_s3 + $0x20] sm:$0xff] (!%p271_p2)  }
   0x9   : > { %6549 = vmatpush3.bf16.msra.mxu1 (!%p271_p2), %v7541_v4  ;;  %v7549_v16 = vld [vmem:[%s9630_s4 + $0x40] sm:$0xff] (!%p271_p2)   ;;  %v7546_v17 = vld [vmem:[%s9629_s3 + $0x28] sm:$0xff] (!%p271_p2)   ;;  %v7547_v20 = vld [vmem:[%s9629_s3 + $0x30] sm:$0xff] (!%p271_p2)  }
   0xa   : > { %6550 = vmatprep.subr.bf16.mxu1 (!%p271_p2), %v7878_v1  ;;  %v7551_v19 = vld [vmem:[%s9630_s4 + $0x48] sm:$0xff] (!%p271_p2)   ;;  %v7553_v21 = vld [vmem:[%s9630_s4 + $0x50] sm:$0xff] (!%p271_p2)   ;;  %v7548_v22 = vld [vmem:[%s9629_s3 + $0x38] sm:$0xff] (!%p271_p2)  }
   0xb   : > { %6535 = vmatpush3.bf16.msra.mxu0 (!%p271_p2), %v7536_v2  ;;  %v7555_v23 = vld [vmem:[%s9630_s4 + $0x58] sm:$0xff] (!%p271_p2)   ;;  %v7550_v24 = vld [vmem:[%s9630_s4] sm:$0xff] (!%p271_p2)   ;;  %v7552_v27 = vld [vmem:[%s9630_s4 + $0x8] sm:$0xff] (!%p271_p2)  }
   0xc   : > { %6536 = vmatprep.subr.bf16.mxu0 (!%p271_p2), %v7878_v1  ;;  %v7557_v26 = vld [vmem:[%s9630_s4 + $0x60] sm:$0xff] (!%p271_p2)   ;;  %v7554_v28 = vld [vmem:[%s9630_s4 + $0x10] sm:$0xff] (!%p271_p2)   ;;  %v7556_v29 = vld [vmem:[%s9630_s4 + $0x18] sm:$0xff] (!%p271_p2)  }
   0xd   : > { %s9636_s28 = smov (!%p307_p3, %s5166_s28), 1  ;;  %6551 = vmatpush3.bf16.msra.mxu1 %v7542_v5  ;;  %v7558_v30 = vld [vmem:[%s9630_s4 + $0x20] sm:$0xff]   ;;  %v7559_v31 = vld [vmem:[%s9630_s4 + $0x68] sm:$0xff]   ;;  %v7561_v33 = vld [vmem:[%s9630_s4 + $0x70] sm:$0xff]  }
   0xe   : > { %s5171_s15 = sshll.u32 %s9636_s28, 3  ;;  %6552 = vmatprep.subr.bf16.mxu1 %v7878_v1  ;;  %v7560_v32 = vld [vmem:[%s9630_s4 + $0x28] sm:$0xff]   ;;  %v7562_v34 = vld [vmem:[%s9630_s4 + $0x30] sm:$0xff]   ;;  %v7563_v35 = vld [vmem:[%s9630_s4 + $0x78] sm:$0xff]   ;;  %s7524_s17 = smul.u32 48, %s9636_s28 }
   0xf   : > { %6537 = vmatpush3.bf16.msra.mxu0 %v7537_v3  ;;  %s310_s22 = scalar_lea.vmem %s9626_s0, %s5171_s15  ;;  %s314_s13 = scalar_lea.vmem %s9627_s1, %s5171_s15  ;;  %v7564_v36 = vld [vmem:[%s9630_s4 + $0x38] sm:$0xff]   ;;  %v5174_v37 = vld [vmem:[%s9632_s6] ss:$0 sm:$0xff]  ;;  %v5182_v50 = vld [vmem:[%s9632_s6 + $0x1] ss:$0 sm:$0xff] }
  0x10   : > { %6538 = vmatprep.subr.bf16.mxu0 %v7878_v1  ;;  %v323_v9 = vld [vmem:[%s310_s22] sm:$0xff]  ;;  %s8096_s28 = scalar_lea.vmem %s9634_s8, %s7524_s17  ;;  %v7567_v52 = vld [vmem:[%s9630_s4 + $0x88] sm:$0xff]   ;;  %v7569_v58 = vld [vmem:[%s9630_s4 + $0x90] sm:$0xff]  }
  0x11   : > { %v324_v10 = vmax.f32 %v323_v9, 0.0  ;;  %6553 = vmatpush3.bf16.msra.mxu1 %v7543_v7  ;;  %v423_v15 = vld [vmem:[%s314_s13] sm:$0xff]  ;;  %v7568_v53 = vld [vmem:[%s9630_s4 + $0xc8] sm:$0xff]   ;;  %v7570_v59 = vld [vmem:[%s9630_s4 + $0xd0] sm:$0xff]  }
  0x12   : > { %6554 = vmatprep.subr.bf16.mxu1 %v7878_v1  ;;  %v424_v18 = vmax.f32 %v423_v15, 0.0  ;;  %v7565_v44 = vld [vmem:[%s9630_s4 + $0x80] sm:$0xff]   ;;  %v7571_v60 = vld [vmem:[%s9630_s4 + $0x98] sm:$0xff]   ;;  %v7575_v0 = vld [vmem:[%s9630_s4 + $0xa8] sm:$0xff]  }
  0x13   : > { %6539 = vmatpush3.bf16.msra.mxu0 %v7538_v6  ;;  %v325_v14 = vpack.c.bf16 %v324_v10, %v324_v10  ;;  %v7566_v47 = vld [vmem:[%s9630_s4 + $0xc0] sm:$0xff]   ;;  %v7572_v61 = vld [vmem:[%s9630_s4 + $0xd8] sm:$0xff]   ;;  %v7576_v2 = vld [vmem:[%s9630_s4 + $0xe8] sm:$0xff]  }
  0x14   : > { %6540 = vmatprep.subr.bf16.mxu0 %v7878_v1  ;;  %v425_v25 = vpack.c.bf16 %v424_v18, %v424_v18  ;;  %v7573_v62 = vld [vmem:[%s9630_s4 + $0xa0] sm:$0xff]   ;;  %v7577_v3 = vld [vmem:[%s9630_s4 + $0xb0] sm:$0xff]   ;;  %v7579_v5 = vld [vmem:[%s9630_s4 + $0xb8] sm:$0xff]  }
  0x15   : > { %6555 = vmatpush3.bf16.msra.mxu1 %v7544_v11  ;;  %v7574_v63 = vld [vmem:[%s9630_s4 + $0xe0] sm:$0xff]   ;;  %v7578_v4 = vld [vmem:[%s9630_s4 + $0xf0] sm:$0xff]   ;;  %v7580_v6 = vld [vmem:[%s9630_s4 + $0xf8] sm:$0xff]  }
  0x16   : > { %6556 = vmatprep.subr.bf16.mxu1 %v7878_v1  ;;  %v7582_v11 = vld [vmem:[%s9630_s4 + $0x108] sm:$0xff]  }
  0x17   : > { %6541 = vmatpush3.bf16.msra.mxu0 %v7539_v8  ;;  %v7581_v8 = vld [vmem:[%s9630_s4 + $0x100] sm:$0xff]   ;;  %v7586_v15 = vld [vmem:[%s9630_s4 + $0x128] sm:$0xff]  }
  0x18   : > { %6542 = vmatprep.subr.bf16.mxu0 %v7878_v1 }
  0x19   : > { %6557 = vmatpush3.bf16.msra.mxu1 %v7545_v13  ;;  %v7584_v13 = vld [vmem:[%s9630_s4 + $0x118] sm:$0xff]  }
  0x1a   : > { %6558 = vmatprep.subr.bf16.mxu1 %v7878_v1 }
  0x1b   : > { %6543 = vmatpush3.bf16.msra.mxu0 %v7540_v12  ;;  %v7583_v12 = vld [vmem:[%s9630_s4 + $0x110] sm:$0xff]  }
  0x1c   : > { %6568 = vmatprep.subr.bf16.mxu0 %v7878_v1 }
  0x1d   : > { %6559 = vmatpush3.bf16.msra.mxu1 %v7546_v17  ;;  %v7588_v17 = vld [vmem:[%s9630_s4 + $0x138] sm:$0xff]  }
  0x1e   : > { %6545 = vmatmul.mubr.msk.bf16.vlgmr.msra.gmra.mrb[0].mxu0 %vm379_vm1, %v325_v14  ;;  %6560 = vmatprep.subr.bf16.mxu1 %v7878_v1  ;;  %v7585_v14 = vld [vmem:[%s9630_s4 + $0x120] sm:$0xff]  }
  0x1f   : > { %6569 = vmatpush3.bf16.msra.mxu0 %v7549_v16  ;;  %6584 = vmatprep.mubr.msk.bf16.mxu0 %vm7879_vm0, %v7878_v1  ;;  %v7587_v16 = vld [vmem:[%s9630_s4 + $0x130] sm:$0xff]  }
  0x20   : > { %6570 = vmatprep.subr.bf16.mxu0 %v7878_v1 }
  0x21   : > { %6561 = vmatpush3.bf16.msra.mxu1 %v7547_v20 }
  0x22   : > { %6562 = vmatprep.subr.bf16.mxu1 %v7878_v1 }
  0x23   : > { %6571 = vmatpush3.bf16.msra.mxu0 %v7551_v19  ;;  %v7592_v19 = vld [vmem:[%s9630_s4 + $0x2c0] sm:$0xff]  }
  0x24   : > { %6572 = vmatprep.subr.bf16.mxu0 %v7878_v1 }
  0x25   : > { %6563 = vmatpush3.bf16.msra.mxu1 %v7548_v22  ;;  %v7596_v22 = vld [vmem:[%s9630_s4 + $0x2d0] sm:$0xff]  }
  0x26   : > { %6588 = vmatprep.subr.bf16.mxu1 %v7878_v1 }
  0x27   : > { %6573 = vmatpush3.bf16.msra.mxu0 %v7553_v21  ;;  %v7594_v21 = vld [vmem:[%s9630_s4 + $0x2c8] sm:$0xff]  }
  0x28   : > { %6574 = vmatprep.subr.bf16.mxu0 %v7878_v1  ;;  %6565 = vmatmul.mubr.bf16.vlgmr.msra.gmra.mrb[0].mxu1 %v425_v25  ;;  %v7602_v25 = vld [vmem:[%s9630_s4 + $0x2e8] sm:$0xff]  }
  0x29   : > { %6589 = vmatpush3.bf16.msra.mxu1 %v7550_v24  ;;  %6604 = vmatprep.mubr.msk.bf16.mxu1 %vm7879_vm0, %v7878_v1  ;;  %v7600_v24 = vld [vmem:[%s9630_s4 + $0x2e0] sm:$0xff]  }
  0x2a   : > { %6590 = vmatprep.subr.bf16.mxu1 %v7878_v1 }
  0x2b   : > { %6575 = vmatpush3.bf16.msra.mxu0 %v7555_v23  ;;  %v7598_v23 = vld [vmem:[%s9630_s4 + $0x2d8] sm:$0xff]  }
  0x2c   : > { %6576 = vmatprep.subr.bf16.mxu0 %v7878_v1 }
  0x2d   : > { %6591 = vmatpush3.bf16.msra.mxu1 %v7552_v27 }
  0x2e   : > { %6592 = vmatprep.subr.bf16.mxu1 %v7878_v1 }
  0x2f   : > { %6577 = vmatpush3.bf16.msra.mxu0 %v7557_v26  ;;  %v7604_v26 = vld [vmem:[%s9630_s4 + $0x2f0] sm:$0xff]  }
  0x30   : > { %6578 = vmatprep.subr.bf16.mxu0 %v7878_v1 }
  0x31   : > { %6593 = vmatpush3.bf16.msra.mxu1 %v7554_v28  ;;  %v7606_v28 = vld [vmem:[%s9630_s4 + $0x2f8] sm:$0xff]  }
  0x32   : > { %6594 = vmatprep.subr.bf16.mxu1 %v7878_v1 }
  0x33   : > { %6579 = vmatpush3.bf16.msra.mxu0 %v7559_v31  ;;  %v7590_v31 = vld [vmem:[%s9630_s4 + $0x188] sm:$0xff]  }
  0x34   : > { %6580 = vmatprep.subr.bf16.mxu0 %v7878_v1 }
  0x35   : > { %6595 = vmatpush3.bf16.msra.mxu1 %v7556_v29 }
  0x36   : > { %6596 = vmatprep.subr.bf16.mxu1 %v7878_v1 }
  0x37   : > { %6581 = vmatpush3.bf16.msra.mxu0 %v7561_v33  ;;  %v7593_v33 = vld [vmem:[%s9630_s4 + $0x198] sm:$0xff]  }
  0x38   : > { %6582 = vmatprep.subr.bf16.mxu0 %v7878_v1 }
  0x39   : > { %6597 = vmatpush3.bf16.msra.mxu1 %v7558_v30  ;;  %v7589_v30 = vld [vmem:[%s9630_s4 + $0x180] sm:$0xff]  }
  0x3a   : > { %6598 = vmatprep.subr.bf16.mxu1 %v7878_v1 }
  0x3b   : > { %6583 = vmatpush3.bf16.msra.mxu0 %v7563_v35  ;;  %v7610_v35 = vld [vmem:[%s9630_s4 + $0x288] sm:$0xff]  }
  0x3c   : > { %6608 = vmatprep.subr.bf16.mxu0 %v7878_v1 }
  0x3d   : > { %6599 = vmatpush3.bf16.msra.mxu1 %v7560_v32  ;;  %v7591_v32 = vld [vmem:[%s9630_s4 + $0x190] sm:$0xff]  }
  0x3e   : > { %6600 = vmatprep.subr.bf16.mxu1 %v7878_v1 }
  0x41   : > { %6601 = vmatpush3.bf16.msra.mxu1 %v7562_v34  ;;  %v7608_v34 = vld [vmem:[%s9630_s4 + $0x280] sm:$0xff]  }
  0x42   : > { %6602 = vmatprep.subr.bf16.mxu1 %v7878_v1 }
  0x45   : > { %6603 = vmatpush3.bf16.msra.mxu1 %v7564_v36  ;;  %v7595_v36 = vld [vmem:[%s9630_s4 + $0x1a0] sm:$0xff]  }
  0x46   : > { %6628 = vmatprep.subr.bf16.mxu1 %v7878_v1 }
  0xf1   : > { %v417_v38 = vpop.f32.mrb[0].mxu0 }
  0xf2   : > { %v8077_v39 = vadd.f32 %v5174_v37, %v417_v38  ;;  %v6546_v40 = vpop.f32.mrb[1].mxu0  ;;  %v7612_v37 = vld [vmem:[%s9630_s4 + $0x290] sm:$0xff]   ;;  %v7597_v38 = vld [vmem:[%s9630_s4 + $0x1a8] sm:$0xff]  }
  0xf3   : > { %v420_v41 = vpop.f32.mrb[2].mxu0  ;;  %v7614_v40 = vld [vmem:[%s9630_s4 + $0x298] sm:$0xff]  }
  0xf4   : > { %v8080_v42 = vmax.f32 %v8077_v39, 0.0  ;;  %v6547_v43 = vpop.f32.mrb[3].mxu0  ;;  %v7599_v41 = vld [vmem:[%s9630_s4 + $0x1b0] sm:$0xff]  }
  0xf5   : > { %v7616_v43 = vld [vmem:[%s9630_s4 + $0x2a0] sm:$0xff]  }
  0xf6   : > { %536 = vst [vmem:[#allocation2 + $0x2] sm:$0xff] %v8080_v42  ;;  %v8167_v9 = vpack.c.bf16 %v8080_v42, %v8080_v42 }
  0xfb   : > { %v529_v51 = vpop.f32.mrb[0].mxu1 }
  0xfc   : > { %v8104_v54 = vadd.f32 %v5182_v50, %v529_v51  ;;  %v6566_v55 = vpop.f32.mrb[1].mxu1 }
  0xfd   : > { %v537_v45 = vld [vmem:[#allocation2] sm:$0xff]  ;;  %v532_v56 = vpop.f32.mrb[2].mxu1 }
  0xfe   : > { %v555_v46 = vld [vmem:[#allocation2 + $0x1] sm:$0xff]  ;;  %v538_v49 = vpack.c.bf16 %v537_v45, %v537_v45  ;;  %5088 = vst [vmem:[%s8096_s28] sm:$0xff] %v8104_v54  ;;  %v6567_v57 = vpop.f32.mrb[3].mxu1  ;;  %v8235_v27 = vmax.f32 %v8104_v54, 0.0 }
  0xff   : > { %v556_v48 = vpack.c.bf16 %v555_v46, %v555_v46  ;;  %v858_v7 = vld [vmem:[#allocation2 + $0x3] sm:$0xff]  ;;  %v7620_v46 = vld [vmem:[%s9630_s4 + $0x2b0] sm:$0xff]  }
 0x100   : > { %6605 = vmatmul.mubr.bf16.vlgmr.msra.gmra.mrb[4].mxu1 %v538_v49  ;;  %v859_v10 = vpack.c.bf16 %v858_v7, %v858_v7  ;;  %v966_v18 = vld [vmem:[#allocation2 + $0x4] sm:$0xff]  ;;  %v8243_v29 = vpack.c.bf16 %v8235_v27, %v8235_v27 }
 0x101   : > { %6585 = vmatmul.mubr.bf16.vlgmr.msra.gmra.mrb[4].mxu0 %v556_v48  ;;  %6629 = vmatpush3.bf16.msra.mxu1 %v7566_v47  ;;  %v967_v20 = vpack.c.bf16 %v966_v18, %v966_v18  ;;  %v7618_v45 = vld [vmem:[%s9630_s4 + $0x2a8] sm:$0xff]   ;;  %v7622_v47 = vld [vmem:[%s9630_s4 + $0x2b8] sm:$0xff]  }
 0x102   : > { %6609 = vmatpush3.bf16.msra.mxu0 %v7565_v44  ;;  %6630 = vmatprep.subr.bf16.mxu1 %v7878_v1  ;;  %v7601_v44 = vld [vmem:[%s9630_s4 + $0x1b8] sm:$0xff]  }
 0x103   : > { %6610 = vmatprep.subr.bf16.mxu0 %v7878_v1  ;;  %6624 = vmatprep.mubr.msk.bf16.mxu0 %vm7879_vm0, %v7878_v1 }
 0x104   : > { %6644 = vmatprep.mubr.msk.bf16.mxu1 %vm7879_vm0, %v7878_v1 }
 0x105   : > { %6631 = vmatpush3.bf16.msra.mxu1 %v7568_v53 }
 0x106   : > { %6611 = vmatpush3.bf16.msra.mxu0 %v7567_v52  ;;  %6632 = vmatprep.subr.bf16.mxu1 %v7878_v1 }
 0x107   : > { %6612 = vmatprep.subr.bf16.mxu0 %v7878_v1 }
 0x109   : > { %6633 = vmatpush3.bf16.msra.mxu1 %v7570_v59 }
 0x10a   : > { %6613 = vmatpush3.bf16.msra.mxu0 %v7569_v58  ;;  %6634 = vmatprep.subr.bf16.mxu1 %v7878_v1 }
 0x10b   : > { %6614 = vmatprep.subr.bf16.mxu0 %v7878_v1 }
 0x10d   : > { %6635 = vmatpush3.bf16.msra.mxu1 %v7572_v61 }
 0x10e   : > { %6615 = vmatpush3.bf16.msra.mxu0 %v7571_v60  ;;  %6636 = vmatprep.subr.bf16.mxu1 %v7878_v1 }
 0x10f   : > { %6616 = vmatprep.subr.bf16.mxu0 %v7878_v1 }
 0x111   : > { %6637 = vmatpush3.bf16.msra.mxu1 %v7574_v63 }
 0x112   : > { %6617 = vmatpush3.bf16.msra.mxu0 %v7573_v62  ;;  %6638 = vmatprep.subr.bf16.mxu1 %v7878_v1 }
 0x113   : > { %6618 = vmatprep.subr.bf16.mxu0 %v7878_v1 }
 0x115   : > { %6639 = vmatpush3.bf16.msra.mxu1 %v7576_v2 }
 0x116   : > { %6619 = vmatpush3.bf16.msra.mxu0 %v7575_v0  ;;  %6640 = vmatprep.subr.bf16.mxu1 %v7878_v1 }
 0x117   : > { %6620 = vmatprep.subr.bf16.mxu0 %v7878_v1 }
 0x119   : > { %6641 = vmatpush3.bf16.msra.mxu1 %v7578_v4 }
 0x11a   : > { %6621 = vmatpush3.bf16.msra.mxu0 %v7577_v3  ;;  %6642 = vmatprep.subr.bf16.mxu1 %v7878_v1 }
 0x11b   : > { %6622 = vmatprep.subr.bf16.mxu0 %v7878_v1 }
 0x11d   : > { %6643 = vmatpush3.bf16.msra.mxu1 %v7580_v6 }
 0x11e   : > { %6623 = vmatpush3.bf16.msra.mxu0 %v7579_v5  ;;  %6668 = vmatprep.subr.bf16.mxu1 %v7878_v1  ;;  %v5295_v5 = vld [vmem:[%s9632_s6 + $0x2] ss:$0 sm:$0xff] }
 0x11f   : > { %6648 = vmatprep.subr.bf16.mxu0 %v7878_v1 }
 0x120   : > { %6645 = vmatmul.mubr.bf16.vlgmr.msra.gmra.mrb[8].mxu1 %v859_v10 }
 0x121   : > { %6625 = vmatmul.mubr.bf16.vlgmr.msra.gmra.mrb[8].mxu0 %v8167_v9  ;;  %6684 = vmatprep.mubr.msk.bf16.mxu1 %vm7879_vm0, %v7878_v1 }
 0x122   : > { %6649 = vmatpush3.bf16.msra.mxu0 %v7581_v8  ;;  %6664 = vmatprep.mubr.msk.bf16.mxu0 %vm7879_vm0, %v7878_v1 }
 0x123   : > { %6650 = vmatprep.subr.bf16.mxu0 %v7878_v1  ;;  %6669 = vmatpush3.bf16.msra.mxu1 %v7589_v30 }
 0x124   : > { %6670 = vmatprep.subr.bf16.mxu1 %v7878_v1 }
 0x126   : > { %6651 = vmatpush3.bf16.msra.mxu0 %v7582_v11 }
 0x127   : > { %6652 = vmatprep.subr.bf16.mxu0 %v7878_v1  ;;  %6671 = vmatpush3.bf16.msra.mxu1 %v7590_v31 }
 0x128   : > { %6672 = vmatprep.subr.bf16.mxu1 %v7878_v1 }
 0x12a   : > { %6653 = vmatpush3.bf16.msra.mxu0 %v7583_v12 }
 0x12b   : > { %6654 = vmatprep.subr.bf16.mxu0 %v7878_v1  ;;  %6673 = vmatpush3.bf16.msra.mxu1 %v7591_v32 }
 0x12c   : > { %6674 = vmatprep.subr.bf16.mxu1 %v7878_v1 }
 0x12e   : > { %6655 = vmatpush3.bf16.msra.mxu0 %v7584_v13 }
 0x12f   : > { %6656 = vmatprep.subr.bf16.mxu0 %v7878_v1  ;;  %6675 = vmatpush3.bf16.msra.mxu1 %v7593_v33  ;;  %v7613_v33 = vld [vmem:[%s9630_s4 + $0x168] sm:$0xff]  }
 0x130   : > { %6676 = vmatprep.subr.bf16.mxu1 %v7878_v1 }
 0x132   : > { %6657 = vmatpush3.bf16.msra.mxu0 %v7585_v14 }
 0x133   : > { %6658 = vmatprep.subr.bf16.mxu0 %v7878_v1  ;;  %6677 = vmatpush3.bf16.msra.mxu1 %v7595_v36  ;;  %v7615_v36 = vld [vmem:[%s9630_s4 + $0x170] sm:$0xff]  }
 0x134   : > { %6678 = vmatprep.subr.bf16.mxu1 %v7878_v1 }
 0x136   : > { %6659 = vmatpush3.bf16.msra.mxu0 %v7586_v15 }
 0x137   : > { %6660 = vmatprep.subr.bf16.mxu0 %v7878_v1  ;;  %6679 = vmatpush3.bf16.msra.mxu1 %v7597_v38  ;;  %v7617_v38 = vld [vmem:[%s9630_s4 + $0x178] sm:$0xff]  }
 0x138   : > { %6680 = vmatprep.subr.bf16.mxu1 %v7878_v1 }
 0x13a   : > { %6661 = vmatpush3.bf16.msra.mxu0 %v7587_v16 }
 0x13b   : > { %6662 = vmatprep.subr.bf16.mxu0 %v7878_v1  ;;  %6681 = vmatpush3.bf16.msra.mxu1 %v7599_v41  ;;  %v7619_v41 = vld [vmem:[%s9630_s4 + $0x1c0] sm:$0xff]  }
 0x13c   : > { %6682 = vmatprep.subr.bf16.mxu1 %v7878_v1 }
 0x13e   : > { %6663 = vmatpush3.bf16.msra.mxu0 %v7588_v17  ;;  %v7603_v17 = vld [vmem:[%s9630_s4 + $0x140] sm:$0xff]  }
 0x13f   : > { %6768 = vmatprep.subr.bf16.mxu0 %v7878_v1  ;;  %6683 = vmatpush3.bf16.msra.mxu1 %v7601_v44  ;;  %v7636_v44 = vld [vmem:[%s9630_s4 + $0x330] sm:$0xff]  }
 0x140   : > { %6688 = vmatprep.subr.bf16.mxu1 %v7878_v1 }
 0x141   : > { %6665 = vmatmul.mubr.bf16.vlgmr.msra.gmra.mrb[12].mxu0 %v967_v20  ;;  %v7607_v20 = vld [vmem:[%s9630_s4 + $0x150] sm:$0xff]  }
 0x142   : > { %6769 = vmatpush3.bf16.msra.mxu0 %v7592_v19  ;;  %6784 = vmatprep.mubr.msk.bf16.mxu0 %vm7879_vm0, %v7878_v1  ;;  %v7605_v19 = vld [vmem:[%s9630_s4 + $0x148] sm:$0xff]  }
 0x143   : > { %6770 = vmatprep.subr.bf16.mxu0 %v7878_v1 }
 0x146   : > { %6771 = vmatpush3.bf16.msra.mxu0 %v7594_v21 }
 0x147   : > { %6772 = vmatprep.subr.bf16.mxu0 %v7878_v1 }
 0x14a   : > { %6773 = vmatpush3.bf16.msra.mxu0 %v7596_v22  ;;  %v7624_v22 = vld [vmem:[%s9630_s4 + $0x300] sm:$0xff]  }
 0x14b   : > { %6774 = vmatprep.subr.bf16.mxu0 %v7878_v1 }
 0x14e   : > { %6775 = vmatpush3.bf16.msra.mxu0 %v7598_v23 }
 0x14f   : > { %6776 = vmatprep.subr.bf16.mxu0 %v7878_v1 }
 0x152   : > { %6777 = vmatpush3.bf16.msra.mxu0 %v7600_v24  ;;  %v7609_v24 = vld [vmem:[%s9630_s4 + $0x158] sm:$0xff]  }
 0x153   : > { %6778 = vmatprep.subr.bf16.mxu0 %v7878_v1 }
 0x156   : > { %6779 = vmatpush3.bf16.msra.mxu0 %v7602_v25  ;;  %v7626_v25 = vld [vmem:[%s9630_s4 + $0x308] sm:$0xff]  }
 0x157   : > { %6780 = vmatprep.subr.bf16.mxu0 %v7878_v1 }
 0x15a   : > { %6781 = vmatpush3.bf16.msra.mxu0 %v7604_v26  ;;  %v7611_v26 = vld [vmem:[%s9630_s4 + $0x160] sm:$0xff]  }
 0x15b   : > { %6782 = vmatprep.subr.bf16.mxu0 %v7878_v1 }
 0x15e   : > { %6783 = vmatpush3.bf16.msra.mxu0 %v7606_v28  ;;  %v7628_v28 = vld [vmem:[%s9630_s4 + $0x310] sm:$0xff]  }
 0x15f   : > { %6788 = vmatprep.subr.bf16.mxu0 %v7878_v1 }
 0x161   : > { %6785 = vmatmul.mubr.bf16.vlgmr.msra.gmra.mrb[16].mxu0 %v8243_v29 }
 0x162   : > { %6804 = vmatprep.mubr.msk.bf16.mxu0 %vm7879_vm0, %v7878_v1  ;;  %6789 = vmatpush3.bf16.msra.mxu0 %v7608_v34  ;;  %v7630_v34 = vld [vmem:[%s9630_s4 + $0x318] sm:$0xff]  }
 0x163   : > { %6790 = vmatprep.subr.bf16.mxu0 %v7878_v1 }
 0x166   : > { %6791 = vmatpush3.bf16.msra.mxu0 %v7610_v35 }
 0x167   : > { %6792 = vmatprep.subr.bf16.mxu0 %v7878_v1 }
 0x16a   : > { %6793 = vmatpush3.bf16.msra.mxu0 %v7612_v37  ;;  %v7632_v37 = vld [vmem:[%s9630_s4 + $0x320] sm:$0xff]  }
 0x16b   : > { %6794 = vmatprep.subr.bf16.mxu0 %v7878_v1 }
 0x16e   : > { %6795 = vmatpush3.bf16.msra.mxu0 %v7614_v40  ;;  %v7634_v40 = vld [vmem:[%s9630_s4 + $0x328] sm:$0xff]  }
 0x16f   : > { %6796 = vmatprep.subr.bf16.mxu0 %v7878_v1 }
 0x172   : > { %6797 = vmatpush3.bf16.msra.mxu0 %v7616_v43 }
 0x173   : > { %6798 = vmatprep.subr.bf16.mxu0 %v7878_v1 }
 0x176   : > { %6799 = vmatpush3.bf16.msra.mxu0 %v7618_v45  ;;  %v7621_v45 = vld [vmem:[%s9630_s4 + $0x1c8] sm:$0xff]  }
 0x177   : > { %6800 = vmatprep.subr.bf16.mxu0 %v7878_v1 }
 0x17a   : > { %6801 = vmatpush3.bf16.msra.mxu0 %v7620_v46  ;;  %v7638_v46 = vld [vmem:[%s9630_s4 + $0x338] sm:$0xff]  }
 0x17b   : > { %6802 = vmatprep.subr.bf16.mxu0 %v7878_v1 }
 0x17e   : > { %6803 = vmatpush3.bf16.msra.mxu0 %v7622_v47 }
 0x17f   : > { %6808 = vmatprep.subr.bf16.mxu0 %v7878_v1 }
 0x1d3   : > { %v744_v49 = vpop.f32.mrb[4].mxu1 }
 0x1d4   : > { %v656_v48 = vpop.f32.mrb[4].mxu0  ;;  %v6606_v52 = vpop.f32.mrb[5].mxu1 }
 0x1d5   : > { %v745_v50 = vadd.f32 %v744_v49, %v656_v48  ;;  %v6586_v51 = vpop.f32.mrb[5].mxu0  ;;  %v747_v54 = vpop.f32.mrb[6].mxu1  ;;  %v7623_v48 = vld [vmem:[%s9630_s4 + $0x1d0] sm:$0xff]   ;;  %v7629_v52 = vld [vmem:[%s9630_s4 + $0x1e8] sm:$0xff]  }
 0x1d6   : > { %v659_v53 = vpop.f32.mrb[6].mxu0  ;;  %v6607_v56 = vpop.f32.mrb[7].mxu1  ;;  %v7627_v51 = vld [vmem:[%s9630_s4 + $0x1e0] sm:$0xff]   ;;  %v7633_v54 = vld [vmem:[%s9630_s4 + $0x1f8] sm:$0xff]  }
 0x1d7   : > { %v6587_v55 = vpop.f32.mrb[7].mxu0  ;;  %v7631_v53 = vld [vmem:[%s9630_s4 + $0x1f0] sm:$0xff]  }
 0x1d8   : > { %v7635_v55 = vld [vmem:[%s9630_s4 + $0x200] sm:$0xff]  }
 0x1f3   : > { %v959_v58 = vpop.f32.mrb[8].mxu1 }
 0x1f4   : > { %v851_v57 = vpop.f32.mrb[8].mxu0  ;;  %v6646_v61 = vpop.f32.mrb[9].mxu1 }
 0x1f5   : > { %v857_v59 = vadd.f32 %v851_v57, %v745_v50  ;;  %v6626_v60 = vpop.f32.mrb[9].mxu0  ;;  %v962_v63 = vpop.f32.mrb[10].mxu1  ;;  %v7625_v50 = vld [vmem:[%s9630_s4 + $0x1d8] sm:$0xff]   ;;  %v7637_v57 = vld [vmem:[%s9630_s4 + $0x208] sm:$0xff]  }
 0x1f6   : > { %v854_v62 = vpop.f32.mrb[10].mxu0  ;;  %v6647_v3 = vpop.f32.mrb[11].mxu1  ;;  %v7641_v60 = vld [vmem:[%s9630_s4 + $0x220] sm:$0xff]   ;;  %v7642_v61 = vld [vmem:[%s9630_s4 + $0x228] sm:$0xff]   ;;  %v7644_v63 = vld [vmem:[%s9630_s4 + $0x238] sm:$0xff]  }
 0x1f7   : > { %v965_v0 = vadd.f32 %v959_v58, %v857_v59  ;;  %v6627_v2 = vpop.f32.mrb[11].mxu0  ;;  %v7639_v58 = vld [vmem:[%s9630_s4 + $0x210] sm:$0xff]   ;;  %v7640_v59 = vld [vmem:[%s9630_s4 + $0x218] sm:$0xff]   ;;  %v7656_v3 = vld [vmem:[%s9630_s4 + $0x440] sm:$0xff]  }
 0x1f8   : > { %v7643_v62 = vld [vmem:[%s9630_s4 + $0x230] sm:$0xff]  }
 0x214   : > { %v1067_v4 = vpop.f32.mrb[12].mxu0 }
 0x215   : > { %v1073_v6 = vadd.f32 %v1067_v4, %v965_v0  ;;  %v6666_v7 = vpop.f32.mrb[13].mxu0  ;;  %v7645_v0 = vld [vmem:[%s9630_s4 + $0x240] sm:$0xff]   ;;  %v7646_v4 = vld [vmem:[%s9630_s4 + $0x248] sm:$0xff]  }
 0x216   : > { %v1070_v8 = vpop.f32.mrb[14].mxu0  ;;  %v7648_v7 = vld [vmem:[%s9630_s4 + $0x258] sm:$0xff]  }
 0x217   : > { %v1079_v10 = vadd.f32 %v5295_v5, %v1073_v6  ;;  %v6667_v11 = vpop.f32.mrb[15].mxu0  ;;  %v7658_v5 = vld [vmem:[%s9630_s4 + $0x448] sm:$0xff]   ;;  %v7647_v6 = vld [vmem:[%s9630_s4 + $0x250] sm:$0xff]   ;;  %v7649_v8 = vld [vmem:[%s9630_s4 + $0x260] sm:$0xff]  }
 0x218   : > { %v7651_v11 = vld [vmem:[%s9630_s4 + $0x270] sm:$0xff]  }
 0x219   : > { %v8316_v12 = vmax.f32 %v1079_v10, 0.0  ;;  %v7650_v10 = vld [vmem:[%s9630_s4 + $0x268] sm:$0xff]  }
 0x21b   : > { %1081 = vst [vmem:[#allocation2 + $0x2] sm:$0xff] %v8316_v12  ;;  %v1297_v56 = vpack.c.bf16 %v8316_v12, %v8316_v12  ;;  %v7652_v12 = vld [vmem:[%s9630_s4 + $0x278] sm:$0xff]  }
 0x222   : > { %v1082_v13 = vld [vmem:[#allocation2] sm:$0xff] }
 0x223   : > { %v8319_v14 = vld [vmem:[#allocation2 + $0x3] sm:$0xff]  ;;  %v1083_v43 = vpack.c.bf16 %v1082_v13, %v1082_v13  ;;  %v7660_v13 = vld [vmem:[%s9630_s4 + $0x450] sm:$0xff]  }
 0x224   : > { %v8321_v15 = vld [vmem:[#allocation2 + $0x4] sm:$0xff]  ;;  %v1405_v2 = vpack.c.bf16 %v8319_v14, %v8319_v14 }
 0x225   : > { %v1101_v16 = vld [vmem:[#allocation2 + $0x1] sm:$0xff] }
 0x226   : > { %v1102_v18 = vpack.c.bf16 %v1101_v16, %v1101_v16  ;;  %1627 = vst [vmem:[#allocation2 + $0x2] sm:$0xff] %v8235_v27  ;;  %v7653_v14 = vld [vmem:[%s9630_s4 + $0x380] sm:$0xff]   ;;  %v1513_v16 = vpack.c.bf16 %v8321_v15, %v8321_v15 }
 0x227   : > { %v7664_v15 = vld [vmem:[%s9630_s4 + $0x460] sm:$0xff]  }
 0x228   : > { %6685 = vmatmul.mubr.bf16.vlgmr.msra.gmra.mrb[12].mxu1 %v1102_v18  ;;  %v7654_v18 = vld [vmem:[%s9630_s4 + $0x388] sm:$0xff]  }
 0x229   : > { %6689 = vmatpush3.bf16.msra.mxu1 %v7603_v17  ;;  %6704 = vmatprep.mubr.msk.bf16.mxu1 %vm7879_vm0, %v7878_v1  ;;  %v7662_v17 = vld [vmem:[%s9630_s4 + $0x458] sm:$0xff]  }
 0x22a   : > { %6690 = vmatprep.subr.bf16.mxu1 %v7878_v1 }
 0x22d   : > { %6691 = vmatpush3.bf16.msra.mxu1 %v7605_v19  ;;  %v1628_v21 = vld [vmem:[#allocation2 + $0x1] sm:$0xff]  ;;  %v7655_v19 = vld [vmem:[%s9630_s4 + $0x390] sm:$0xff]  }
 0x22e   : > { %6692 = vmatprep.subr.bf16.mxu1 %v7878_v1  ;;  %v1629_v23 = vpack.c.bf16 %v1628_v21, %v1628_v21  ;;  %v1842_v47 = vld [vmem:[#allocation2 + $0x3] sm:$0xff]  ;;  %v7657_v21 = vld [vmem:[%s9630_s4 + $0x398] sm:$0xff]  }
 0x22f   : > { %v1843_v49 = vpack.c.bf16 %v1842_v47, %v1842_v47  ;;  %v7669_v47 = vld [vmem:[%s9630_s4 + $0x348] sm:$0xff]  }
 0x230   : > { %6805 = vmatmul.mubr.bf16.vlgmr.msra.gmra.mrb[20].mxu0 %v1629_v23  ;;  %v7659_v23 = vld [vmem:[%s9630_s4 + $0x3a0] sm:$0xff]  }
 0x231   : > { %6693 = vmatpush3.bf16.msra.mxu1 %v7607_v20  ;;  %6809 = vmatpush3.bf16.msra.mxu0 %v7624_v22  ;;  %v7666_v20 = vld [vmem:[%s9630_s4 + $0x468] sm:$0xff]   ;;  %v7668_v22 = vld [vmem:[%s9630_s4 + $0x470] sm:$0xff]  }
 0x232   : > { %6694 = vmatprep.subr.bf16.mxu1 %v7878_v1  ;;  %6810 = vmatprep.subr.bf16.mxu0 %v7878_v1 }
 0x233   : > { %6824 = vmatprep.mubr.msk.bf16.mxu0 %vm7879_vm0, %v7878_v1 }
 0x234   : > { %v8358_v30 = vpop.f32.mrb[16].mxu0 }
 0x235   : > { %6695 = vmatpush3.bf16.msra.mxu1 %v7609_v24  ;;  %6811 = vmatpush3.bf16.msra.mxu0 %v7626_v25  ;;  %v6786_v31 = vpop.f32.mrb[17].mxu0  ;;  %v7670_v24 = vld [vmem:[%s9630_s4 + $0x478] sm:$0xff]   ;;  %v7661_v25 = vld [vmem:[%s9630_s4 + $0x3a8] sm:$0xff]  }
 0x236   : > { %6696 = vmatprep.subr.bf16.mxu1 %v7878_v1  ;;  %6812 = vmatprep.subr.bf16.mxu0 %v7878_v1  ;;  %v1751_v32 = vpop.f32.mrb[18].mxu0 }
 0x237   : > { %v6787_v35 = vpop.f32.mrb[19].mxu0 }
 0x239   : > { %6697 = vmatpush3.bf16.msra.mxu1 %v7611_v26  ;;  %6813 = vmatpush3.bf16.msra.mxu0 %v7628_v28  ;;  %v7663_v26 = vld [vmem:[%s9630_s4 + $0x3b0] sm:$0xff]   ;;  %v7665_v28 = vld [vmem:[%s9630_s4 + $0x3b8] sm:$0xff]  }
 0x23a   : > { %6698 = vmatprep.subr.bf16.mxu1 %v7878_v1  ;;  %6814 = vmatprep.subr.bf16.mxu0 %v7878_v1 }
 0x23d   : > { %6699 = vmatpush3.bf16.msra.mxu1 %v7613_v33  ;;  %6815 = vmatpush3.bf16.msra.mxu0 %v7630_v34 }
 0x23e   : > { %6700 = vmatprep.subr.bf16.mxu1 %v7878_v1  ;;  %6816 = vmatprep.subr.bf16.mxu0 %v7878_v1 }
 0x241   : > { %6701 = vmatpush3.bf16.msra.mxu1 %v7615_v36  ;;  %6817 = vmatpush3.bf16.msra.mxu0 %v7632_v37  ;;  %v5489_v37 = vld [vmem:[%s9632_s6 + $0x4] ss:$0 sm:$0xff] }
 0x242   : > { %6702 = vmatprep.subr.bf16.mxu1 %v7878_v1  ;;  %6818 = vmatprep.subr.bf16.mxu0 %v7878_v1 }
 0x245   : > { %6703 = vmatpush3.bf16.msra.mxu1 %v7617_v38  ;;  %6819 = vmatpush3.bf16.msra.mxu0 %v7634_v40 }
 0x246   : > { %6708 = vmatprep.subr.bf16.mxu1 %v7878_v1  ;;  %6820 = vmatprep.subr.bf16.mxu0 %v7878_v1 }
 0x248   : > { %6705 = vmatmul.mubr.bf16.vlgmr.msra.gmra.mrb[12].mxu1 %v1083_v43 }
 0x249   : > { %6709 = vmatpush3.bf16.msra.mxu1 %v7619_v41  ;;  %6724 = vmatprep.mubr.msk.bf16.mxu1 %vm7879_vm0, %v7878_v1 }
 0x24a   : > { %6710 = vmatprep.subr.bf16.mxu1 %v7878_v1  ;;  %6821 = vmatpush3.bf16.msra.mxu0 %v7636_v44 }
 0x24b   : > { %6822 = vmatprep.subr.bf16.mxu0 %v7878_v1 }
 0x24d   : > { %6711 = vmatpush3.bf16.msra.mxu1 %v7621_v45 }
 0x24e   : > { %6712 = vmatprep.subr.bf16.mxu1 %v7878_v1  ;;  %6823 = vmatpush3.bf16.msra.mxu0 %v7638_v46  ;;  %v7667_v46 = vld [vmem:[%s9630_s4 + $0x340] sm:$0xff]  }
 0x24f   : > { %6888 = vmatprep.subr.bf16.mxu0 %v7878_v1 }
 0x251   : > { %6713 = vmatpush3.bf16.msra.mxu1 %v7623_v48  ;;  %6825 = vmatmul.mubr.bf16.vlgmr.msra.gmra.mrb[24].mxu0 %v1843_v49 }
 0x252   : > { %6714 = vmatprep.subr.bf16.mxu1 %v7878_v1  ;;  %6904 = vmatprep.mubr.msk.bf16.mxu0 %vm7879_vm0, %v7878_v1 }
 0x253   : > { %6889 = vmatpush3.bf16.msra.mxu0 %v7656_v3  ;;  %v7685_v3 = vld [vmem:[%s9630_s4 + $0x3c8] sm:$0xff]  }
 0x254   : > { %6890 = vmatprep.subr.bf16.mxu0 %v7878_v1 }
 0x255   : > { %6715 = vmatpush3.bf16.msra.mxu1 %v7625_v50  ;;  %v7671_v50 = vld [vmem:[%s9630_s4 + $0x350] sm:$0xff]  }
 0x256   : > { %6716 = vmatprep.subr.bf16.mxu1 %v7878_v1 }
 0x257   : > { %6891 = vmatpush3.bf16.msra.mxu0 %v7658_v5  ;;  %v7687_v5 = vld [vmem:[%s9630_s4 + $0x3d0] sm:$0xff]  }
 0x258   : > { %6892 = vmatprep.subr.bf16.mxu0 %v7878_v1 }
 0x259   : > { %6717 = vmatpush3.bf16.msra.mxu1 %v7627_v51  ;;  %v7673_v51 = vld [vmem:[%s9630_s4 + $0x358] sm:$0xff]  }
 0x25a   : > { %6718 = vmatprep.subr.bf16.mxu1 %v7878_v1 }
 0x25b   : > { %6893 = vmatpush3.bf16.msra.mxu0 %v7660_v13  ;;  %v7690_v13 = vld [vmem:[%s9630_s4 + $0x488] sm:$0xff]  }
 0x25c   : > { %6894 = vmatprep.subr.bf16.mxu0 %v7878_v1 }
 0x25d   : > { %6719 = vmatpush3.bf16.msra.mxu1 %v7629_v52 }
 0x25e   : > { %6720 = vmatprep.subr.bf16.mxu1 %v7878_v1 }
 0x25f   : > { %6895 = vmatpush3.bf16.msra.mxu0 %v7662_v17  ;;  %v7695_v17 = vld [vmem:[%s9630_s4 + $0x3f0] sm:$0xff]  }
 0x260   : > { %6896 = vmatprep.subr.bf16.mxu0 %v7878_v1 }
 0x261   : > { %6721 = vmatpush3.bf16.msra.mxu1 %v7631_v53  ;;  %v7672_v53 = vld [vmem:[%s9630_s4 + $0x400] sm:$0xff]  }
 0x262   : > { %6722 = vmatprep.subr.bf16.mxu1 %v7878_v1 }
 0x263   : > { %6897 = vmatpush3.bf16.msra.mxu0 %v7664_v15  ;;  %v7697_v15 = vld [vmem:[%s9630_s4 + $0x3f8] sm:$0xff]  }
 0x264   : > { %6898 = vmatprep.subr.bf16.mxu0 %v7878_v1 }
 0x265   : > { %6723 = vmatpush3.bf16.msra.mxu1 %v7633_v54  ;;  %v7675_v54 = vld [vmem:[%s9630_s4 + $0x360] sm:$0xff]  }
 0x266   : > { %6728 = vmatprep.subr.bf16.mxu1 %v7878_v1 }
 0x267   : > { %6899 = vmatpush3.bf16.msra.mxu0 %v7666_v20 }
 0x268   : > { %6725 = vmatmul.mubr.bf16.vlgmr.msra.gmra.mrb[12].mxu1 %v1297_v56  ;;  %6900 = vmatprep.subr.bf16.mxu0 %v7878_v1  ;;  %v7674_v56 = vld [vmem:[%s9630_s4 + $0x408] sm:$0xff]  }
 0x269   : > { %6729 = vmatpush3.bf16.msra.mxu1 %v7635_v55  ;;  %6744 = vmatprep.mubr.msk.bf16.mxu1 %vm7879_vm0, %v7878_v1 }
 0x26a   : > { %6730 = vmatprep.subr.bf16.mxu1 %v7878_v1 }
 0x26b   : > { %6901 = vmatpush3.bf16.msra.mxu0 %v7668_v22  ;;  %v7699_v22 = vld [vmem:[%s9630_s4 + $0x4b0] sm:$0xff]  }
 0x26c   : > { %6902 = vmatprep.subr.bf16.mxu0 %v7878_v1 }
 0x26d   : > { %6731 = vmatpush3.bf16.msra.mxu1 %v7637_v57  ;;  %v7677_v57 = vld [vmem:[%s9630_s4 + $0x368] sm:$0xff]  }
 0x26e   : > { %6732 = vmatprep.subr.bf16.mxu1 %v7878_v1 }
 0x26f   : > { %6903 = vmatpush3.bf16.msra.mxu0 %v7670_v24  ;;  %v7701_v24 = vld [vmem:[%s9630_s4 + $0x4c0] sm:$0xff]  }
 0x270   : > { %6908 = vmatprep.subr.bf16.mxu0 %v7878_v1 }
 0x271   : > { %6733 = vmatpush3.bf16.msra.mxu1 %v7639_v58  ;;  %v7676_v58 = vld [vmem:[%s9630_s4 + $0x410] sm:$0xff]  }
 0x272   : > { %6734 = vmatprep.subr.bf16.mxu1 %v7878_v1 }
 0x275   : > { %6735 = vmatpush3.bf16.msra.mxu1 %v7640_v59  ;;  %v7679_v59 = vld [vmem:[%s9630_s4 + $0x370] sm:$0xff]  }
 0x276   : > { %6736 = vmatprep.subr.bf16.mxu1 %v7878_v1 }
 0x279   : > { %6737 = vmatpush3.bf16.msra.mxu1 %v7641_v60  ;;  %v7678_v60 = vld [vmem:[%s9630_s4 + $0x418] sm:$0xff]  }
 0x27a   : > { %6738 = vmatprep.subr.bf16.mxu1 %v7878_v1 }
 0x27d   : > { %6739 = vmatpush3.bf16.msra.mxu1 %v7642_v61  ;;  %v7681_v61 = vld [vmem:[%s9630_s4 + $0x378] sm:$0xff]  }
 0x27e   : > { %6740 = vmatprep.subr.bf16.mxu1 %v7878_v1 }
 0x281   : > { %6741 = vmatpush3.bf16.msra.mxu1 %v7643_v62  ;;  %v7680_v62 = vld [vmem:[%s9630_s4 + $0x420] sm:$0xff]  }
 0x282   : > { %6742 = vmatprep.subr.bf16.mxu1 %v7878_v1 }
 0x285   : > { %6743 = vmatpush3.bf16.msra.mxu1 %v7644_v63  ;;  %v7683_v63 = vld [vmem:[%s9630_s4 + $0x3c0] sm:$0xff]  }
 0x286   : > { %6748 = vmatprep.subr.bf16.mxu1 %v7878_v1 }
 0x288   : > { %6745 = vmatmul.mubr.bf16.vlgmr.msra.gmra.mrb[12].mxu1 %v1405_v2  ;;  %v7682_v2 = vld [vmem:[%s9630_s4 + $0x428] sm:$0xff]  }
 0x289   : > { %6749 = vmatpush3.bf16.msra.mxu1 %v7645_v0  ;;  %6764 = vmatprep.mubr.msk.bf16.mxu1 %vm7879_vm0, %v7878_v1 }
 0x28a   : > { %6750 = vmatprep.subr.bf16.mxu1 %v7878_v1 }
 0x28d   : > { %6751 = vmatpush3.bf16.msra.mxu1 %v7646_v4  ;;  %v7684_v4 = vld [vmem:[%s9630_s4 + $0x430] sm:$0xff]  }
 0x28e   : > { %6752 = vmatprep.subr.bf16.mxu1 %v7878_v1 }
 0x291   : > { %6753 = vmatpush3.bf16.msra.mxu1 %v7647_v6  ;;  %v7686_v6 = vld [vmem:[%s9630_s4 + $0x438] sm:$0xff]  }
 0x292   : > { %6754 = vmatprep.subr.bf16.mxu1 %v7878_v1 }
 0x295   : > { %6755 = vmatpush3.bf16.msra.mxu1 %v7648_v7  ;;  %v7689_v7 = vld [vmem:[%s9630_s4 + $0x3d8] sm:$0xff]  }
 0x296   : > { %6756 = vmatprep.subr.bf16.mxu1 %v7878_v1 }
 0x299   : > { %6757 = vmatpush3.bf16.msra.mxu1 %v7649_v8 }
 0x29a   : > { %6758 = vmatprep.subr.bf16.mxu1 %v7878_v1 }
 0x29d   : > { %6759 = vmatpush3.bf16.msra.mxu1 %v7650_v10  ;;  %v7688_v10 = vld [vmem:[%s9630_s4 + $0x480] sm:$0xff]  }
 0x29e   : > { %6760 = vmatprep.subr.bf16.mxu1 %v7878_v1 }
 0x2a1   : > { %6761 = vmatpush3.bf16.msra.mxu1 %v7651_v11  ;;  %v7691_v11 = vld [vmem:[%s9630_s4 + $0x3e0] sm:$0xff]  }
 0x2a2   : > { %6762 = vmatprep.subr.bf16.mxu1 %v7878_v1 }
 0x2a5   : > { %6763 = vmatpush3.bf16.msra.mxu1 %v7652_v12 }
 0x2a6   : > { %6828 = vmatprep.subr.bf16.mxu1 %v7878_v1 }
 0x2a8   : > { %6765 = vmatmul.mubr.bf16.vlgmr.msra.gmra.mrb[12].mxu1 %v1513_v16  ;;  %v7692_v16 = vld [vmem:[%s9630_s4 + $0x490] sm:$0xff]  }
 0x2a9   : > { %6829 = vmatpush3.bf16.msra.mxu1 %v7653_v14  ;;  %6844 = vmatprep.mubr.msk.bf16.mxu1 %vm7879_vm0, %v7878_v1  ;;  %v7693_v14 = vld [vmem:[%s9630_s4 + $0x3e8] sm:$0xff]  }
 0x2aa   : > { %6830 = vmatprep.subr.bf16.mxu1 %v7878_v1 }
 0x2ad   : > { %6831 = vmatpush3.bf16.msra.mxu1 %v7654_v18  ;;  %v7694_v18 = vld [vmem:[%s9630_s4 + $0x498] sm:$0xff]  }
 0x2ae   : > { %6832 = vmatprep.subr.bf16.mxu1 %v7878_v1 }
 0x2b1   : > { %6833 = vmatpush3.bf16.msra.mxu1 %v7655_v19  ;;  %v7696_v19 = vld [vmem:[%s9630_s4 + $0x4a0] sm:$0xff]  }
 0x2b2   : > { %6834 = vmatprep.subr.bf16.mxu1 %v7878_v1 }
 0x2b5   : > { %6835 = vmatpush3.bf16.msra.mxu1 %v7657_v21  ;;  %v7698_v21 = vld [vmem:[%s9630_s4 + $0x4a8] sm:$0xff]  }
 0x2b6   : > { %6836 = vmatprep.subr.bf16.mxu1 %v7878_v1 }
 0x2b9   : > { %6837 = vmatpush3.bf16.msra.mxu1 %v7659_v23  ;;  %v7700_v23 = vld [vmem:[%s9630_s4 + $0x4b8] sm:$0xff]  }
 0x2ba   : > { %6838 = vmatprep.subr.bf16.mxu1 %v7878_v1 }
 0x2bd   : > { %6839 = vmatpush3.bf16.msra.mxu1 %v7661_v25  ;;  %v7702_v25 = vld [vmem:[%s9630_s4 + $0x4c8] sm:$0xff]  }
 0x2be   : > { %6840 = vmatprep.subr.bf16.mxu1 %v7878_v1 }
 0x2c1   : > { %6841 = vmatpush3.bf16.msra.mxu1 %v7663_v26  ;;  %v7703_v26 = vld [vmem:[%s9630_s4 + $0x4d0] sm:$0xff]  }
 0x2c2   : > { %6842 = vmatprep.subr.bf16.mxu1 %v7878_v1 }
 0x2c5   : > { %6843 = vmatpush3.bf16.msra.mxu1 %v7665_v28  ;;  %v7704_v28 = vld [vmem:[%s9630_s4 + $0x4d8] sm:$0xff]  }
 0x2c6   : > { %6848 = vmatprep.subr.bf16.mxu1 %v7878_v1 }
 0x303   : > { %v1836_v31 = vpop.f32.mrb[20].mxu0 }
 0x304   : > { %v1837_v32 = vadd.f32 %v1836_v31, %v8358_v30  ;;  %v6806_v33 = vpop.f32.mrb[21].mxu0  ;;  %v7705_v31 = vld [vmem:[%s9630_s4 + $0x4e0] sm:$0xff]  }
 0x305   : > { %v1839_v34 = vpop.f32.mrb[22].mxu0  ;;  %v7707_v33 = vld [vmem:[%s9630_s4 + $0x4f0] sm:$0xff]  }
 0x306   : > { %v6807_v35 = vpop.f32.mrb[23].mxu0  ;;  %v7708_v34 = vld [vmem:[%s9630_s4 + $0x4f8] sm:$0xff]  }
 0x324   : > { %v1943_v36 = vpop.f32.mrb[24].mxu0 }
 0x325   : > { %v1949_v38 = vadd.f32 %v1943_v36, %v1837_v32  ;;  %v6826_v40 = vpop.f32.mrb[25].mxu0  ;;  %v7706_v32 = vld [vmem:[%s9630_s4 + $0x4e8] sm:$0xff]   ;;  %v7709_v36 = vld [vmem:[%s9630_s4 + $0x500] sm:$0xff]  }
 0x326   : > { %v1946_v41 = vpop.f32.mrb[26].mxu0  ;;  %v7711_v40 = vld [vmem:[%s9630_s4 + $0x510] sm:$0xff]  }
 0x327   : > { %v1955_v43 = vadd.f32 %v5489_v37, %v1949_v38  ;;  %v6827_v44 = vpop.f32.mrb[27].mxu0  ;;  %v7710_v38 = vld [vmem:[%s9630_s4 + $0x508] sm:$0xff]   ;;  %v7712_v41 = vld [vmem:[%s9630_s4 + $0x518] sm:$0xff]  }
 0x328   : > { %v7714_v44 = vld [vmem:[%s9630_s4 + $0x528] sm:$0xff]  }
 0x329   : > { %v1956_v45 = vmax.f32 %v1955_v43, 0.0  ;;  %v7713_v43 = vld [vmem:[%s9630_s4 + $0x520] sm:$0xff]  }
 0x32b   : > { %1957 = vst [vmem:[#allocation2 + $0x2] sm:$0xff] %v1956_v45  ;;  %v1978_v30 = vpack.c.bf16 %v1956_v45, %v1956_v45  ;;  %v7715_v45 = vld [vmem:[%s9630_s4 + $0x530] sm:$0xff]  }
 0x32d   : > { %6845 = vmatmul.mubr.bf16.vlgmr.msra.gmra.mrb[12].mxu1 %v1978_v30 }
 0x32e   : > { %6849 = vmatpush3.bf16.msra.mxu1 %v7667_v46  ;;  %6864 = vmatprep.mubr.msk.bf16.mxu1 %vm7879_vm0, %v7878_v1  ;;  %v7716_v46 = vld [vmem:[%s9630_s4 + $0x538] sm:$0xff]  }
 0x32f   : > { %6850 = vmatprep.subr.bf16.mxu1 %v7878_v1 }
 0x332   : > { %v1958_v48 = vld [vmem:[#allocation2 + $0x1] sm:$0xff]  ;;  %6851 = vmatpush3.bf16.msra.mxu1 %v7669_v47 }
 0x333   : > { %v8583_v49 = vld [vmem:[#allocation2 + $0x3] sm:$0xff]  ;;  %6852 = vmatprep.subr.bf16.mxu1 %v7878_v1  ;;  %v1959_v0 = vpack.c.bf16 %v1958_v48, %v1958_v48 }
 0x334   : > { %2287 = vst [vmem:[#allocation2 + $0x2] sm:$0xff] %v8235_v27  ;;  %v2173_v20 = vpack.c.bf16 %v8583_v49, %v8583_v49  ;;  %v7720_v47 = vld [vmem:[%s9630_s4 + $0x6c0] sm:$0xff]   ;;  %v7722_v49 = vld [vmem:[%s9630_s4 + $0x6c8] sm:$0xff]  }
 0x336   : > { %6853 = vmatpush3.bf16.msra.mxu1 %v7671_v50  ;;  %v7724_v50 = vld [vmem:[%s9630_s4 + $0x6d0] sm:$0xff]  }
 0x337   : > { %6854 = vmatprep.subr.bf16.mxu1 %v7878_v1 }
 0x33a   : > { %6855 = vmatpush3.bf16.msra.mxu1 %v7673_v51  ;;  %v7726_v51 = vld [vmem:[%s9630_s4 + $0x6d8] sm:$0xff]  }
 0x33b   : > { %v2307_v52 = vld [vmem:[#allocation2 + $0x1] sm:$0xff]  ;;  %6856 = vmatprep.subr.bf16.mxu1 %v7878_v1 }
 0x33c   : > { %v2308_v55 = vpack.c.bf16 %v2307_v52, %v2307_v52  ;;  %v2288_v8 = vld [vmem:[#allocation2] sm:$0xff] }
 0x33d   : > { %v2289_v12 = vpack.c.bf16 %v2288_v8, %v2288_v8  ;;  %v2610_v35 = vld [vmem:[#allocation2 + $0x3] sm:$0xff]  ;;  %v7729_v8 = vld [vmem:[%s9630_s4 + $0x5b8] sm:$0xff]  }
 0x33e   : > { %6905 = vmatmul.mubr.bf16.vlgmr.msra.gmra.mrb[28].mxu0 %v2308_v55  ;;  %6857 = vmatpush3.bf16.msra.mxu1 %v7675_v54  ;;  %v2611_v37 = vpack.c.bf16 %v2610_v35, %v2610_v35  ;;  %v2718_v30 = vld [vmem:[#allocation2 + $0x4] sm:$0xff]  ;;  %v7732_v54 = vld [vmem:[%s9630_s4 + $0x6f0] sm:$0xff]   ;;  %v7734_v55 = vld [vmem:[%s9630_s4 + $0x6f8] sm:$0xff]  }
 0x33f   : > { %6909 = vmatpush3.bf16.msra.mxu0 %v7672_v53  ;;  %6858 = vmatprep.subr.bf16.mxu1 %v7878_v1  ;;  %v2719_v48 = vpack.c.bf16 %v2718_v30, %v2718_v30  ;;  %v7728_v52 = vld [vmem:[%s9630_s4 + $0x6e0] sm:$0xff]   ;;  %v7730_v53 = vld [vmem:[%s9630_s4 + $0x6e8] sm:$0xff]  }
 0x340   : > { %6910 = vmatprep.subr.bf16.mxu0 %v7878_v1  ;;  %6924 = vmatprep.mubr.msk.bf16.mxu0 %vm7879_vm0, %v7878_v1 }
 0x342   : > { %6859 = vmatpush3.bf16.msra.mxu1 %v7677_v57  ;;  %v7718_v57 = vld [vmem:[%s9630_s4 + $0x588] sm:$0xff]  }
 0x343   : > { %6911 = vmatpush3.bf16.msra.mxu0 %v7674_v56  ;;  %6860 = vmatprep.subr.bf16.mxu1 %v7878_v1  ;;  %v7717_v56 = vld [vmem:[%s9630_s4 + $0x580] sm:$0xff]  }
 0x344   : > { %6912 = vmatprep.subr.bf16.mxu0 %v7878_v1 }
 0x346   : > { %6861 = vmatpush3.bf16.msra.mxu1 %v7679_v59  ;;  %v7736_v59 = vld [vmem:[%s9630_s4 + $0x680] sm:$0xff]  }
 0x347   : > { %6913 = vmatpush3.bf16.msra.mxu0 %v7676_v58  ;;  %6862 = vmatprep.subr.bf16.mxu1 %v7878_v1  ;;  %v7719_v58 = vld [vmem:[%s9630_s4 + $0x590] sm:$0xff]  }
 0x348   : > { %6914 = vmatprep.subr.bf16.mxu0 %v7878_v1 }
 0x34a   : > { %6863 = vmatpush3.bf16.msra.mxu1 %v7681_v61  ;;  %v7723_v61 = vld [vmem:[%s9630_s4 + $0x5a0] sm:$0xff]  }
 0x34b   : > { %6915 = vmatpush3.bf16.msra.mxu0 %v7678_v60  ;;  %6868 = vmatprep.subr.bf16.mxu1 %v7878_v1  ;;  %v7738_v60 = vld [vmem:[%s9630_s4 + $0x688] sm:$0xff]  }
 0x34c   : > { %6916 = vmatprep.subr.bf16.mxu0 %v7878_v1 }
 0x34d   : > { %6865 = vmatmul.mubr.bf16.vlgmr.msra.gmra.mrb[12].mxu1 %v1959_v0 }
 0x34e   : > { %6869 = vmatpush3.bf16.msra.mxu1 %v7683_v63  ;;  %6884 = vmatprep.mubr.msk.bf16.mxu1 %vm7879_vm0, %v7878_v1  ;;  %v7740_v63 = vld [vmem:[%s9630_s4 + $0x690] sm:$0xff]  }
 0x34f   : > { %6917 = vmatpush3.bf16.msra.mxu0 %v7680_v62  ;;  %6870 = vmatprep.subr.bf16.mxu1 %v7878_v1 }
 0x350   : > { %6918 = vmatprep.subr.bf16.mxu0 %v7878_v1 }
 0x352   : > { %6871 = vmatpush3.bf16.msra.mxu1 %v7685_v3 }
 0x353   : > { %6919 = vmatpush3.bf16.msra.mxu0 %v7682_v2  ;;  %6872 = vmatprep.subr.bf16.mxu1 %v7878_v1 }
 0x354   : > { %6920 = vmatprep.subr.bf16.mxu0 %v7878_v1 }
 0x356   : > { %6873 = vmatpush3.bf16.msra.mxu1 %v7687_v5  ;;  %v7742_v5 = vld [vmem:[%s9630_s4 + $0x698] sm:$0xff]  }
 0x357   : > { %6921 = vmatpush3.bf16.msra.mxu0 %v7684_v4  ;;  %6874 = vmatprep.subr.bf16.mxu1 %v7878_v1  ;;  %v7725_v4 = vld [vmem:[%s9630_s4 + $0x5a8] sm:$0xff]  }
 0x358   : > { %6922 = vmatprep.subr.bf16.mxu0 %v7878_v1 }
 0x35a   : > { %6875 = vmatpush3.bf16.msra.mxu1 %v7689_v7  ;;  %v7744_v7 = vld [vmem:[%s9630_s4 + $0x6a0] sm:$0xff]  }
 0x35b   : > { %6923 = vmatpush3.bf16.msra.mxu0 %v7686_v6  ;;  %6876 = vmatprep.subr.bf16.mxu1 %v7878_v1  ;;  %v7727_v6 = vld [vmem:[%s9630_s4 + $0x5b0] sm:$0xff]  }
 0x35c   : > { %6928 = vmatprep.subr.bf16.mxu0 %v7878_v1 }
 0x35e   : > { %6925 = vmatmul.mubr.bf16.vlgmr.msra.gmra.mrb[32].mxu0 %v2289_v12  ;;  %6877 = vmatpush3.bf16.msra.mxu1 %v7691_v11  ;;  %v7748_v11 = vld [vmem:[%s9630_s4 + $0x6b0] sm:$0xff]   ;;  %v7750_v12 = vld [vmem:[%s9630_s4 + $0x6b8] sm:$0xff]  }
 0x35f   : > { %6929 = vmatpush3.bf16.msra.mxu0 %v7688_v10  ;;  %6878 = vmatprep.subr.bf16.mxu1 %v7878_v1  ;;  %v7746_v10 = vld [vmem:[%s9630_s4 + $0x6a8] sm:$0xff]  }
 0x360   : > { %6930 = vmatprep.subr.bf16.mxu0 %v7878_v1  ;;  %6944 = vmatprep.mubr.msk.bf16.mxu0 %vm7879_vm0, %v7878_v1 }
 0x362   : > { %6879 = vmatpush3.bf16.msra.mxu1 %v7693_v14 }
 0x363   : > { %6931 = vmatpush3.bf16.msra.mxu0 %v7690_v13  ;;  %6880 = vmatprep.subr.bf16.mxu1 %v7878_v1 }
 0x364   : > { %6932 = vmatprep.subr.bf16.mxu0 %v7878_v1 }
 0x366   : > { %6881 = vmatpush3.bf16.msra.mxu1 %v7695_v17 }
 0x367   : > { %6933 = vmatpush3.bf16.msra.mxu0 %v7692_v16  ;;  %6882 = vmatprep.subr.bf16.mxu1 %v7878_v1 }
 0x368   : > { %6934 = vmatprep.subr.bf16.mxu0 %v7878_v1 }
 0x36a   : > { %6883 = vmatpush3.bf16.msra.mxu1 %v7697_v15  ;;  %v5416_v15 = vld [vmem:[%s9632_s6 + $0x3] ss:$0 sm:$0xff] }
 0x36b   : > { %6935 = vmatpush3.bf16.msra.mxu0 %v7694_v18  ;;  %6988 = vmatprep.subr.bf16.mxu1 %v7878_v1 }
 0x36c   : > { %6936 = vmatprep.subr.bf16.mxu0 %v7878_v1 }
 0x36d   : > { %6885 = vmatmul.mubr.bf16.vlgmr.msra.gmra.mrb[12].mxu1 %v2173_v20  ;;  %v5562_v20 = vld [vmem:[%s9632_s6 + $0x5] ss:$0 sm:$0xff] }
 0x36e   : > { %7004 = vmatprep.mubr.msk.bf16.mxu1 %vm7879_vm0, %v7878_v1  ;;  %6989 = vmatpush3.bf16.msra.mxu1 %v7717_v56 }
 0x36f   : > { %6937 = vmatpush3.bf16.msra.mxu0 %v7696_v19  ;;  %6990 = vmatprep.subr.bf16.mxu1 %v7878_v1 }
 0x370   : > { %6938 = vmatprep.subr.bf16.mxu0 %v7878_v1 }
 0x372   : > { %6991 = vmatpush3.bf16.msra.mxu1 %v7718_v57 }
 0x373   : > { %6939 = vmatpush3.bf16.msra.mxu0 %v7698_v21  ;;  %6992 = vmatprep.subr.bf16.mxu1 %v7878_v1 }
 0x374   : > { %6940 = vmatprep.subr.bf16.mxu0 %v7878_v1 }
 0x376   : > { %6993 = vmatpush3.bf16.msra.mxu1 %v7719_v58  ;;  %v7737_v58 = vld [vmem:[%s9630_s4 + $0x558] sm:$0xff]  }
 0x377   : > { %6941 = vmatpush3.bf16.msra.mxu0 %v7699_v22  ;;  %6994 = vmatprep.subr.bf16.mxu1 %v7878_v1 }
 0x378   : > { %6942 = vmatprep.subr.bf16.mxu0 %v7878_v1 }
 0x37b   : > { %6943 = vmatpush3.bf16.msra.mxu0 %v7700_v23 }
 0x37c   : > { %6948 = vmatprep.subr.bf16.mxu0 %v7878_v1 }
 0x37e   : > { %6945 = vmatmul.mubr.bf16.vlgmr.msra.gmra.mrb[36].mxu0 %v8243_v29 }
 0x37f   : > { %6949 = vmatpush3.bf16.msra.mxu0 %v7701_v24  ;;  %6964 = vmatprep.mubr.msk.bf16.mxu0 %vm7879_vm0, %v7878_v1 }
 0x380   : > { %6950 = vmatprep.subr.bf16.mxu0 %v7878_v1 }
 0x383   : > { %6951 = vmatpush3.bf16.msra.mxu0 %v7702_v25 }
 0x384   : > { %6952 = vmatprep.subr.bf16.mxu0 %v7878_v1 }
 0x387   : > { %6953 = vmatpush3.bf16.msra.mxu0 %v7703_v26 }
 0x388   : > { %6954 = vmatprep.subr.bf16.mxu0 %v7878_v1 }
 0x38b   : > { %6955 = vmatpush3.bf16.msra.mxu0 %v7704_v28 }
 0x38c   : > { %6956 = vmatprep.subr.bf16.mxu0 %v7878_v1 }
 0x38f   : > { %6957 = vmatpush3.bf16.msra.mxu0 %v7705_v31 }
 0x390   : > { %6958 = vmatprep.subr.bf16.mxu0 %v7878_v1 }
 0x393   : > { %6959 = vmatpush3.bf16.msra.mxu0 %v7706_v32 }
 0x394   : > { %6960 = vmatprep.subr.bf16.mxu0 %v7878_v1 }
 0x397   : > { %6961 = vmatpush3.bf16.msra.mxu0 %v7707_v33 }
 0x398   : > { %6962 = vmatprep.subr.bf16.mxu0 %v7878_v1 }
 0x39b   : > { %6963 = vmatpush3.bf16.msra.mxu0 %v7708_v34 }
 0x39c   : > { %6968 = vmatprep.subr.bf16.mxu0 %v7878_v1 }
 0x39e   : > { %6965 = vmatmul.mubr.bf16.vlgmr.msra.gmra.mrb[40].mxu0 %v2611_v37 }
 0x39f   : > { %6969 = vmatpush3.bf16.msra.mxu0 %v7709_v36  ;;  %6984 = vmatprep.mubr.msk.bf16.mxu0 %vm7879_vm0, %v7878_v1 }
 0x3a0   : > { %6970 = vmatprep.subr.bf16.mxu0 %v7878_v1 }
 0x3a3   : > { %6971 = vmatpush3.bf16.msra.mxu0 %v7710_v38 }
 0x3a4   : > { %6972 = vmatprep.subr.bf16.mxu0 %v7878_v1 }
 0x3a7   : > { %6973 = vmatpush3.bf16.msra.mxu0 %v7711_v40 }
 0x3a8   : > { %6974 = vmatprep.subr.bf16.mxu0 %v7878_v1 }
 0x3ab   : > { %6975 = vmatpush3.bf16.msra.mxu0 %v7712_v41  ;;  %v5683_v41 = vld [vmem:[%s9632_s6 + $0x6] ss:$0 sm:$0xff] }
 0x3ac   : > { %6976 = vmatprep.subr.bf16.mxu0 %v7878_v1 }
 0x3af   : > { %6977 = vmatpush3.bf16.msra.mxu0 %v7713_v43 }
 0x3b0   : > { %6978 = vmatprep.subr.bf16.mxu0 %v7878_v1 }
 0x3b3   : > { %6979 = vmatpush3.bf16.msra.mxu0 %v7714_v44 }
 0x3b4   : > { %6980 = vmatprep.subr.bf16.mxu0 %v7878_v1 }
 0x3b7   : > { %6981 = vmatpush3.bf16.msra.mxu0 %v7715_v45 }
 0x3b8   : > { %6982 = vmatprep.subr.bf16.mxu0 %v7878_v1 }
 0x3bb   : > { %6983 = vmatpush3.bf16.msra.mxu0 %v7716_v46 }
 0x3bc   : > { %7088 = vmatprep.subr.bf16.mxu0 %v7878_v1 }
 0x3be   : > { %6985 = vmatmul.mubr.bf16.vlgmr.msra.gmra.mrb[44].mxu0 %v2719_v48  ;;  %v7731_v48 = vld [vmem:[%s9630_s4 + $0x540] sm:$0xff]  }
 0x3bf   : > { %7089 = vmatpush3.bf16.msra.mxu0 %v7720_v47  ;;  %7104 = vmatprep.mubr.msk.bf16.mxu0 %vm7879_vm0, %v7878_v1 }
 0x3c0   : > { %7090 = vmatprep.subr.bf16.mxu0 %v7878_v1 }
 0x3c3   : > { %7091 = vmatpush3.bf16.msra.mxu0 %v7722_v49 }
 0x3c4   : > { %7092 = vmatprep.subr.bf16.mxu0 %v7878_v1 }
 0x3c7   : > { %7093 = vmatpush3.bf16.msra.mxu0 %v7724_v50 }
 0x3c8   : > { %7094 = vmatprep.subr.bf16.mxu0 %v7878_v1 }
 0x3cb   : > { %7095 = vmatpush3.bf16.msra.mxu0 %v7726_v51 }
 0x3cc   : > { %7096 = vmatprep.subr.bf16.mxu0 %v7878_v1 }
 0x3cf   : > { %7097 = vmatpush3.bf16.msra.mxu0 %v7728_v52 }
 0x3d0   : > { %7098 = vmatprep.subr.bf16.mxu0 %v7878_v1 }
 0x3d3   : > { %7099 = vmatpush3.bf16.msra.mxu0 %v7730_v53 }
 0x3d4   : > { %7100 = vmatprep.subr.bf16.mxu0 %v7878_v1 }
 0x3d7   : > { %7101 = vmatpush3.bf16.msra.mxu0 %v7732_v54  ;;  %v7733_v54 = vld [vmem:[%s9630_s4 + $0x548] sm:$0xff]  }
 0x3d8   : > { %7102 = vmatprep.subr.bf16.mxu0 %v7878_v1 }
 0x3db   : > { %7103 = vmatpush3.bf16.msra.mxu0 %v7734_v55  ;;  %v7735_v55 = vld [vmem:[%s9630_s4 + $0x550] sm:$0xff]  }
 0x3dc   : > { %7108 = vmatprep.subr.bf16.mxu0 %v7878_v1 }
 0x3de   : > { %7105 = vmatmul.mubr.bf16.vlgmr.msra.gmra.mrb[48].mxu0 %v8243_v29  ;;  %v7721_v29 = vld [vmem:[%s9630_s4 + $0x598] sm:$0xff]  }
 0x3df   : > { %7124 = vmatprep.mubr.msk.bf16.mxu0 %vm7879_vm0, %v7878_v1  ;;  %6995 = vmatpush3.bf16.msra.mxu1 %v7721_v29  ;;  %v7754_v29 = vld [vmem:[%s9630_s4 + $0x708] sm:$0xff]  }
 0x3e0   : > { %6996 = vmatprep.subr.bf16.mxu1 %v7878_v1  ;;  %7109 = vmatpush3.bf16.msra.mxu0 %v7736_v59  ;;  %v7739_v59 = vld [vmem:[%s9630_s4 + $0x560] sm:$0xff]  }
 0x3e1   : > { %7110 = vmatprep.subr.bf16.mxu0 %v7878_v1 }
 0x3e3   : > { %6997 = vmatpush3.bf16.msra.mxu1 %v7723_v61 }
 0x3e4   : > { %7111 = vmatpush3.bf16.msra.mxu0 %v7738_v60  ;;  %6998 = vmatprep.subr.bf16.mxu1 %v7878_v1  ;;  %v7756_v60 = vld [vmem:[%s9630_s4 + $0x710] sm:$0xff]  }
 0x3e5   : > { %7112 = vmatprep.subr.bf16.mxu0 %v7878_v1 }
 0x3e7   : > { %6999 = vmatpush3.bf16.msra.mxu1 %v7725_v4  ;;  %v7743_v4 = vld [vmem:[%s9630_s4 + $0x570] sm:$0xff]  }
 0x3e8   : > { %7113 = vmatpush3.bf16.msra.mxu0 %v7740_v63  ;;  %7000 = vmatprep.subr.bf16.mxu1 %v7878_v1  ;;  %v7741_v63 = vld [vmem:[%s9630_s4 + $0x568] sm:$0xff]  }
 0x3e9   : > { %7114 = vmatprep.subr.bf16.mxu0 %v7878_v1 }
 0x3eb   : > { %7001 = vmatpush3.bf16.msra.mxu1 %v7727_v6  ;;  %v7745_v6 = vld [vmem:[%s9630_s4 + $0x578] sm:$0xff]  }
 0x3ec   : > { %7115 = vmatpush3.bf16.msra.mxu0 %v7742_v5  ;;  %7002 = vmatprep.subr.bf16.mxu1 %v7878_v1  ;;  %v7760_v5 = vld [vmem:[%s9630_s4 + $0x720] sm:$0xff]  }
 0x3ed   : > { %7116 = vmatprep.subr.bf16.mxu0 %v7878_v1 }
 0x3ef   : > { %7003 = vmatpush3.bf16.msra.mxu1 %v7729_v8  ;;  %v7747_v8 = vld [vmem:[%s9630_s4 + $0x5c0] sm:$0xff]  }
 0x3f0   : > { %7117 = vmatpush3.bf16.msra.mxu0 %v7744_v7  ;;  %7008 = vmatprep.subr.bf16.mxu1 %v7878_v1  ;;  %v7762_v7 = vld [vmem:[%s9630_s4 + $0x728] sm:$0xff]  }
 0x3f1   : > { %7118 = vmatprep.subr.bf16.mxu0 %v7878_v1 }
 0x3f4   : > { %7119 = vmatpush3.bf16.msra.mxu0 %v7746_v10 }
 0x3f5   : > { %7120 = vmatprep.subr.bf16.mxu0 %v7878_v1 }
 0x3f8   : > { %7121 = vmatpush3.bf16.msra.mxu0 %v7748_v11  ;;  %v7764_v11 = vld [vmem:[%s9630_s4 + $0x730] sm:$0xff]  }
 0x3f9   : > { %7122 = vmatprep.subr.bf16.mxu0 %v7878_v1 }
 0x3fc   : > { %7123 = vmatpush3.bf16.msra.mxu0 %v7750_v12  ;;  %v7749_v12 = vld [vmem:[%s9630_s4 + $0x5c8] sm:$0xff]  }
 0x3fd   : > { %7128 = vmatprep.subr.bf16.mxu0 %v7878_v1 }
 0x411   : > { %v2408_v62 = vpop.f32.mrb[28].mxu0 }
 0x412   : > { %v6906_v0 = vpop.f32.mrb[29].mxu0 }
 0x413   : > { %v2411_v2 = vpop.f32.mrb[30].mxu0 }
 0x414   : > { %v6907_v3 = vpop.f32.mrb[31].mxu0  ;;  %v7758_v2 = vld [vmem:[%s9630_s4 + $0x718] sm:$0xff]  }
 0x431   : > { %v2496_v13 = vpop.f32.mrb[32].mxu0 }
 0x432   : > { %v2497_v14 = vadd.f32 %v2496_v13, %v2408_v62  ;;  %v6926_v16 = vpop.f32.mrb[33].mxu0  ;;  %v7766_v13 = vld [vmem:[%s9630_s4 + $0x738] sm:$0xff]  }
 0x433   : > { %v2499_v17 = vpop.f32.mrb[34].mxu0  ;;  %v7751_v16 = vld [vmem:[%s9630_s4 + $0x5d0] sm:$0xff]  }
 0x434   : > { %v6927_v18 = vpop.f32.mrb[35].mxu0  ;;  %v8990_v17 = vld [vmem:[%s9631_s5] sm:$0xff]  }
 0x440   : > { %v2273_v19 = vpop.f32.mrb[12].mxu1 }
 0x441   : > { %v7448_v21 = vadd.f32 %v5416_v15, %v2273_v19  ;;  %v6886_v22 = vpop.f32.mrb[13].mxu1  ;;  %v7753_v15 = vld [vmem:[%s9630_s4 + $0x5d8] sm:$0xff]   ;;  %v9001_v19 = vld [vmem:[%s9631_s5 + $0x8] sm:$0xff]  }
 0x442   : > { %v2276_v23 = vpop.f32.mrb[14].mxu1  ;;  %v7757_v22 = vld [vmem:[%s9630_s4 + $0x5e8] sm:$0xff]  }
 0x443   : > { %v7449_v24 = vadd.f32 %v7448_v21, %v5562_v20  ;;  %v6887_v25 = vpop.f32.mrb[15].mxu1  ;;  %v7755_v20 = vld [vmem:[%s9630_s4 + $0x5e0] sm:$0xff]   ;;  %v9014_v21 = vld [vmem:[%s9631_s5 + $0x10] sm:$0xff]   ;;  %v9025_v23 = vld [vmem:[%s9631_s5 + $0x18] sm:$0xff]  }
 0x444   : > { %v9036_v25 = vld [vmem:[%s9631_s5 + $0x20] sm:$0xff]  }
 0x445   : > { %6113 = vst [vmem:[%s8096_s28 + $0x8] sm:$0xff] %v7449_v24  ;;  %v7759_v24 = vld [vmem:[%s9630_s4 + $0x5f0] sm:$0xff]  }
 0x451   : > { %v2603_v26 = vpop.f32.mrb[36].mxu0 }
 0x452   : > { %v2609_v28 = vadd.f32 %v2603_v26, %v2497_v14  ;;  %v6946_v31 = vpop.f32.mrb[37].mxu0  ;;  %v7761_v26 = vld [vmem:[%s9630_s4 + $0x5f8] sm:$0xff]  }
 0x453   : > { %v2606_v32 = vpop.f32.mrb[38].mxu0  ;;  %v7763_v31 = vld [vmem:[%s9630_s4 + $0x600] sm:$0xff]  }
 0x454   : > { %v6947_v33 = vpop.f32.mrb[39].mxu0 }
 0x455   : > { %v9060_v33 = vld [vmem:[%s9631_s5 + $0x30] sm:$0xff]  }
 0x471   : > { %v2711_v34 = vpop.f32.mrb[40].mxu0 }
 0x472   : > { %v2717_v35 = vadd.f32 %v2711_v34, %v2609_v28  ;;  %v6966_v36 = vpop.f32.mrb[41].mxu0  ;;  %v9047_v28 = vld [vmem:[%s9631_s5 + $0x28] sm:$0xff]  }
 0x473   : > { %v2714_v37 = vpop.f32.mrb[42].mxu0  ;;  %v7765_v34 = vld [vmem:[%s9630_s4 + $0x608] sm:$0xff]   ;;  %v7767_v36 = vld [vmem:[%s9630_s4 + $0x610] sm:$0xff]  }
 0x474   : > { %v6967_v38 = vpop.f32.mrb[43].mxu0  ;;  %v4058_v37 = vpack.c.bf16 %v8077_v39, %v8077_v39 }
 0x475   : > { %v7768_v38 = vld [vmem:[%s9630_s4 + $0x618] sm:$0xff]  }
 0x491   : > { %v2819_v40 = vpop.f32.mrb[44].mxu0 }
 0x492   : > { %v2825_v43 = vadd.f32 %v2819_v40, %v2717_v35  ;;  %v6986_v44 = vpop.f32.mrb[45].mxu0  ;;  %v9073_v35 = vld [vmem:[%s9631_s5 + $0x38] sm:$0xff]   ;;  %v7769_v40 = vld [vmem:[%s9630_s4 + $0x620] sm:$0xff]  }
 0x493   : > { %v2822_v45 = vpop.f32.mrb[46].mxu0  ;;  %v7772_v44 = vld [vmem:[%s9630_s4 + $0x638] sm:$0xff]  }
 0x494   : > { %v2831_v46 = vadd.f32 %v5683_v41, %v2825_v43  ;;  %v6987_v30 = vpop.f32.mrb[47].mxu0  ;;  %v7770_v41 = vld [vmem:[%s9630_s4 + $0x628] sm:$0xff]   ;;  %v7771_v43 = vld [vmem:[%s9630_s4 + $0x630] sm:$0xff]   ;;  %v7773_v45 = vld [vmem:[%s9630_s4 + $0x640] sm:$0xff]  }
 0x495   : > { %v7774_v30 = vld [vmem:[%s9630_s4 + $0x648] sm:$0xff]  }
 0x496   : > { %v8897_v47 = vmax.f32 %v2831_v46, 0.0 }
 0x498   : > { %2833 = vst [vmem:[#allocation2 + $0x2] sm:$0xff] %v8897_v47  ;;  %v3049_v32 = vpack.c.bf16 %v8897_v47, %v8897_v47  ;;  %v7775_v47 = vld [vmem:[%s9630_s4 + $0x650] sm:$0xff]  }
 0x49f   : > { %v2853_v49 = vld [vmem:[#allocation2 + $0x1] sm:$0xff] }
 0x4a0   : > { %v2834_v50 = vld [vmem:[#allocation2] sm:$0xff]  ;;  %v2854_v52 = vpack.c.bf16 %v2853_v49, %v2853_v49 }
 0x4a1   : > { %v8903_v51 = vld [vmem:[#allocation2 + $0x3] sm:$0xff]  ;;  %v2835_v10 = vpack.c.bf16 %v2834_v50, %v2834_v50 }
 0x4a2   : > { %v8905_v53 = vld [vmem:[#allocation2 + $0x4] sm:$0xff]  ;;  %7005 = vmatmul.mubr.bf16.vlgmr.msra.gmra.mrb[16].mxu1 %v2854_v52  ;;  %v3157_v46 = vpack.c.bf16 %v8903_v51, %v8903_v51  ;;  %v7779_v51 = vld [vmem:[%s9630_s4 + $0x670] sm:$0xff]   ;;  %v7780_v52 = vld [vmem:[%s9630_s4 + $0x678] sm:$0xff]  }
 0x4a3   : > { %3378 = vst [vmem:[#allocation2 + $0x2] sm:$0xff] %v8235_v27  ;;  %7009 = vmatpush3.bf16.msra.mxu1 %v7731_v48  ;;  %7024 = vmatprep.mubr.msk.bf16.mxu1 %vm7879_vm0, %v7878_v1  ;;  %v7752_v27 = vld [vmem:[%s9630_s4 + $0x700] sm:$0xff]   ;;  %v7776_v48 = vld [vmem:[%s9630_s4 + $0x658] sm:$0xff]   ;;  %v7778_v50 = vld [vmem:[%s9630_s4 + $0x668] sm:$0xff]  }
 0x4a4   : > { %7010 = vmatprep.subr.bf16.mxu1 %v7878_v1  ;;  %v7777_v49 = vld [vmem:[%s9630_s4 + $0x660] sm:$0xff]  }
 0x4a7   : > { %7011 = vmatpush3.bf16.msra.mxu1 %v7733_v54  ;;  %v7781_v54 = vld [vmem:[%s9630_s4 + $0x780] sm:$0xff]  }
 0x4a8   : > { %7012 = vmatprep.subr.bf16.mxu1 %v7878_v1 }
 0x4aa   : > { %v3379_v56 = vld [vmem:[#allocation2 + $0x1] sm:$0xff] }
 0x4ab   : > { %v3380_v57 = vpack.c.bf16 %v3379_v56, %v3379_v56  ;;  %7013 = vmatpush3.bf16.msra.mxu1 %v7735_v55  ;;  %v3593_v14 = vld [vmem:[#allocation2 + $0x3] sm:$0xff]  ;;  %v3265_v55 = vpack.c.bf16 %v8905_v53, %v8905_v53  ;;  %v7785_v53 = vld [vmem:[%s9630_s4 + $0x798] sm:$0xff]  }
 0x4ac   : > { %7014 = vmatprep.subr.bf16.mxu1 %v7878_v1  ;;  %v3594_v18 = vpack.c.bf16 %v3593_v14, %v3593_v14  ;;  %v7782_v56 = vld [vmem:[%s9630_s4 + $0x788] sm:$0xff]   ;;  %v7799_v14 = vld [vmem:[%s9630_s4 + $0x750] sm:$0xff]  }
 0x4ad   : > { %7125 = vmatmul.mubr.bf16.vlgmr.msra.gmra.mrb[52].mxu0 %v3380_v57  ;;  %v7787_v57 = vld [vmem:[%s9630_s4 + $0x7a0] sm:$0xff]  }
 0x4ae   : > { %7129 = vmatpush3.bf16.msra.mxu0 %v7752_v27  ;;  %7144 = vmatprep.mubr.msk.bf16.mxu0 %vm7879_vm0, %v7878_v1  ;;  %v7783_v27 = vld [vmem:[%s9630_s4 + $0x790] sm:$0xff]  }
 0x4af   : > { %7130 = vmatprep.subr.bf16.mxu0 %v7878_v1  ;;  %7015 = vmatpush3.bf16.msra.mxu1 %v7737_v58  ;;  %v7789_v58 = vld [vmem:[%s9630_s4 + $0x7a8] sm:$0xff]  }
 0x4b0   : > { %7016 = vmatprep.subr.bf16.mxu1 %v7878_v1 }
 0x4b1   : > { %v8939_v61 = vpop.f32.mrb[48].mxu0 }
 0x4b2   : > { %7131 = vmatpush3.bf16.msra.mxu0 %v7754_v29  ;;  %v7106_v62 = vpop.f32.mrb[49].mxu0  ;;  %v7791_v29 = vld [vmem:[%s9630_s4 + $0x7b0] sm:$0xff]  }
 0x4b3   : > { %7132 = vmatprep.subr.bf16.mxu0 %v7878_v1  ;;  %7017 = vmatpush3.bf16.msra.mxu1 %v7739_v59  ;;  %v3502_v0 = vpop.f32.mrb[50].mxu0  ;;  %v7793_v59 = vld [vmem:[%s9630_s4 + $0x7b8] sm:$0xff]  }
 0x4b4   : > { %7018 = vmatprep.subr.bf16.mxu1 %v7878_v1  ;;  %v7107_v3 = vpop.f32.mrb[51].mxu0 }
 0x4b6   : > { %7133 = vmatpush3.bf16.msra.mxu0 %v7756_v60 }
 0x4b7   : > { %7134 = vmatprep.subr.bf16.mxu0 %v7878_v1  ;;  %7019 = vmatpush3.bf16.msra.mxu1 %v7741_v63 }
 0x4b8   : > { %7020 = vmatprep.subr.bf16.mxu1 %v7878_v1 }
 0x4ba   : > { %7135 = vmatpush3.bf16.msra.mxu0 %v7758_v2 }
 0x4bb   : > { %7136 = vmatprep.subr.bf16.mxu0 %v7878_v1  ;;  %7021 = vmatpush3.bf16.msra.mxu1 %v7743_v4  ;;  %v5877_v4 = vld [vmem:[%s9632_s6 + $0x8] ss:$0 sm:$0xff] }
 0x4bc   : > { %7022 = vmatprep.subr.bf16.mxu1 %v7878_v1 }
 0x4be   : > { %7137 = vmatpush3.bf16.msra.mxu0 %v7760_v5 }
 0x4bf   : > { %7138 = vmatprep.subr.bf16.mxu0 %v7878_v1  ;;  %7023 = vmatpush3.bf16.msra.mxu1 %v7745_v6 }
 0x4c0   : > { %7028 = vmatprep.subr.bf16.mxu1 %v7878_v1 }
 0x4c2   : > { %7139 = vmatpush3.bf16.msra.mxu0 %v7762_v7  ;;  %7025 = vmatmul.mubr.bf16.vlgmr.msra.gmra.mrb[16].mxu1 %v2835_v10 }
 0x4c3   : > { %7140 = vmatprep.subr.bf16.mxu0 %v7878_v1  ;;  %7029 = vmatpush3.bf16.msra.mxu1 %v7747_v8 }
 0x4c4   : > { %7044 = vmatprep.mubr.msk.bf16.mxu1 %vm7879_vm0, %v7878_v1  ;;  %7030 = vmatprep.subr.bf16.mxu1 %v7878_v1 }
 0x4c6   : > { %7141 = vmatpush3.bf16.msra.mxu0 %v7764_v11 }
 0x4c7   : > { %7142 = vmatprep.subr.bf16.mxu0 %v7878_v1  ;;  %7031 = vmatpush3.bf16.msra.mxu1 %v7749_v12  ;;  %v7795_v12 = vld [vmem:[%s9630_s4 + $0x740] sm:$0xff]  }
 0x4c8   : > { %7032 = vmatprep.subr.bf16.mxu1 %v7878_v1 }
 0x4ca   : > { %7143 = vmatpush3.bf16.msra.mxu0 %v7766_v13  ;;  %v7797_v13 = vld [vmem:[%s9630_s4 + $0x748] sm:$0xff]  }
 0x4cb   : > { %7208 = vmatprep.subr.bf16.mxu0 %v7878_v1  ;;  %7033 = vmatpush3.bf16.msra.mxu1 %v7751_v16 }
 0x4cc   : > { %7034 = vmatprep.subr.bf16.mxu1 %v7878_v1 }
 0x4cd   : > { %7145 = vmatmul.mubr.bf16.vlgmr.msra.gmra.mrb[56].mxu0 %v3594_v18 }
 0x4ce   : > { %7209 = vmatpush3.bf16.msra.mxu0 %v8990_v17  ;;  %7224 = vmatprep.mubr.msk.bf16.mxu0 %vm7879_vm0, %v7878_v1 }
 0x4cf   : > { %7210 = vmatprep.subr.bf16.mxu0 %v7878_v1  ;;  %7035 = vmatpush3.bf16.msra.mxu1 %v7753_v15  ;;  %v7800_v15 = vld [vmem:[%s9630_s4 + $0x758] sm:$0xff]  }
 0x4d0   : > { %7036 = vmatprep.subr.bf16.mxu1 %v7878_v1 }
 0x4d2   : > { %7211 = vmatpush3.bf16.msra.mxu0 %v9001_v19 }
 0x4d3   : > { %7212 = vmatprep.subr.bf16.mxu0 %v7878_v1  ;;  %7037 = vmatpush3.bf16.msra.mxu1 %v7755_v20  ;;  %v7801_v20 = vld [vmem:[%s9630_s4 + $0x760] sm:$0xff]  }
 0x4d4   : > { %7038 = vmatprep.subr.bf16.mxu1 %v7878_v1 }
 0x4d6   : > { %7213 = vmatpush3.bf16.msra.mxu0 %v9014_v21 }
 0x4d7   : > { %7214 = vmatprep.subr.bf16.mxu0 %v7878_v1  ;;  %7039 = vmatpush3.bf16.msra.mxu1 %v7757_v22 }
 0x4d8   : > { %7040 = vmatprep.subr.bf16.mxu1 %v7878_v1 }
 0x4da   : > { %7215 = vmatpush3.bf16.msra.mxu0 %v9025_v23 }
 0x4db   : > { %7216 = vmatprep.subr.bf16.mxu0 %v7878_v1  ;;  %7041 = vmatpush3.bf16.msra.mxu1 %v7759_v24 }
 0x4dc   : > { %7042 = vmatprep.subr.bf16.mxu1 %v7878_v1 }
 0x4de   : > { %7217 = vmatpush3.bf16.msra.mxu0 %v9036_v25 }
 0x4df   : > { %7218 = vmatprep.subr.bf16.mxu0 %v7878_v1  ;;  %7043 = vmatpush3.bf16.msra.mxu1 %v7761_v26 }
 0x4e0   : > { %7048 = vmatprep.subr.bf16.mxu1 %v7878_v1 }
 0x4e2   : > { %7219 = vmatpush3.bf16.msra.mxu0 %v9047_v28  ;;  %7045 = vmatmul.mubr.bf16.vlgmr.msra.gmra.mrb[16].mxu1 %v3049_v32  ;;  %v7802_v32 = vld [vmem:[%s9630_s4 + $0x768] sm:$0xff]  }
 0x4e3   : > { %7220 = vmatprep.subr.bf16.mxu0 %v7878_v1  ;;  %7049 = vmatpush3.bf16.msra.mxu1 %v7763_v31  ;;  %v9224_v31 = vld [vmem:[%s8096_s28] sm:$0xff] }
 0x4e4   : > { %7064 = vmatprep.mubr.msk.bf16.mxu1 %vm7879_vm0, %v7878_v1  ;;  %7050 = vmatprep.subr.bf16.mxu1 %v7878_v1 }
 0x4e6   : > { %7221 = vmatpush3.bf16.msra.mxu0 %v9060_v33 }
 0x4e7   : > { %7222 = vmatprep.subr.bf16.mxu0 %v7878_v1  ;;  %7051 = vmatpush3.bf16.msra.mxu1 %v7765_v34  ;;  %v7803_v34 = vld [vmem:[%s9630_s4 + $0x770] sm:$0xff]  }
 0x4e8   : > { %7052 = vmatprep.subr.bf16.mxu1 %v7878_v1 }
 0x4ea   : > { %7223 = vmatpush3.bf16.msra.mxu0 %v9073_v35 }
 0x4eb   : > { %7228 = vmatprep.subr.bf16.mxu0 %v7878_v1  ;;  %7053 = vmatpush3.bf16.msra.mxu1 %v7767_v36 }
 0x4ec   : > { %7054 = vmatprep.subr.bf16.mxu1 %v7878_v1 }
 0x4ed   : > { %7225 = vmatmul.mubr.bf16.vlgmr.msra.gmra.mrb[60].mxu0 %v4058_v37 }
 0x4ee   : > { %7229 = vmatpush3.bf16.msra.mxu0 %v8990_v17  ;;  %7244 = vmatprep.mubr.msk.bf16.mxu0 %vm7879_vm0, %v7878_v1 }
 0x4ef   : > { %7230 = vmatprep.subr.bf16.mxu0 %v7878_v1  ;;  %7055 = vmatpush3.bf16.msra.mxu1 %v7768_v38 }
 0x4f0   : > { %7056 = vmatprep.subr.bf16.mxu1 %v7878_v1 }
 0x4f2   : > { %7231 = vmatpush3.bf16.msra.mxu0 %v9001_v19 }
 0x4f3   : > { %7232 = vmatprep.subr.bf16.mxu0 %v7878_v1  ;;  %7057 = vmatpush3.bf16.msra.mxu1 %v7769_v40 }
 0x4f4   : > { %7058 = vmatprep.subr.bf16.mxu1 %v7878_v1 }
 0x4f6   : > { %7233 = vmatpush3.bf16.msra.mxu0 %v9014_v21 }
 0x4f7   : > { %7234 = vmatprep.subr.bf16.mxu0 %v7878_v1  ;;  %7059 = vmatpush3.bf16.msra.mxu1 %v7770_v41  ;;  %v7811_v41 = vld [vmem:[%s9630_s4 + $0x7f0] sm:$0xff]  }
 0x4f8   : > { %7060 = vmatprep.subr.bf16.mxu1 %v7878_v1 }
 0x4fa   : > { %7235 = vmatpush3.bf16.msra.mxu0 %v9025_v23 }
 0x4fb   : > { %7236 = vmatprep.subr.bf16.mxu0 %v7878_v1  ;;  %7061 = vmatpush3.bf16.msra.mxu1 %v7771_v43  ;;  %v9309_v43 = vld [vmem:[%s9631_s5 + $0x10] sm:$0xff]  }
 0x4fc   : > { %7062 = vmatprep.subr.bf16.mxu1 %v7878_v1 }
 0x4fe   : > { %7237 = vmatpush3.bf16.msra.mxu0 %v9036_v25 }
 0x4ff   : > { %7238 = vmatprep.subr.bf16.mxu0 %v7878_v1  ;;  %7063 = vmatpush3.bf16.msra.mxu1 %v7772_v44  ;;  %v7812_v44 = vld [vmem:[%s9630_s4 + $0x7f8] sm:$0xff]  }
 0x500   : > { %7068 = vmatprep.subr.bf16.mxu1 %v7878_v1 }
 0x502   : > { %7239 = vmatpush3.bf16.msra.mxu0 %v9047_v28  ;;  %7065 = vmatmul.mubr.bf16.vlgmr.msra.gmra.mrb[16].mxu1 %v3157_v46  ;;  %v7813_v46 = vld [vmem:[%s9630_s4 + $0x840] sm:$0xff]  }
 0x503   : > { %7240 = vmatprep.subr.bf16.mxu0 %v7878_v1  ;;  %7069 = vmatpush3.bf16.msra.mxu1 %v7773_v45  ;;  %v9320_v45 = vld [vmem:[%s9631_s5 + $0x18] sm:$0xff]  }
 0x504   : > { %7084 = vmatprep.mubr.msk.bf16.mxu1 %vm7879_vm0, %v7878_v1  ;;  %7070 = vmatprep.subr.bf16.mxu1 %v7878_v1 }
 0x506   : > { %7241 = vmatpush3.bf16.msra.mxu0 %v9060_v33 }
 0x507   : > { %7242 = vmatprep.subr.bf16.mxu0 %v7878_v1  ;;  %7071 = vmatpush3.bf16.msra.mxu1 %v7774_v30  ;;  %v9331_v30 = vld [vmem:[%s9631_s5 + $0x20] sm:$0xff]  }
 0x508   : > { %7072 = vmatprep.subr.bf16.mxu1 %v7878_v1 }
 0x50a   : > { %7243 = vmatpush3.bf16.msra.mxu0 %v9073_v35 }
 0x50b   : > { %7248 = vmatprep.subr.bf16.mxu0 %v7878_v1  ;;  %7073 = vmatpush3.bf16.msra.mxu1 %v7775_v47 }
 0x50c   : > { %7074 = vmatprep.subr.bf16.mxu1 %v7878_v1 }
 0x50f   : > { %7075 = vmatpush3.bf16.msra.mxu1 %v7776_v48  ;;  %v7814_v48 = vld [vmem:[%s9630_s4 + $0x848] sm:$0xff]  }
 0x510   : > { %7076 = vmatprep.subr.bf16.mxu1 %v7878_v1 }
 0x513   : > { %7077 = vmatpush3.bf16.msra.mxu1 %v7777_v49  ;;  %v9344_v49 = vld [vmem:[%s9631_s5 + $0x28] sm:$0xff]  }
 0x514   : > { %7078 = vmatprep.subr.bf16.mxu1 %v7878_v1 }
 0x517   : > { %7079 = vmatpush3.bf16.msra.mxu1 %v7778_v50  ;;  %v7816_v50 = vld [vmem:[%s9630_s4 + $0x850] sm:$0xff]  }
 0x518   : > { %7080 = vmatprep.subr.bf16.mxu1 %v7878_v1 }
 0x51b   : > { %7081 = vmatpush3.bf16.msra.mxu1 %v7779_v51  ;;  %v9357_v51 = vld [vmem:[%s9631_s5 + $0x30] sm:$0xff]  }
 0x51c   : > { %7082 = vmatprep.subr.bf16.mxu1 %v7878_v1 }
 0x51f   : > { %7083 = vmatpush3.bf16.msra.mxu1 %v7780_v52  ;;  %v7818_v52 = vld [vmem:[%s9630_s4 + $0x858] sm:$0xff]  }
 0x520   : > { %7148 = vmatprep.subr.bf16.mxu1 %v7878_v1 }
 0x522   : > { %7085 = vmatmul.mubr.bf16.vlgmr.msra.gmra.mrb[16].mxu1 %v3265_v55  ;;  %v7820_v55 = vld [vmem:[%s9630_s4 + $0x860] sm:$0xff]  }
 0x523   : > { %7149 = vmatpush3.bf16.msra.mxu1 %v7781_v54  ;;  %7164 = vmatprep.mubr.msk.bf16.mxu1 %vm7879_vm0, %v7878_v1  ;;  %v9368_v54 = vld [vmem:[%s9631_s5 + $0x38] sm:$0xff]  }
 0x524   : > { %7150 = vmatprep.subr.bf16.mxu1 %v7878_v1 }
 0x527   : > { %7151 = vmatpush3.bf16.msra.mxu1 %v7782_v56  ;;  %v4253_v56 = vpack.c.bf16 %v9224_v31, %v9224_v31 }
 0x528   : > { %7152 = vmatprep.subr.bf16.mxu1 %v7878_v1 }
 0x52b   : > { %7153 = vmatpush3.bf16.msra.mxu1 %v7783_v27  ;;  %v7822_v27 = vld [vmem:[%s9630_s4 + $0x868] sm:$0xff]  }
 0x52c   : > { %7154 = vmatprep.subr.bf16.mxu1 %v7878_v1 }
 0x52f   : > { %7155 = vmatpush3.bf16.msra.mxu1 %v7785_v53  ;;  %v7824_v53 = vld [vmem:[%s9630_s4 + $0x870] sm:$0xff]  }
 0x530   : > { %7156 = vmatprep.subr.bf16.mxu1 %v7878_v1 }
 0x533   : > { %7157 = vmatpush3.bf16.msra.mxu1 %v7787_v57  ;;  %v7826_v57 = vld [vmem:[%s9630_s4 + $0x878] sm:$0xff]  }
 0x534   : > { %7158 = vmatprep.subr.bf16.mxu1 %v7878_v1 }
 0x537   : > { %7159 = vmatpush3.bf16.msra.mxu1 %v7789_v58  ;;  %v7828_v58 = vld [vmem:[%s9630_s4 + $0x800] sm:$0xff]  }
 0x538   : > { %7160 = vmatprep.subr.bf16.mxu1 %v7878_v1 }
 0x53b   : > { %7161 = vmatpush3.bf16.msra.mxu1 %v7791_v29  ;;  %v7830_v29 = vld [vmem:[%s9630_s4 + $0x808] sm:$0xff]  }
 0x53c   : > { %7162 = vmatprep.subr.bf16.mxu1 %v7878_v1 }
 0x53f   : > { %7163 = vmatpush3.bf16.msra.mxu1 %v7793_v59  ;;  %v7831_v59 = vld [vmem:[%s9630_s4 + $0x810] sm:$0xff]  }
 0x540   : > { %7168 = vmatprep.subr.bf16.mxu1 %v7878_v1 }
 0x580   : > { %v3587_v60 = vpop.f32.mrb[52].mxu0 }
 0x581   : > { %v3588_v62 = vadd.f32 %v3587_v60, %v8939_v61  ;;  %v7126_v63 = vpop.f32.mrb[53].mxu0  ;;  %v7833_v60 = vld [vmem:[%s9630_s4 + $0x820] sm:$0xff]  }
 0x582   : > { %v3590_v0 = vpop.f32.mrb[54].mxu0  ;;  %v7834_v63 = vld [vmem:[%s9630_s4 + $0x828] sm:$0xff]  }
 0x583   : > { %v7127_v2 = vpop.f32.mrb[55].mxu0  ;;  %v7835_v0 = vld [vmem:[%s9630_s4 + $0x830] sm:$0xff]  }
 0x584   : > { %v7836_v2 = vld [vmem:[%s9630_s4 + $0x838] sm:$0xff]  }
 0x5a0   : > { %v3694_v3 = vpop.f32.mrb[56].mxu0 }
 0x5a1   : > { %v3700_v5 = vadd.f32 %v3694_v3, %v3588_v62  ;;  %v7146_v6 = vpop.f32.mrb[57].mxu0 }
 0x5a2   : > { %v3697_v7 = vpop.f32.mrb[58].mxu0 }
 0x5a3   : > { %v3706_v8 = vadd.f32 %v5877_v4, %v3700_v5  ;;  %v7147_v10 = vpop.f32.mrb[59].mxu0  ;;  %v7837_v5 = vld [vmem:[%s9630_s4 + $0x880] sm:$0xff]   ;;  %v7838_v7 = vld [vmem:[%s9630_s4 + $0x888] sm:$0xff]  }
 0x5a4   : > { %v7840_v10 = vld [vmem:[%s9630_s4 + $0x898] sm:$0xff]  }
 0x5a5   : > { %v3707_v11 = vmax.f32 %v3706_v8, 0.0  ;;  %v7839_v8 = vld [vmem:[%s9630_s4 + $0x890] sm:$0xff]  }
 0x5a7   : > { %3708 = vst [vmem:[#allocation2 + $0x2] sm:$0xff] %v3707_v11  ;;  %v3729_v61 = vpack.c.bf16 %v3707_v11, %v3707_v11  ;;  %v7841_v11 = vld [vmem:[%s9630_s4 + $0x8a0] sm:$0xff]  }
 0x5a9   : > { %7165 = vmatmul.mubr.bf16.vlgmr.msra.gmra.mrb[16].mxu1 %v3729_v61  ;;  %v7843_v61 = vld [vmem:[%s9630_s4 + $0x8b0] sm:$0xff]  }
 0x5aa   : > { %7169 = vmatpush3.bf16.msra.mxu1 %v7795_v12  ;;  %7184 = vmatprep.mubr.msk.bf16.mxu1 %vm7879_vm0, %v7878_v1  ;;  %v7842_v12 = vld [vmem:[%s9630_s4 + $0x8a8] sm:$0xff]  }
 0x5ab   : > { %7170 = vmatprep.subr.bf16.mxu1 %v7878_v1 }
 0x5ae   : > { %7171 = vmatpush3.bf16.msra.mxu1 %v7797_v13  ;;  %v3709_v16 = vld [vmem:[#allocation2 + $0x1] sm:$0xff]  ;;  %v7844_v13 = vld [vmem:[%s9630_s4 + $0x8b8] sm:$0xff]  }
 0x5af   : > { %v9211_v18 = vld [vmem:[#allocation2 + $0x3] sm:$0xff]  ;;  %7172 = vmatprep.subr.bf16.mxu1 %v7878_v1  ;;  %v3710_v38 = vpack.c.bf16 %v3709_v16, %v3709_v16 }
 0x5b0   : > { %4038 = vst [vmem:[#allocation2 + $0x2] sm:$0xff] %v8077_v39  ;;  %v3924_v47 = vpack.c.bf16 %v9211_v18, %v9211_v18  ;;  %v7845_v18 = vld [vmem:[%s9630_s4 + $0x900] sm:$0xff]  }
 0x5b2   : > { %7173 = vmatpush3.bf16.msra.mxu1 %v7799_v14 }
 0x5b3   : > { %7174 = vmatprep.subr.bf16.mxu1 %v7878_v1 }
 0x5b6   : > { %7175 = vmatpush3.bf16.msra.mxu1 %v7800_v15  ;;  %v7846_v15 = vld [vmem:[%s9630_s4 + $0x8c0] sm:$0xff]  }
 0x5b7   : > { %v4055_v22 = vld [vmem:[#allocation2 + $0x1] sm:$0xff]  ;;  %7176 = vmatprep.subr.bf16.mxu1 %v7878_v1 }
 0x5b8   : > { %v4187_v24 = vld [vmem:[#allocation2 + $0x3] sm:$0xff]  ;;  %v4056_v26 = vpack.c.bf16 %v4055_v22, %v4055_v22 }
 0x5b9   : > { %4233 = vst [vmem:[#allocation2 + $0x2] sm:$0xff] %v9224_v31  ;;  %v4188_v40 = vpack.c.bf16 %v4187_v24, %v4187_v24  ;;  %v7848_v22 = vld [vmem:[%s9630_s4 + $0x8c8] sm:$0xff]   ;;  %v7849_v24 = vld [vmem:[%s9630_s4 + $0x910] sm:$0xff]  }
 0x5ba   : > { %7245 = vmatmul.mubr.bf16.vlgmr.msra.gmra.mrb[60].mxu0 %v4056_v26  ;;  %7177 = vmatpush3.bf16.msra.mxu1 %v7801_v20  ;;  %v7847_v20 = vld [vmem:[%s9630_s4 + $0x908] sm:$0xff]   ;;  %v7850_v26 = vld [vmem:[%s9630_s4 + $0x8d0] sm:$0xff]  }
 0x5bb   : > { %7249 = vmatpush3.bf16.msra.mxu0 %v8990_v17  ;;  %7178 = vmatprep.subr.bf16.mxu1 %v7878_v1  ;;  %v7804_v17 = vld [vmem:[%s9630_s4 + $0x778] sm:$0xff]  }
 0x5bc   : > { %7250 = vmatprep.subr.bf16.mxu0 %v7878_v1  ;;  %7264 = vmatprep.mubr.msk.bf16.mxu0 %vm7879_vm0, %v7878_v1 }
 0x5be   : > { %7179 = vmatpush3.bf16.msra.mxu1 %v7802_v32  ;;  %v7851_v32 = vld [vmem:[%s9630_s4 + $0x918] sm:$0xff]  }
 0x5bf   : > { %7251 = vmatpush3.bf16.msra.mxu0 %v9001_v19  ;;  %7180 = vmatprep.subr.bf16.mxu1 %v7878_v1  ;;  %v7805_v19 = vld [vmem:[%s9630_s4 + $0x7c0] sm:$0xff]  }
 0x5c0   : > { %v9239_v36 = vld [vmem:[#allocation2 + $0x1] sm:$0xff]  ;;  %7252 = vmatprep.subr.bf16.mxu0 %v7878_v1 }
 0x5c1   : > { %v9241_v37 = vld [vmem:[#allocation2 + $0x3] sm:$0xff]  ;;  %v4251_v62 = vpack.c.bf16 %v9239_v36, %v9239_v36 }
 0x5c2   : > { %4428 = vst [vmem:[#allocation2 + $0x2] sm:$0xff] %v8080_v42  ;;  %7181 = vmatpush3.bf16.msra.mxu1 %v7803_v34  ;;  %v7806_v42 = vld [vmem:[%s9630_s4 + $0x7c8] sm:$0xff]   ;;  %v4383_v6 = vpack.c.bf16 %v9241_v37, %v9241_v37  ;;  %v7852_v34 = vld [vmem:[%s9630_s4 + $0x8d8] sm:$0xff]   ;;  %v7853_v36 = vld [vmem:[%s9630_s4 + $0x920] sm:$0xff]  }
 0x5c3   : > { %7253 = vmatpush3.bf16.msra.mxu0 %v9014_v21  ;;  %7182 = vmatprep.subr.bf16.mxu1 %v7878_v1  ;;  %v7807_v21 = vld [vmem:[%s9630_s4 + $0x7d0] sm:$0xff]   ;;  %v7855_v37 = vld [vmem:[%s9630_s4 + $0x928] sm:$0xff]  }
 0x5c4   : > { %7254 = vmatprep.subr.bf16.mxu0 %v7878_v1 }
 0x5c6   : > { %7183 = vmatpush3.bf16.msra.mxu1 %v7804_v17  ;;  %v4230_v17 = vld [vmem:[%s9633_s7] sm:$0xff] }
 0x5c7   : > { %7255 = vmatpush3.bf16.msra.mxu0 %v9025_v23  ;;  %7188 = vmatprep.subr.bf16.mxu1 %v7878_v1  ;;  %v7808_v23 = vld [vmem:[%s9630_s4 + $0x7d8] sm:$0xff]  }
 0x5c8   : > { %7256 = vmatprep.subr.bf16.mxu0 %v7878_v1 }
 0x5c9   : > { %7185 = vmatmul.mubr.bf16.vlgmr.msra.gmra.mrb[16].mxu1 %v3710_v38  ;;  %v4429_v3 = vld [vmem:[#allocation2 + $0x1] sm:$0xff] }
 0x5ca   : > { %7189 = vmatpush3.bf16.msra.mxu1 %v7805_v19  ;;  %7204 = vmatprep.mubr.msk.bf16.mxu1 %vm7879_vm0, %v7878_v1  ;;  %v4430_v4 = vpack.c.bf16 %v4429_v3, %v4429_v3  ;;  %v4643_v14 = vld [vmem:[#allocation2 + $0x3] sm:$0xff]  ;;  %v7857_v19 = vld [vmem:[%s9630_s4 + $0x930] sm:$0xff]  }
 0x5cb   : > { %7257 = vmatpush3.bf16.msra.mxu0 %v9036_v25  ;;  %7190 = vmatprep.subr.bf16.mxu1 %v7878_v1  ;;  %v7809_v25 = vld [vmem:[%s9630_s4 + $0x7e0] sm:$0xff]   ;;  %v4644_v16 = vpack.c.bf16 %v4643_v14, %v4643_v14  ;;  %v7864_v14 = vld [vmem:[%s9630_s4 + $0x958] sm:$0xff]  }
 0x5cc   : > { %7258 = vmatprep.subr.bf16.mxu0 %v7878_v1 }
 0x5ce   : > { %7191 = vmatpush3.bf16.msra.mxu1 %v7806_v42  ;;  %v7854_v42 = vld [vmem:[%s9630_s4 + $0x8e0] sm:$0xff]  }
 0x5cf   : > { %7259 = vmatpush3.bf16.msra.mxu0 %v9047_v28  ;;  %7192 = vmatprep.subr.bf16.mxu1 %v7878_v1  ;;  %v9285_v28 = vld [vmem:[%s9631_s5] sm:$0xff]  }
 0x5d0   : > { %7260 = vmatprep.subr.bf16.mxu0 %v7878_v1 }
 0x5d2   : > { %7193 = vmatpush3.bf16.msra.mxu1 %v7807_v21 }
 0x5d3   : > { %7261 = vmatpush3.bf16.msra.mxu0 %v9060_v33  ;;  %7194 = vmatprep.subr.bf16.mxu1 %v7878_v1  ;;  %v7810_v33 = vld [vmem:[%s9630_s4 + $0x7e8] sm:$0xff]  }
 0x5d4   : > { %7262 = vmatprep.subr.bf16.mxu0 %v7878_v1 }
 0x5d6   : > { %7195 = vmatpush3.bf16.msra.mxu1 %v7808_v23 }
 0x5d7   : > { %7263 = vmatpush3.bf16.msra.mxu0 %v9073_v35  ;;  %7196 = vmatprep.subr.bf16.mxu1 %v7878_v1  ;;  %v9296_v35 = vld [vmem:[%s9631_s5 + $0x8] sm:$0xff]  }
 0x5d8   : > { %7268 = vmatprep.subr.bf16.mxu0 %v7878_v1 }
 0x5da   : > { %7265 = vmatmul.mubr.bf16.vlgmr.msra.gmra.mrb[60].mxu0 %v4188_v40  ;;  %7197 = vmatpush3.bf16.msra.mxu1 %v7809_v25 }
 0x5db   : > { %7269 = vmatpush3.bf16.msra.mxu0 %v9285_v28  ;;  %7198 = vmatprep.subr.bf16.mxu1 %v7878_v1 }
 0x5dc   : > { %7270 = vmatprep.subr.bf16.mxu0 %v7878_v1  ;;  %7284 = vmatprep.mubr.msk.bf16.mxu0 %vm7879_vm0, %v7878_v1 }
 0x5de   : > { %7199 = vmatpush3.bf16.msra.mxu1 %v7810_v33  ;;  %v7859_v33 = vld [vmem:[%s9630_s4 + $0x938] sm:$0xff]  }
 0x5df   : > { %7271 = vmatpush3.bf16.msra.mxu0 %v9296_v35  ;;  %7200 = vmatprep.subr.bf16.mxu1 %v7878_v1 }
 0x5e0   : > { %7272 = vmatprep.subr.bf16.mxu0 %v7878_v1 }
 0x5e2   : > { %7201 = vmatpush3.bf16.msra.mxu1 %v7811_v41  ;;  %v7860_v41 = vld [vmem:[%s9630_s4 + $0x8f8] sm:$0xff]  }
 0x5e3   : > { %7273 = vmatpush3.bf16.msra.mxu0 %v9309_v43  ;;  %7202 = vmatprep.subr.bf16.mxu1 %v7878_v1 }
 0x5e4   : > { %7274 = vmatprep.subr.bf16.mxu0 %v7878_v1 }
 0x5e6   : > { %7203 = vmatpush3.bf16.msra.mxu1 %v7812_v44 }
 0x5e7   : > { %7275 = vmatpush3.bf16.msra.mxu0 %v9320_v45  ;;  %7328 = vmatprep.subr.bf16.mxu1 %v7878_v1 }
 0x5e8   : > { %7276 = vmatprep.subr.bf16.mxu0 %v7878_v1 }
 0x5e9   : > { %7205 = vmatmul.mubr.bf16.vlgmr.msra.gmra.mrb[16].mxu1 %v3924_v47 }
 0x5ea   : > { %7329 = vmatpush3.bf16.msra.mxu1 %v7813_v46  ;;  %7344 = vmatprep.mubr.msk.bf16.mxu1 %vm7879_vm0, %v7878_v1 }
 0x5eb   : > { %7277 = vmatpush3.bf16.msra.mxu0 %v9331_v30  ;;  %7330 = vmatprep.subr.bf16.mxu1 %v7878_v1 }
 0x5ec   : > { %7278 = vmatprep.subr.bf16.mxu0 %v7878_v1 }
 0x5ee   : > { %7331 = vmatpush3.bf16.msra.mxu1 %v7814_v48 }
 0x5ef   : > { %7279 = vmatpush3.bf16.msra.mxu0 %v9344_v49  ;;  %7332 = vmatprep.subr.bf16.mxu1 %v7878_v1 }
 0x5f0   : > { %7280 = vmatprep.subr.bf16.mxu0 %v7878_v1 }
 0x5f2   : > { %7333 = vmatpush3.bf16.msra.mxu1 %v7816_v50 }
 0x5f3   : > { %7281 = vmatpush3.bf16.msra.mxu0 %v9357_v51  ;;  %7334 = vmatprep.subr.bf16.mxu1 %v7878_v1 }
 0x5f4   : > { %7282 = vmatprep.subr.bf16.mxu0 %v7878_v1 }
 0x5f6   : > { %7335 = vmatpush3.bf16.msra.mxu1 %v7818_v52 }
 0x5f7   : > { %7283 = vmatpush3.bf16.msra.mxu0 %v9368_v54  ;;  %7336 = vmatprep.subr.bf16.mxu1 %v7878_v1 }
 0x5f8   : > { %7288 = vmatprep.subr.bf16.mxu0 %v7878_v1 }
 0x5fa   : > { %7285 = vmatmul.mubr.bf16.vlgmr.msra.gmra.mrb[64].mxu0 %v4253_v56  ;;  %7337 = vmatpush3.bf16.msra.mxu1 %v7820_v55 }
 0x5fb   : > { %7289 = vmatpush3.bf16.msra.mxu0 %v9285_v28  ;;  %7338 = vmatprep.subr.bf16.mxu1 %v7878_v1 }
 0x5fc   : > { %7290 = vmatprep.subr.bf16.mxu0 %v7878_v1  ;;  %7304 = vmatprep.mubr.msk.bf16.mxu0 %vm7879_vm0, %v7878_v1 }
 0x5fe   : > { %7339 = vmatpush3.bf16.msra.mxu1 %v7822_v27 }
 0x5ff   : > { %7291 = vmatpush3.bf16.msra.mxu0 %v9296_v35  ;;  %7340 = vmatprep.subr.bf16.mxu1 %v7878_v1 }
 0x600   : > { %7292 = vmatprep.subr.bf16.mxu0 %v7878_v1 }
 0x602   : > { %7341 = vmatpush3.bf16.msra.mxu1 %v7824_v53 }
 0x603   : > { %7293 = vmatpush3.bf16.msra.mxu0 %v9309_v43  ;;  %7342 = vmatprep.subr.bf16.mxu1 %v7878_v1 }
 0x604   : > { %7294 = vmatprep.subr.bf16.mxu0 %v7878_v1 }
 0x606   : > { %7343 = vmatpush3.bf16.msra.mxu1 %v7826_v57 }
 0x607   : > { %7295 = vmatpush3.bf16.msra.mxu0 %v9320_v45  ;;  %7348 = vmatprep.subr.bf16.mxu1 %v7878_v1 }
 0x608   : > { %7296 = vmatprep.subr.bf16.mxu0 %v7878_v1 }
 0x609   : > { %7345 = vmatmul.mubr.bf16.vlgmr.msra.gmra.mrb[20].mxu1 %v8167_v9  ;;  %v7832_v9 = vld [vmem:[%s9630_s4 + $0x818] sm:$0xff]  }
 0x60a   : > { %7349 = vmatpush3.bf16.msra.mxu1 %v7828_v58  ;;  %7364 = vmatprep.mubr.msk.bf16.mxu1 %vm7879_vm0, %v7878_v1 }
 0x60b   : > { %7297 = vmatpush3.bf16.msra.mxu0 %v9331_v30  ;;  %7350 = vmatprep.subr.bf16.mxu1 %v7878_v1 }
 0x60c   : > { %7298 = vmatprep.subr.bf16.mxu0 %v7878_v1 }
 0x60e   : > { %7351 = vmatpush3.bf16.msra.mxu1 %v7830_v29 }
 0x60f   : > { %7299 = vmatpush3.bf16.msra.mxu0 %v9344_v49  ;;  %7352 = vmatprep.subr.bf16.mxu1 %v7878_v1 }
 0x610   : > { %7300 = vmatprep.subr.bf16.mxu0 %v7878_v1 }
 0x612   : > { %7353 = vmatpush3.bf16.msra.mxu1 %v7831_v59 }
 0x613   : > { %7301 = vmatpush3.bf16.msra.mxu0 %v9357_v51  ;;  %7354 = vmatprep.subr.bf16.mxu1 %v7878_v1 }
 0x614   : > { %7302 = vmatprep.subr.bf16.mxu0 %v7878_v1 }
 0x616   : > { %7355 = vmatpush3.bf16.msra.mxu1 %v7832_v9 }
 0x617   : > { %7303 = vmatpush3.bf16.msra.mxu0 %v9368_v54  ;;  %7356 = vmatprep.subr.bf16.mxu1 %v7878_v1 }
 0x618   : > { %7308 = vmatprep.subr.bf16.mxu0 %v7878_v1 }
 0x61a   : > { %7305 = vmatmul.mubr.bf16.vlgmr.msra.gmra.mrb[64].mxu0 %v4251_v62  ;;  %7357 = vmatpush3.bf16.msra.mxu1 %v7833_v60 }
 0x61b   : > { %7309 = vmatpush3.bf16.msra.mxu0 %v9285_v28  ;;  %7358 = vmatprep.subr.bf16.mxu1 %v7878_v1 }
 0x61c   : > { %7310 = vmatprep.subr.bf16.mxu0 %v7878_v1  ;;  %7324 = vmatprep.mubr.msk.bf16.mxu0 %vm7879_vm0, %v7878_v1 }
 0x61e   : > { %7359 = vmatpush3.bf16.msra.mxu1 %v7834_v63 }
 0x61f   : > { %7311 = vmatpush3.bf16.msra.mxu0 %v9296_v35  ;;  %7360 = vmatprep.subr.bf16.mxu1 %v7878_v1  ;;  %v7856_v35 = vld [vmem:[%s9630_s4 + $0x8e8] sm:$0xff]  }
 0x620   : > { %7312 = vmatprep.subr.bf16.mxu0 %v7878_v1 }
 0x622   : > { %7361 = vmatpush3.bf16.msra.mxu1 %v7835_v0  ;;  %v6039_v0 = vld [vmem:[%s9632_s6 + $0xa] ss:$0 sm:$0xff] }
 0x623   : > { %7313 = vmatpush3.bf16.msra.mxu0 %v9309_v43  ;;  %7362 = vmatprep.subr.bf16.mxu1 %v7878_v1  ;;  %v5804_v43 = vld [vmem:[%s9632_s6 + $0x7] ss:$0 sm:$0xff] }
 0x624   : > { %7314 = vmatprep.subr.bf16.mxu0 %v7878_v1 }
 0x626   : > { %7363 = vmatpush3.bf16.msra.mxu1 %v7836_v2 }
 0x627   : > { %7315 = vmatpush3.bf16.msra.mxu0 %v9320_v45  ;;  %7388 = vmatprep.subr.bf16.mxu1 %v7878_v1  ;;  %v5950_v45 = vld [vmem:[%s9632_s6 + $0x9] ss:$0 sm:$0xff] }
 0x628   : > { %7316 = vmatprep.subr.bf16.mxu0 %v7878_v1 }
 0x629   : > { %7365 = vmatmul.mubr.bf16.vlgmr.msra.gmra.mrb[24].mxu1 %v4430_v4 }
 0x62a   : > { %7404 = vmatprep.mubr.msk.bf16.mxu1 %vm7879_vm0, %v7878_v1  ;;  %7389 = vmatpush3.bf16.msra.mxu1 %v7845_v18  ;;  %v7866_v18 = vld [vmem:[%s9630_s4 + $0x968] sm:$0xff]  }
 0x62b   : > { %7317 = vmatpush3.bf16.msra.mxu0 %v9331_v30  ;;  %7390 = vmatprep.subr.bf16.mxu1 %v7878_v1 }
 0x62c   : > { %7318 = vmatprep.subr.bf16.mxu0 %v7878_v1 }
 0x62e   : > { %7391 = vmatpush3.bf16.msra.mxu1 %v7847_v20  ;;  %v7868_v20 = vld [vmem:[%s9630_s4 + $0x978] sm:$0xff]  }
 0x62f   : > { %7319 = vmatpush3.bf16.msra.mxu0 %v9344_v49  ;;  %7392 = vmatprep.subr.bf16.mxu1 %v7878_v1 }
 0x630   : > { %7320 = vmatprep.subr.bf16.mxu0 %v7878_v1 }
 0x632   : > { %7393 = vmatpush3.bf16.msra.mxu1 %v7849_v24 }
 0x633   : > { %7321 = vmatpush3.bf16.msra.mxu0 %v9357_v51  ;;  %7394 = vmatprep.subr.bf16.mxu1 %v7878_v1 }
 0x634   : > { %7322 = vmatprep.subr.bf16.mxu0 %v7878_v1 }
 0x636   : > { %7395 = vmatpush3.bf16.msra.mxu1 %v7851_v32 }
 0x637   : > { %7323 = vmatpush3.bf16.msra.mxu0 %v9368_v54  ;;  %7396 = vmatprep.subr.bf16.mxu1 %v7878_v1 }
 0x638   : > { %7368 = vmatprep.subr.bf16.mxu0 %v7878_v1 }
 0x63a   : > { %7325 = vmatmul.mubr.bf16.vlgmr.msra.gmra.mrb[64].mxu0 %v4383_v6  ;;  %7397 = vmatpush3.bf16.msra.mxu1 %v7853_v36 }
 0x63b   : > { %7369 = vmatpush3.bf16.msra.mxu0 %v7837_v5  ;;  %7384 = vmatprep.mubr.msk.bf16.mxu0 %vm7879_vm0, %v7878_v1 }
 0x63c   : > { %7370 = vmatprep.subr.bf16.mxu0 %v7878_v1  ;;  %7398 = vmatprep.subr.bf16.mxu1 %v7878_v1 }
 0x63e   : > { %7399 = vmatpush3.bf16.msra.mxu1 %v7855_v37 }
 0x63f   : > { %7371 = vmatpush3.bf16.msra.mxu0 %v7838_v7  ;;  %7400 = vmatprep.subr.bf16.mxu1 %v7878_v1 }
 0x640   : > { %7372 = vmatprep.subr.bf16.mxu0 %v7878_v1 }
 0x642   : > { %7401 = vmatpush3.bf16.msra.mxu1 %v7857_v19 }
 0x643   : > { %7373 = vmatpush3.bf16.msra.mxu0 %v7839_v8  ;;  %7402 = vmatprep.subr.bf16.mxu1 %v7878_v1  ;;  %v7861_v8 = vld [vmem:[%s9630_s4 + $0x940] sm:$0xff]  }
 0x644   : > { %7374 = vmatprep.subr.bf16.mxu0 %v7878_v1 }
 0x646   : > { %7403 = vmatpush3.bf16.msra.mxu1 %v7859_v33 }
 0x647   : > { %7375 = vmatpush3.bf16.msra.mxu0 %v7840_v10  ;;  %7428 = vmatprep.subr.bf16.mxu1 %v7878_v1 }
 0x648   : > { %7376 = vmatprep.subr.bf16.mxu0 %v7878_v1 }
 0x64b   : > { %7377 = vmatpush3.bf16.msra.mxu0 %v7841_v11  ;;  %v7862_v11 = vld [vmem:[%s9630_s4 + $0x948] sm:$0xff]  }
 0x64c   : > { %7378 = vmatprep.subr.bf16.mxu0 %v7878_v1 }
 0x64f   : > { %7379 = vmatpush3.bf16.msra.mxu0 %v7842_v12 }
 0x650   : > { %7380 = vmatprep.subr.bf16.mxu0 %v7878_v1 }
 0x653   : > { %7381 = vmatpush3.bf16.msra.mxu0 %v7843_v61  ;;  %v7863_v61 = vld [vmem:[%s9630_s4 + $0x950] sm:$0xff]  }
 0x654   : > { %7382 = vmatprep.subr.bf16.mxu0 %v7878_v1 }
 0x657   : > { %7383 = vmatpush3.bf16.msra.mxu0 %v7844_v13 }
 0x658   : > { %7408 = vmatprep.subr.bf16.mxu0 %v7878_v1 }
 0x65a   : > { %7385 = vmatmul.mubr.bf16.vlgmr.msra.gmra.mrb[68].mxu0 %v4644_v16  ;;  %v7865_v16 = vld [vmem:[%s9630_s4 + $0x960] sm:$0xff]  }
 0x65b   : > { %7424 = vmatprep.mubr.msk.bf16.mxu0 %vm7879_vm0, %v7878_v1  ;;  %7409 = vmatpush3.bf16.msra.mxu0 %v7846_v15  ;;  %v7867_v15 = vld [vmem:[%s9630_s4 + $0x970] sm:$0xff]  }
 0x65c   : > { %7410 = vmatprep.subr.bf16.mxu0 %v7878_v1 }
 0x65f   : > { %7411 = vmatpush3.bf16.msra.mxu0 %v7848_v22 }
 0x660   : > { %7412 = vmatprep.subr.bf16.mxu0 %v7878_v1 }
 0x663   : > { %7413 = vmatpush3.bf16.msra.mxu0 %v7850_v26 }
 0x664   : > { %7414 = vmatprep.subr.bf16.mxu0 %v7878_v1 }
 0x667   : > { %7415 = vmatpush3.bf16.msra.mxu0 %v7852_v34 }
 0x668   : > { %7416 = vmatprep.subr.bf16.mxu0 %v7878_v1 }
 0x66b   : > { %7417 = vmatpush3.bf16.msra.mxu0 %v7854_v42 }
 0x66c   : > { %7418 = vmatprep.subr.bf16.mxu0 %v7878_v1 }
 0x66f   : > { %7419 = vmatpush3.bf16.msra.mxu0 %v7856_v35 }
 0x670   : > { %7420 = vmatprep.subr.bf16.mxu0 %v7878_v1 }
 0x6ad   : > { %v4223_v38 = vpop.f32.mrb[60].mxu0 }
 0x6ae   : > { %v4231_v21 = vmul.f32 %v4230_v17, %v4223_v38  ;;  %v7266_v23 = vpop.f32.mrb[61].mxu0 }
 0x6af   : > { %v4226_v25 = vpop.f32.mrb[62].mxu0  ;;  %v6112_v23 = vld [vmem:[%s9632_s6 + $0xb] ss:$0 sm:$0xff] }
 0x6b0   : > { %v4232_v28 = vadd.f32 %v9224_v31, %v4231_v21  ;;  %v7267_v40 = vpop.f32.mrb[63].mxu0  ;;  %v7858_v31 = vld [vmem:[%s9630_s4 + $0x8f0] sm:$0xff]  }
 0x6b1   : > { %7421 = vmatpush3.bf16.msra.mxu0 %v7858_v31 }
 0x6b2   : > { %6115 = vst [vmem:[%s8096_s28 + $0x18] sm:$0xff] %v4232_v28  ;;  %7422 = vmatprep.subr.bf16.mxu0 %v7878_v1 }
 0x6b5   : > { %7423 = vmatpush3.bf16.msra.mxu0 %v7860_v41 }
 0x6bc   : > { %v4024_v44 = vpop.f32.mrb[16].mxu1 }
 0x6bd   : > { %v7450_v46 = vadd.f32 %v5804_v43, %v4024_v44  ;;  %v7206_v30 = vpop.f32.mrb[17].mxu1 }
 0x6be   : > { %v4027_v47 = vpop.f32.mrb[18].mxu1 }
 0x6bf   : > { %v7451_v48 = vadd.f32 %v7450_v46, %v5950_v45  ;;  %v7207_v49 = vpop.f32.mrb[19].mxu1 }
 0x6c1   : > { %6114 = vst [vmem:[%s8096_s28 + $0x10] sm:$0xff] %v7451_v48 }
 0x6dc   : > { %v4549_v50 = vpop.f32.mrb[20].mxu1 }
 0x6dd   : > { %v7346_v51 = vpop.f32.mrb[21].mxu1 }
 0x6de   : > { %v4552_v52 = vpop.f32.mrb[22].mxu1 }
 0x6df   : > { %v7347_v54 = vpop.f32.mrb[23].mxu1 }
 0x6fc   : > { %v4637_v55 = vpop.f32.mrb[24].mxu1 }
 0x6fd   : > { %v4638_v56 = vadd.f32 %v4637_v55, %v4549_v50  ;;  %v7366_v27 = vpop.f32.mrb[25].mxu1 }
 0x6fe   : > { %v4640_v53 = vpop.f32.mrb[26].mxu1 }
 0x6ff   : > { %v7367_v57 = vpop.f32.mrb[27].mxu1 }
 0x70d   : > { %v4418_v58 = vpop.f32.mrb[64].mxu0 }
 0x70e   : > { %v4426_v29 = vmul.f32 %v4418_v58, %v4230_v17  ;;  %v7326_v59 = vpop.f32.mrb[65].mxu0 }
 0x70f   : > { %v4421_v9 = vpop.f32.mrb[66].mxu0 }
 0x710   : > { %v4427_v60 = vmul.f32 2.0, %v4426_v29  ;;  %v7327_v62 = vpop.f32.mrb[67].mxu0 }
 0x712   : > { %6116 = vst [vmem:[%s8096_s28 + $0x20] sm:$0xff] %v4427_v60 }
 0x72d   : > { %v4744_v63 = vpop.f32.mrb[68].mxu0 }
 0x72e   : > { %v4750_v2 = vadd.f32 %v4744_v63, %v4638_v56  ;;  %v7386_v3 = vpop.f32.mrb[69].mxu0 }
 0x72f   : > { %v4747_v4 = vpop.f32.mrb[70].mxu0 }
 0x730   : > { %v4756_v5 = vadd.f32 %v6039_v0, %v4750_v2  ;;  %v7387_v6 = vpop.f32.mrb[71].mxu0 }
 0x732   : > { %v4757_v7 = vmax.f32 %v4756_v5, 0.0 }
 0x734   : > { %4758 = vst [vmem:[#allocation2 + $0x2] sm:$0xff] %v4757_v7  ;;  %v4779_v10 = vpack.c.bf16 %v4757_v7, %v4757_v7 }
 0x736   : > { %7405 = vmatmul.mubr.bf16.vlgmr.msra.gmra.mrb[28].mxu1 %v4779_v10 }
 0x737   : > { %7429 = vmatpush3.bf16.msra.mxu1 %v7861_v8  ;;  %7444 = vmatprep.mubr.msk.bf16.mxu1 %vm7879_vm0, %v7878_v1 }
 0x738   : > { %7430 = vmatprep.subr.bf16.mxu1 %v7878_v1 }
 0x73b   : > { %v4759_v12 = vld [vmem:[#allocation2 + $0x1] sm:$0xff]  ;;  %7431 = vmatpush3.bf16.msra.mxu1 %v7862_v11 }
 0x73c   : > { %v4760_v13 = vpack.c.bf16 %v4759_v12, %v4759_v12  ;;  %7432 = vmatprep.subr.bf16.mxu1 %v7878_v1  ;;  %v4973_v22 = vld [vmem:[#allocation2 + $0x3] sm:$0xff] }
 0x73d   : > { %v4974_v24 = vpack.c.bf16 %v4973_v22, %v4973_v22 }
 0x73e   : > { %7425 = vmatmul.mubr.bf16.vlgmr.msra.gmra.mrb[72].mxu0 %v4760_v13 }
 0x73f   : > { %7433 = vmatpush3.bf16.msra.mxu1 %v7863_v61 }
 0x740   : > { %7434 = vmatprep.subr.bf16.mxu1 %v7878_v1 }
 0x743   : > { %7435 = vmatpush3.bf16.msra.mxu1 %v7864_v14 }
 0x744   : > { %7436 = vmatprep.subr.bf16.mxu1 %v7878_v1 }
 0x747   : > { %7437 = vmatpush3.bf16.msra.mxu1 %v7865_v16 }
 0x748   : > { %7438 = vmatprep.subr.bf16.mxu1 %v7878_v1 }
 0x74b   : > { %7439 = vmatpush3.bf16.msra.mxu1 %v7866_v18 }
 0x74c   : > { %7440 = vmatprep.subr.bf16.mxu1 %v7878_v1 }
 0x74f   : > { %7441 = vmatpush3.bf16.msra.mxu1 %v7867_v15 }
 0x750   : > { %7442 = vmatprep.subr.bf16.mxu1 %v7878_v1 }
 0x753   : > { %7443 = vmatpush3.bf16.msra.mxu1 %v7868_v20 }
 0x756   : > { %7445 = vmatmul.mubr.bf16.vlgmr.msra.gmra.mrb[32].mxu1 %v4974_v24 }
 0x809   : > { %v4879_v26 = vpop.f32.mrb[28].mxu1 }
 0x80a   : > { %v7406_v32 = vpop.f32.mrb[29].mxu1 }
 0x80b   : > { %v4882_v34 = vpop.f32.mrb[30].mxu1 }
 0x80c   : > { %v7407_v36 = vpop.f32.mrb[31].mxu1 }
 0x811   : > { %v4967_v37 = vpop.f32.mrb[72].mxu0 }
 0x812   : > { %v4968_v17 = vadd.f32 %v4967_v37, %v4879_v26  ;;  %v7426_v19 = vpop.f32.mrb[73].mxu0 }
 0x813   : > { %v4970_v38 = vpop.f32.mrb[74].mxu0 }
 0x814   : > { %v7427_v42 = vpop.f32.mrb[75].mxu0 }
 0x829   : > { %v5074_v21 = vpop.f32.mrb[32].mxu1 }
 0x82a   : > { %v5080_v1 = vadd.f32 %v5074_v21, %v4968_v17  ;;  %v7446_v25 = vpop.f32.mrb[33].mxu1 }
 0x82b   : > { %v5077_v28 = vpop.f32.mrb[34].mxu1 }
 0x82c   : > { %v5086_v40 = vadd.f32 %v6112_v23, %v5080_v1  ;;  %v7447_v33 = vpop.f32.mrb[35].mxu1 }
 0x82e   : > { %v5087_v35 = vadd.f32 %v5086_v40, %v8077_v39 }
 0x830   : > { %6117 = vst [vmem:[%s8096_s28 + $0x28] sm:$0xff] %v5087_v35 }
 0x831 PF: > { %s18_s27 = sadd.s32 1, %s7876_s27  }
 0x832   : > { %p15_p4 = scmp.ge.s32.totalorder %s18_s27, 4  }
 0x834   :  { %17 = sbr.rel (!%p15_p4) target bundleno = 1 (0x1), region = 127 }

</bundles_post_ra>
